<compile_context>
chip_gen: v7x
topology: tpu7x:2x2x1
jax: 0.10.0
libtpu: 0.0.40
codegen_flags: <defaults>
</compile_context>

<pallas_src>
import jax
import jax.numpy as jnp
from jax import lax
from jax.experimental import pallas as pl
from jax.experimental.pallas import tpu as pltpu

BN_EPS = 1e-5
ACT_DTYPE = jnp.bfloat16          # inter-layer activations / big weight slabs
ACT_BYTES = 2
DEFAULT_VMEM_BUDGET = 24 << 20    # per-tile working-set target (fits v7x 64 MiB/TC)
VMEM_LIMIT_BYTES = 48 << 20       # Mosaic scoped-VMEM limit (< 64 MiB v7x physical)
IM2COL_MAX_K = 1024               # single K=9*cin contraction when 9*cin <= this


# --------------------------------------------------------------------------
# host-side helpers
# --------------------------------------------------------------------------
def _fold_bn(w_hwio, conv_bias, bn):
    """Fold eval-mode BN into conv weight/bias.  w_hwio: (3, 3, Cin, Cout)."""
    s = bn["gamma"] * lax.rsqrt(bn["var"] + BN_EPS)           # (Cout,)
    w_f = w_hwio * s
    b = conv_bias if conv_bias is not None else 0.0
    b_f = (b - bn["mean"]) * s + bn["beta"]
    return w_f, b_f


def _space_to_depth2(x):
    """(B, H, W, C) -> (B, H//2, W//2, 4C); phase (a, b) -> channel block a*2+b."""
    B, H, W, C = x.shape
    x = x.reshape(B, H // 2, 2, W // 2, 2, C)
    x = jnp.transpose(x, (0, 1, 3, 2, 4, 5))
    return x.reshape(B, H // 2, W // 2, 4 * C)


def _pick_row_tile(h_out, cost_fn, budget, *, halo, extra_ok):
    """Largest legal divisor of h_out whose estimated VMEM working set fits."""
    cands = [th for th in range(h_out, 0, -1)
             if h_out % th == 0 and th % halo == 0 and extra_ok(th)]
    assert cands, "no legal row tile"
    for th in cands:                      # descending -> biggest tile first
        if cost_fn(th) <= budget:
            return th
    return cands[-1]


# --------------------------------------------------------------------------
# fused Conv3x3 (+ folded BN) + ReLU kernel (multi-input = fused channel concat)
# --------------------------------------------------------------------------
def _conv_kernel_factory(jobs, th, w_out, c_out, n_feats, halo, use_im2col):
    rows = th * w_out

    def kernel(*args):
        nf2 = 2 * n_feats
        w_ref, b_ref, o_ref = args[nf2], args[nf2 + 1], args[nf2 + 2]
        xf_refs = args[nf2 + 3: nf2 + 3 + n_feats]

        # Stitch each feature's main rows + bottom halo rows into one VMEM slab
        # so every tap is a plain unit-stride slice (halo read straight from HBM,
        # no host-side overlapping-tile copy).
        for f in range(n_feats):
            xf_refs[f][0:th] = args[2 * f][0]
            xf_refs[f][th:th + halo] = args[2 * f + 1][0]

        if use_im2col:
            # Small-Cin layers: one K = 9*cin MXU contraction; accumulation stays
            # inside the MXU instead of 9 accumulator read-modify-write passes.
            col_ref = args[nf2 + 3 + n_feats]
            off = 0
            for tap in jobs:
                for (f, ro, co, ch, clen, _wrow) in tap:
                    patch = xf_refs[f][ro:ro + th, co:co + w_out, ch:ch + clen]
                    col_ref[:, off:off + clen] = (
                        patch.reshape(rows, clen).astype(jnp.float32))
                    off += clen
            acc = jnp.dot(col_ref[...], w_ref[...],
                          preferred_element_type=jnp.float32)
        else:
            # Large-Cin fusion layers: 9-tap (x n_inputs) bf16 MXU accumulation.
            # TODO(synk): chunk acc over c_out / rows for production-size tiles.
            acc = jnp.zeros((rows, c_out), jnp.float32)
            for tap in jobs:
                for (f, ro, co, ch, clen, wrow) in tap:
                    patch = xf_refs[f][ro:ro + th, co:co + w_out, ch:ch + clen]
                    acc = acc + jnp.dot(patch.reshape(rows, clen),
                                        w_ref[wrow:wrow + clen, :],
                                        preferred_element_type=jnp.float32)

        y = jnp.maximum(acc + b_ref[...], 0.0)          # folded-BN bias + ReLU
        o_ref[...] = y.reshape(1, rows, c_out).astype(o_ref.dtype)
    return kernel


def conv3x3_bn_relu(inputs, layer, *, stride, budget=DEFAULT_VMEM_BUDGET):
    """Fused Conv3x3 + folded-BN + ReLU.

    `inputs` is a list of NHWC bf16 tensors that are concatenated along the
    channel axis *inside the kernel* (fused FusionBlock concat), in list order.
    Returns (B, H/stride, W/stride, Cout) bf16.
    """
    B, H, W = inputs[0].shape[:3]
    cins = [int(x.shape[-1]) for x in inputs]
    cin_total = sum(cins)
    assert int(layer["w"].shape[2]) == cin_total
    w_f, b_f = _fold_bn(layer["w"], layer.get("b"), layer)
    c_out = int(w_f.shape[-1])

    if stride == 1:
        assert H % 2 == 0
        h_out, w_out, halo = H, W, 2
        feats = [jnp.pad(x, ((0, 0), (1, 1), (1, 1), (0, 0))) for x in inputs]
        offs, off = [], 0
        for c in cins:
            offs.append(off)
            off += c
        jobs = []
        for dy in range(3):
            for dx in range(3):
                tp = dy * 3 + dx
                jobs.append([(f, dy, dx, 0, cins[f], tp * cin_total + offs[f])
                             for f in range(len(inputs))])
    elif stride == 2:
        assert len(inputs) == 1 and H % 2 == 0 and W % 2 == 0
        h_out, w_out, halo = H // 2, W // 2, 1
        cin = cins[0]
        feats = [_space_to_depth2(
            jnp.pad(inputs[0], ((0, 0), (1, 1), (1, 1), (0, 0))))]
        jobs = []
        for dy in range(3):
            for dx in range(3):
                tp = dy * 3 + dx
                phase = (dy % 2) * 2 + (dx % 2)
                jobs.append([(0, dy // 2, dx // 2, phase * cin, cin, tp * cin)])
    else:
        raise ValueError(f"unsupported stride {stride}")

    Kw = 9 * cin_total
    use_im2col = Kw <= IM2COL_MAX_K
    w_dtype = jnp.float32 if use_im2col else ACT_DTYPE
    w_bytes = 4 if use_im2col else ACT_BYTES
    w2d = w_f.reshape(Kw, c_out).astype(w_dtype)
    bias = b_f.reshape(1, c_out).astype(jnp.float32)

    n_feats = len(feats)
    max_clen = max(clen for tap in jobs for (_, _, _, _, clen, _) in tap)

    def tile_cost(th):  # double-buffered blocks + scratch + weights + acc
        c = 0
        for p in feats:
            wp_, ck_ = int(p.shape[2]), int(p.shape[3])
            c += (2 * th + 2 * halo + (th + halo)) * wp_ * ck_ * ACT_BYTES
        c += 2 * Kw * c_out * w_bytes
        c += 2 * th * w_out * c_out * ACT_BYTES
        c += th * w_out * c_out * 4
        c += th * w_out * (Kw * 4 if use_im2col else max_clen * ACT_BYTES)
        return c

    th = _pick_row_tile(
        h_out, tile_cost, budget, halo=halo,
        extra_ok=lambda t: t == h_out or (t * w_out) % 8 == 0)
    n_tiles = h_out // th
    step = th // halo

    in_specs, operands = [], []
    for p in feats:
        wp_, ck_ = int(p.shape[2]), int(p.shape[3])
        in_specs.append(pl.BlockSpec((1, th, wp_, ck_),
                                     lambda b, t: (b, t, 0, 0)))
        in_specs.append(pl.BlockSpec((1, halo, wp_, ck_),
                                     lambda b, t, s=step: (b, (t + 1) * s, 0, 0)))
        operands += [p, p]         # same HBM array feeds main block and halo block
    in_specs += [pl.BlockSpec((Kw, c_out), lambda b, t: (0, 0)),
                 pl.BlockSpec((1, c_out), lambda b, t: (0, 0))]

    scratch = [pltpu.VMEM((th + halo, int(p.shape[2]), int(p.shape[3])), ACT_DTYPE)
               for p in feats]
    if use_im2col:
        scratch.append(pltpu.VMEM((th * w_out, Kw), jnp.float32))

    out = pl.pallas_call(
        _conv_kernel_factory(jobs, th, w_out, c_out, n_feats, halo, use_im2col),
        out_shape=jax.ShapeDtypeStruct((B, h_out * w_out, c_out), ACT_DTYPE),
        grid=(B, n_tiles),
        in_specs=in_specs,
        out_specs=pl.BlockSpec((1, th * w_out, c_out), lambda b, t: (b, t, 0)),
        scratch_shapes=scratch,
        compiler_params=pltpu.CompilerParams(
            dimension_semantics=("parallel", "parallel"),
            vmem_limit_bytes=VMEM_LIMIT_BYTES),
    )(*operands, w2d, bias)
    return out.reshape(B, h_out, w_out, c_out)


# --------------------------------------------------------------------------
# fused MattingHead kernel: conv3x3(32->16)+BN+ReLU + conv1x1(16->1) + sigmoid
# --------------------------------------------------------------------------
def _head_kernel_factory(th, w_out, c_in, c_mid, halo):
    rows = th * w_out

    def kernel(xm_ref, xh_ref, w1_ref, b1_ref, w2b2_ref, o_ref, xf_ref, col_ref):
        xf_ref[0:th] = xm_ref[0]
        xf_ref[th:th + halo] = xh_ref[0]
        off = 0
        for dy in range(3):
            for dx in range(3):
                patch = xf_ref[dy:dy + th, dx:dx + w_out, :]
                col_ref[:, off:off + c_in] = (
                    patch.reshape(rows, c_in).astype(jnp.float32))
                off += c_in
        y = jnp.dot(col_ref[...], w1_ref[...], preferred_element_type=jnp.float32)
        y = jnp.maximum(y + b1_ref[...], 0.0)                         # (rows, 16)
        w2 = w2b2_ref[:, :c_mid]                                      # (1, 16)
        b2 = w2b2_ref[:, c_mid:]                                      # (1, 1)
        # 1x1 conv as a lane-dense (1,16)@(16,rows) contraction + stable sigmoid.
        logits = jnp.dot(w2, y.T, preferred_element_type=jnp.float32) + b2
        z = jnp.exp(-jnp.abs(logits))
        o_ref[...] = jnp.where(logits >= 0.0, 1.0 / (1.0 + z), z / (1.0 + z))
    return kernel


def matting_head(x, head, *, budget=DEFAULT_VMEM_BUDGET):
    """x: (B, H, W, 32) NHWC bf16 -> (B, 1, H, W) f32 alpha matte in (0, 1)."""
    B, H, W, c_in = x.shape
    assert H % 2 == 0
    c_mid = int(head["w1"].shape[-1])
    w1_f, b1_f = _fold_bn(head["w1"], head["b1"], head)
    w1_k = w1_f.reshape(9 * c_in, c_mid).astype(jnp.float32)          # K = 288
    b1 = b1_f.reshape(1, c_mid).astype(jnp.float32)
    w2b2 = jnp.concatenate([head["w2"].reshape(c_mid), head["b2"].reshape(1)])
    w2b2 = w2b2.reshape(1, c_mid + 1).astype(jnp.float32)

    x_pad = jnp.pad(x, ((0, 0), (1, 1), (1, 1), (0, 0)))
    wp = W + 2
    halo = 2

    def tile_cost(th):
        return ((2 * th + 2 * halo + (th + halo)) * wp * c_in * ACT_BYTES
                + th * W * 9 * c_in * 4           # f32 im2col slab
                + th * W * c_mid * 4              # mid activations
                + 2 * th * W * 4                  # output (double-buffered)
                + 2 * 9 * c_in * c_mid * 4)

    th = _pick_row_tile(H, tile_cost, budget, halo=halo,
                        extra_ok=lambda t: t == H or (t * W) % 128 == 0)
    n_tiles = H // th
    step = th // halo

    out = pl.pallas_call(
        _head_kernel_factory(th, W, c_in, c_mid, halo),
        out_shape=jax.ShapeDtypeStruct((B, H * W), jnp.float32),
        grid=(B, n_tiles),
        in_specs=[
            pl.BlockSpec((1, th, wp, c_in), lambda b, t: (b, t, 0, 0)),
            pl.BlockSpec((1, halo, wp, c_in),
                         lambda b, t, s=step: (b, (t + 1) * s, 0, 0)),
            pl.BlockSpec((9 * c_in, c_mid), lambda b, t: (0, 0)),
            pl.BlockSpec((1, c_mid), lambda b, t: (0, 0)),
            pl.BlockSpec((1, c_mid + 1), lambda b, t: (0, 0)),
        ],
        out_specs=pl.BlockSpec((1, th * W), lambda b, t: (b, t)),
        scratch_shapes=[pltpu.VMEM((th + halo, wp, c_in), x.dtype),
                        pltpu.VMEM((th * W, 9 * c_in), jnp.float32)],
        compiler_params=pltpu.CompilerParams(
            dimension_semantics=("parallel", "parallel"),
            vmem_limit_bytes=VMEM_LIMIT_BYTES),
    )(x_pad, x_pad, w1_k, b1, w2b2)
    return out.reshape(B, 1, H, W)


# --------------------------------------------------------------------------
# host-level glue (upsample stays in XLA) and the full forward pass
# --------------------------------------------------------------------------
def upsample2x_bilinear(x):
    """NHWC bilinear x2 upsample, align_corners=False (matches F.interpolate)."""
    def up(v, axis):
        n = v.shape[axis]
        left = jnp.clip(jnp.arange(n) - 1, 0, n - 1)
        right = jnp.clip(jnp.arange(n) + 1, 0, n - 1)
        v_l = jnp.take(v, left, axis=axis)
        v_r = jnp.take(v, right, axis=axis)
        even = 0.25 * v_l + 0.75 * v
        odd = 0.75 * v + 0.25 * v_r
        out = jnp.stack([even, odd], axis=axis + 1)
        shape = list(v.shape)
        shape[axis] = 2 * n
        return out.reshape(shape)
    return up(up(x, 1), 2)


def detail_capture_forward(features_nchw, images_nchw, params,
                           budget=DEFAULT_VMEM_BUDGET):
    """features: (B, 384, H/16, W/16), images: (B, 4, H, W) -> (B, 1, H, W)."""
    feats = jnp.transpose(features_nchw, (0, 2, 3, 1)).astype(ACT_DTYPE)
    img = jnp.transpose(images_nchw, (0, 2, 3, 1)).astype(ACT_DTYPE)

    details = [img]
    d = img
    for layer in params["convstream"]:
        d = conv3x3_bn_relu([d], layer, stride=2, budget=budget)
        details.append(d)

    y = feats
    n_fuse = len(params["fusion"])
    for i, layer in enumerate(params["fusion"]):
        skip = details[n_fuse - i - 1]
        # concat is fused into the conv kernel; only the x2 upsample stays in XLA.
        y = conv3x3_bn_relu([skip, upsample2x_bilinear(y)], layer,
                            stride=1, budget=budget)

    return matting_head(y, params["head"], budget=budget)


# --------------------------------------------------------------------------
# pure-JAX (XLA conv, f32) reference for correctness checking
# --------------------------------------------------------------------------
def _ref_conv_bn_relu(x, layer, stride):
    y = lax.conv_general_dilated(
        x, layer["w"], (stride, stride), ((1, 1), (1, 1)),
        dimension_numbers=("NHWC", "HWIO", "NHWC"))
    if layer.get("b") is not None:
        y = y + layer["b"]
    inv = lax.rsqrt(layer["var"] + BN_EPS)
    y = (y - layer["mean"]) * inv * layer["gamma"] + layer["beta"]
    return jnp.maximum(y, 0.0)


def _ref_matting_head(x, head):
    y = lax.conv_general_dilated(
        x, head["w1"], (1, 1), ((1, 1), (1, 1)),
        dimension_numbers=("NHWC", "HWIO", "NHWC")) + head["b1"]
    inv = lax.rsqrt(head["var"] + BN_EPS)
    y = (y - head["mean"]) * inv * head["gamma"] + head["beta"]
    y = jnp.maximum(y, 0.0)
    logits = jnp.einsum("bhwc,c->bhw", y, head["w2"].reshape(-1)) + head["b2"][0]
    return jax.nn.sigmoid(logits)[:, None, :, :]


def _ref_detail_capture(features_nchw, images_nchw, params):
    feats = jnp.transpose(features_nchw, (0, 2, 3, 1))
    img = jnp.transpose(images_nchw, (0, 2, 3, 1))
    details = [img]
    d = img
    for layer in params["convstream"]:
        d = _ref_conv_bn_relu(d, layer, 2)
        details.append(d)
    y = feats
    for i, layer in enumerate(params["fusion"]):
        skip = details[len(params["fusion"]) - i - 1]
        y = _ref_conv_bn_relu(
            jnp.concatenate([skip, upsample2x_bilinear(y)], axis=-1), layer, 1)
    return _ref_matting_head(y, params["head"])


# --------------------------------------------------------------------------
# parameters
# --------------------------------------------------------------------------
def make_params(key):
    def nxt():
        nonlocal key
        key, sub = jax.random.split(key)
        return sub

    def bn(cout):
        return {
            "gamma": 1.0 + 0.1 * jax.random.normal(nxt(), (cout,), jnp.float32),
            "beta": 0.1 * jax.random.normal(nxt(), (cout,), jnp.float32),
            "mean": 0.1 * jax.random.normal(nxt(), (cout,), jnp.float32),
            "var": 0.5 + jnp.abs(jax.random.normal(nxt(), (cout,), jnp.float32)),
        }

    def conv_bn(cin, cout):
        p = {"w": jax.random.normal(nxt(), (3, 3, cin, cout), jnp.float32)
                  * (2.0 / (9 * cin)) ** 0.5}
        p.update(bn(cout))
        return p

    params = {
        "convstream": [conv_bn(ci, co) for ci, co in [(4, 48), (48, 96), (96, 192)]],
        "fusion": [conv_bn(ci, co)
                   for ci, co in [(576, 256), (352, 128), (176, 64), (68, 32)]],
    }
    head = {
        "w1": jax.random.normal(nxt(), (3, 3, 32, 16), jnp.float32) * (2.0 / 288) ** 0.5,
        "b1": 0.1 * jax.random.normal(nxt(), (16,), jnp.float32),
    }
    head.update(bn(16))
    head["w2"] = jax.random.normal(nxt(), (16,), jnp.float32) * 0.25
    head["b2"] = 0.1 * jax.random.normal(nxt(), (1,), jnp.float32)
    params["head"] = head
    return params


# --------------------------------------------------------------------------
if __name__ == "__main__":
    key = jax.random.PRNGKey(0)
    k_feat, k_img, k_par = jax.random.split(key, 3)

    B, H, W = 2, 32, 32                                   # images: (B, 4, H, W)
    images = jax.random.normal(k_img, (B, 4, H, W), jnp.float32)
    features = jax.random.normal(k_feat, (B, 384, H // 16, W // 16), jnp.float32)
    params = make_params(k_par)

    out = detail_capture_forward(features, images, params)
    out = jax.block_until_ready(out)
    assert out.shape == (B, 1, H, W), out.shape

    ref = jax.block_until_ready(_ref_detail_capture(features, images, params))
    err = float(jnp.max(jnp.abs(out - ref)))
    # bf16 activations/weight slabs (f32 MXU accumulate) vs the all-f32 XLA
    # reference give ~1-2% relative logit noise over 8 layers; post-sigmoid that
    # is <~0.02 abs, while a structural bug would show errors of ~0.3+.
    assert err < 5e-2, err
    print("KERNEL_OK")
</pallas_src>

<mosaic_0001>
module attributes {stable_mosaic.version = 11 : i64} {
  func.func @kernel(%arg0: i32, %arg1: i32, %arg2: memref<1x16x17x16xbf16, #tpu.memory_space<vmem>>, %arg3: memref<1x1x17x16xbf16, #tpu.memory_space<vmem>>, %arg4: memref<36x48xf32, #tpu.memory_space<vmem>>, %arg5: memref<1x48xf32, #tpu.memory_space<vmem>>, %arg6: memref<1x256x48xbf16, #tpu.memory_space<vmem>>, %arg7: memref<17x17x16xbf16, #tpu.memory_space<vmem>>, %arg8: memref<256x36xf32, #tpu.memory_space<vmem>>) attributes {dimension_semantics = [#tpu.dimension_semantics<parallel>, #tpu.dimension_semantics<parallel>], iteration_bounds = array<i64: 2, 1>, scalar_prefetch = 0 : i64, scratch_operands = 2 : i64, tpu.core_type = #tpu.core_type<tc>, window_params = [{transform_indices = @transform_0, window_bounds = array<i64: 1, 16, 17, 16>}, {transform_indices = @transform_1, window_bounds = array<i64: 1, 1, 17, 16>}, {pipeline_mode = #tpu.pipeline_mode<synchronous>, transform_indices = @transform_2, window_bounds = array<i64: 36, 48>}, {pipeline_mode = #tpu.pipeline_mode<synchronous>, transform_indices = @transform_3, window_bounds = array<i64: 1, 48>}, {transform_indices = @transform_4, window_bounds = array<i64: 1, 256, 48>}]} {
    %c0 = arith.constant 0 : index
    %c0_0 = arith.constant 0 : index
    %c0_1 = arith.constant 0 : index
    %c0_2 = arith.constant 0 : index
    %0 = vector.load %arg2[%c0, %c0_0, %c0_1, %c0_2] : memref<1x16x17x16xbf16, #tpu.memory_space<vmem>>, vector<1x16x17x16xbf16>
    %1 = vector.shape_cast %0 : vector<1x16x17x16xbf16> to vector<16x17x16xbf16>
    %c0_3 = arith.constant 0 : index
    %c0_4 = arith.constant 0 : index
    %c0_5 = arith.constant 0 : index
    %2 = vector.load %arg7[%c0_3, %c0_4, %c0_5] : memref<17x17x16xbf16, #tpu.memory_space<vmem>>, vector<16x17x16xbf16>
    tpu.vector_store %arg7[%c0_3, %c0_4, %c0_5], %1 {strides = array<i32>} : memref<17x17x16xbf16, #tpu.memory_space<vmem>>, vector<16x17x16xbf16>,
    %c0_6 = arith.constant 0 : index
    %c0_7 = arith.constant 0 : index
    %c0_8 = arith.constant 0 : index
    %c0_9 = arith.constant 0 : index
    %3 = vector.load %arg3[%c0_6, %c0_7, %c0_8, %c0_9] : memref<1x1x17x16xbf16, #tpu.memory_space<vmem>>, vector<1x1x17x16xbf16>
    %4 = vector.shape_cast %3 : vector<1x1x17x16xbf16> to vector<1x17x16xbf16>
    %c16 = arith.constant 16 : index
    %c0_10 = arith.constant 0 : index
    %c0_11 = arith.constant 0 : index
    %5 = vector.load %arg7[%c16, %c0_10, %c0_11] : memref<17x17x16xbf16, #tpu.memory_space<vmem>>, vector<1x17x16xbf16>
    tpu.vector_store %arg7[%c16, %c0_10, %c0_11], %4 {strides = array<i32>} : memref<17x17x16xbf16, #tpu.memory_space<vmem>>, vector<1x17x16xbf16>,
    %c0_12 = arith.constant 0 : index
    %c0_13 = arith.constant 0 : index
    %c0_14 = arith.constant 0 : index
    %6 = vector.load %arg7[%c0_12, %c0_13, %c0_14] : memref<17x17x16xbf16, #tpu.memory_space<vmem>>, vector<16x16x4xbf16>
    %7 = vector.shape_cast %6 : vector<16x16x4xbf16> to vector<256x4xbf16>
    %8 = arith.extf %7 : vector<256x4xbf16> to vector<256x4xf32>
    %c0_15 = arith.constant 0 : index
    %c0_16 = arith.constant 0 : index
    %9 = vector.load %arg8[%c0_15, %c0_16] : memref<256x36xf32, #tpu.memory_space<vmem>>, vector<256x4xf32>
    tpu.vector_store %arg8[%c0_15, %c0_16], %8 {strides = array<i32>} : memref<256x36xf32, #tpu.memory_space<vmem>>, vector<256x4xf32>,
    %c0_17 = arith.constant 0 : index
    %c0_18 = arith.constant 0 : index
    %c4 = arith.constant 4 : index
    %10 = vector.load %arg7[%c0_17, %c0_18, %c4] : memref<17x17x16xbf16, #tpu.memory_space<vmem>>, vector<16x16x4xbf16>
    %11 = vector.shape_cast %10 : vector<16x16x4xbf16> to vector<256x4xbf16>
    %12 = arith.extf %11 : vector<256x4xbf16> to vector<256x4xf32>
    %c0_19 = arith.constant 0 : index
    %c4_20 = arith.constant 4 : index
    %13 = vector.load %arg8[%c0_19, %c4_20] : memref<256x36xf32, #tpu.memory_space<vmem>>, vector<256x4xf32>
    tpu.vector_store %arg8[%c0_19, %c4_20], %12 {strides = array<i32>} : memref<256x36xf32, #tpu.memory_space<vmem>>, vector<256x4xf32>,
    %c0_21 = arith.constant 0 : index
    %c1 = arith.constant 1 : index
    %c0_22 = arith.constant 0 : index
    %14 = vector.load %arg7[%c0_21, %c1, %c0_22] : memref<17x17x16xbf16, #tpu.memory_space<vmem>>, vector<16x16x4xbf16>
    %15 = vector.shape_cast %14 : vector<16x16x4xbf16> to vector<256x4xbf16>
    %16 = arith.extf %15 : vector<256x4xbf16> to vector<256x4xf32>
    %c0_23 = arith.constant 0 : index
    %c8 = arith.constant 8 : index
    %17 = vector.load %arg8[%c0_23, %c8] : memref<256x36xf32, #tpu.memory_space<vmem>>, vector<256x4xf32>
    tpu.vector_store %arg8[%c0_23, %c8], %16 {strides = array<i32>} : memref<256x36xf32, #tpu.memory_space<vmem>>, vector<256x4xf32>,
    %c0_24 = arith.constant 0 : index
    %c0_25 = arith.constant 0 : index
    %c8_26 = arith.constant 8 : index
    %18 = vector.load %arg7[%c0_24, %c0_25, %c8_26] : memref<17x17x16xbf16, #tpu.memory_space<vmem>>, vector<16x16x4xbf16>
    %19 = vector.shape_cast %18 : vector<16x16x4xbf16> to vector<256x4xbf16>
    %20 = arith.extf %19 : vector<256x4xbf16> to vector<256x4xf32>
    %c0_27 = arith.constant 0 : index
    %c12 = arith.constant 12 : index
    %21 = vector.load %arg8[%c0_27, %c12] : memref<256x36xf32, #tpu.memory_space<vmem>>, vector<256x4xf32>
    tpu.vector_store %arg8[%c0_27, %c12], %20 {strides = array<i32>} : memref<256x36xf32, #tpu.memory_space<vmem>>, vector<256x4xf32>,
    %c0_28 = arith.constant 0 : index
    %c0_29 = arith.constant 0 : index
    %c12_30 = arith.constant 12 : index
    %22 = vector.load %arg7[%c0_28, %c0_29, %c12_30] : memref<17x17x16xbf16, #tpu.memory_space<vmem>>, vector<16x16x4xbf16>
    %23 = vector.shape_cast %22 : vector<16x16x4xbf16> to vector<256x4xbf16>
    %24 = arith.extf %23 : vector<256x4xbf16> to vector<256x4xf32>
    %c0_31 = arith.constant 0 : index
    %c16_32 = arith.constant 16 : index
    %25 = vector.load %arg8[%c0_31, %c16_32] : memref<256x36xf32, #tpu.memory_space<vmem>>, vector<256x4xf32>
    tpu.vector_store %arg8[%c0_31, %c16_32], %24 {strides = array<i32>} : memref<256x36xf32, #tpu.memory_space<vmem>>, vector<256x4xf32>,
    %c0_33 = arith.constant 0 : index
    %c1_34 = arith.constant 1 : index
    %c8_35 = arith.constant 8 : index
    %26 = vector.load %arg7[%c0_33, %c1_34, %c8_35] : memref<17x17x16xbf16, #tpu.memory_space<vmem>>, vector<16x16x4xbf16>
    %27 = vector.shape_cast %26 : vector<16x16x4xbf16> to vector<256x4xbf16>
    %28 = arith.extf %27 : vector<256x4xbf16> to vector<256x4xf32>
    %c0_36 = arith.constant 0 : index
    %c20 = arith.constant 20 : index
    %29 = vector.load %arg8[%c0_36, %c20] : memref<256x36xf32, #tpu.memory_space<vmem>>, vector<256x4xf32>
    tpu.vector_store %arg8[%c0_36, %c20], %28 {strides = array<i32>} : memref<256x36xf32, #tpu.memory_space<vmem>>, vector<256x4xf32>,
    %c1_37 = arith.constant 1 : index
    %c0_38 = arith.constant 0 : index
    %c0_39 = arith.constant 0 : index
    %30 = vector.load %arg7[%c1_37, %c0_38, %c0_39] : memref<17x17x16xbf16, #tpu.memory_space<vmem>>, vector<16x16x4xbf16>
    %31 = vector.shape_cast %30 : vector<16x16x4xbf16> to vector<256x4xbf16>
    %32 = arith.extf %31 : vector<256x4xbf16> to vector<256x4xf32>
    %c0_40 = arith.constant 0 : index
    %c24 = arith.constant 24 : index
    %33 = vector.load %arg8[%c0_40, %c24] : memref<256x36xf32, #tpu.memory_space<vmem>>, vector<256x4xf32>
    tpu.vector_store %arg8[%c0_40, %c24], %32 {strides = array<i32>} : memref<256x36xf32, #tpu.memory_space<vmem>>, vector<256x4xf32>,
    %c1_41 = arith.constant 1 : index
    %c0_42 = arith.constant 0 : index
    %c4_43 = arith.constant 4 : index
    %34 = vector.load %arg7[%c1_41, %c0_42, %c4_43] : memref<17x17x16xbf16, #tpu.memory_space<vmem>>, vector<16x16x4xbf16>
    %35 = vector.shape_cast %34 : vector<16x16x4xbf16> to vector<256x4xbf16>
    %36 = arith.extf %35 : vector<256x4xbf16> to vector<256x4xf32>
    %c0_44 = arith.constant 0 : index
    %c28 = arith.constant 28 : index
    %37 = vector.load %arg8[%c0_44, %c28] : memref<256x36xf32, #tpu.memory_space<vmem>>, vector<256x4xf32>
    tpu.vector_store %arg8[%c0_44, %c28], %36 {strides = array<i32>} : memref<256x36xf32, #tpu.memory_space<vmem>>, vector<256x4xf32>,
    %c1_45 = arith.constant 1 : index
    %c1_46 = arith.constant 1 : index
    %c0_47 = arith.constant 0 : index
    %38 = vector.load %arg7[%c1_45, %c1_46, %c0_47] : memref<17x17x16xbf16, #tpu.memory_space<vmem>>, vector<16x16x4xbf16>
    %39 = vector.shape_cast %38 : vector<16x16x4xbf16> to vector<256x4xbf16>
    %40 = arith.extf %39 : vector<256x4xbf16> to vector<256x4xf32>
    %c0_48 = arith.constant 0 : index
    %c32 = arith.constant 32 : index
    %41 = vector.load %arg8[%c0_48, %c32] : memref<256x36xf32, #tpu.memory_space<vmem>>, vector<256x4xf32>
    tpu.vector_store %arg8[%c0_48, %c32], %40 {strides = array<i32>} : memref<256x36xf32, #tpu.memory_space<vmem>>, vector<256x4xf32>,
    %c0_49 = arith.constant 0 : index
    %c0_50 = arith.constant 0 : index
    %42 = vector.load %arg8[%c0_49, %c0_50] : memref<256x36xf32, #tpu.memory_space<vmem>>, vector<256x36xf32>
    %c0_51 = arith.constant 0 : index
    %c0_52 = arith.constant 0 : index
    %43 = vector.load %arg4[%c0_51, %c0_52] : memref<36x48xf32, #tpu.memory_space<vmem>>, vector<36x48xf32>
    %cst = arith.constant dense<0.000000e+00> : vector<256x48xf32>
    %44 = tpu.matmul %42, %43, %cst {dimension_numbers = #tpu.dot_dimension_numbers<[1], [0], [0], [1], [0, 0, 1, 1], [], []>} : vector<256x36xf32>, vector<36x48xf32>, vector<256x48xf32> -> vector<256x48xf32>
    %c0_53 = arith.constant 0 : index
    %c0_54 = arith.constant 0 : index
    %45 = vector.load %arg5[%c0_53, %c0_54] : memref<1x48xf32, #tpu.memory_space<vmem>>, vector<1x48xf32>
    %46 = vector.broadcast %45 : vector<1x48xf32> to vector<256x48xf32>
    %47 = arith.addf %44, %46 : vector<256x48xf32>
    %cst_55 = arith.constant 0.000000e+00 : f32
    %48 = vector.broadcast %cst_55 : f32 to vector<256x48xf32>
    %49 = arith.maximumf %47, %48 : vector<256x48xf32>
    %50 = vector.shape_cast %49 : vector<256x48xf32> to vector<1x256x48xf32>
    %51 = arith.truncf %50 : vector<1x256x48xf32> to vector<1x256x48xbf16>
    %c0_56 = arith.constant 0 : index
    %c0_57 = arith.constant 0 : index
    %c0_58 = arith.constant 0 : index
    %52 = vector.load %arg6[%c0_56, %c0_57, %c0_58] : memref<1x256x48xbf16, #tpu.memory_space<vmem>>, vector<1x256x48xbf16>
    tpu.vector_store %arg6[%c0_56, %c0_57, %c0_58], %51 {strides = array<i32>} : memref<1x256x48xbf16, #tpu.memory_space<vmem>>, vector<1x256x48xbf16>,
    return
  }
  func.func @transform_0(%arg0: i32, %arg1: i32) -> (i32, i32, i32, i32) {
    %c0_i32 = arith.constant 0 : i32
    %c0_i32_0 = arith.constant 0 : i32
    %c0_i32_1 = arith.constant 0 : i32
    return %arg0, %arg1, %c0_i32, %c0_i32_0 : i32, i32, i32, i32
  }
  func.func @transform_1(%arg0: i32, %arg1: i32) -> (i32, i32, i32, i32) {
    %c1_i32 = arith.constant 1 : i32
    %0 = arith.addi %arg1, %c1_i32 : i32
    %c16_i32 = arith.constant 16 : i32
    %1 = arith.muli %0, %c16_i32 : i32
    %c0_i32 = arith.constant 0 : i32
    %c0_i32_0 = arith.constant 0 : i32
    %c0_i32_1 = arith.constant 0 : i32
    return %arg0, %1, %c0_i32, %c0_i32_0 : i32, i32, i32, i32
  }
  func.func @transform_2(%arg0: i32, %arg1: i32) -> (i32, i32) {
    %c0_i32 = arith.constant 0 : i32
    %c0_i32_0 = arith.constant 0 : i32
    %c0_i32_1 = arith.constant 0 : i32
    return %c0_i32, %c0_i32_0 : i32, i32
  }
  func.func @transform_3(%arg0: i32, %arg1: i32) -> (i32, i32) {
    %c0_i32 = arith.constant 0 : i32
    %c0_i32_0 = arith.constant 0 : i32
    %c0_i32_1 = arith.constant 0 : i32
    return %c0_i32, %c0_i32_0 : i32, i32
  }
  func.func @transform_4(%arg0: i32, %arg1: i32) -> (i32, i32, i32) {
    %c0_i32 = arith.constant 0 : i32
    %c0_i32_0 = arith.constant 0 : i32
    return %arg0, %arg1, %c0_i32 : i32, i32, i32
  }
}

</mosaic_0001>

<bundles_post_ra>
// kernel: tpu_custom_call.1
= control target key start
LH: loop header
LB: loop body
LE: loop exit
PB: predicated region body
PF: predicated region fallthrough
CT: control target
= control target key end

     0   :  { %s5300_s15 = smov 0   ;;  %s5302_s16 = smov 0   ;;  %s6837_s0 = inlined_call_operand.vmem [shape: bf16[2,17,17,16], index: 0, kind: input, shape index: {}]   ;;  %s6838_s1 = inlined_call_operand.vmem [shape: bf16[2,17,17,16], index: 1, kind: input, shape index: {}]   ;;  %s6839_s2 = inlined_call_operand.vmem [shape: f32[36,48], index: 2, kind: input, shape index: {}]   ;;  %s6840_s3 = inlined_call_operand.vmem [shape: f32[1,48], index: 3, kind: input, shape index: {}]   ;;  %s6841_s4 = inlined_call_operand.vmem [shape: bf16[2,256,48], index: 4, kind: output, shape index: {}]  }
   0x1   :  { %s5304_s17 = smov 0  }
   0x2 LB: > { %s26_s18 = sadd.s32 1, %s5264_s16  ;;  %p4201_p0 = scmp.ge.s32.totalorder %s5268_s17, 1  ;;  %s5268_s17 = sphi %s5304_s17, %s14_s17   ;;  %s5264_s16 = sphi %s5302_s16, %s6847_s16   ;;  %s5260_s15 = sphi %s5300_s15, %s6846_s15  }
   0x3   : > { %p28_p1 = scmp.ge.s32.totalorder %s26_s18, 2  ;;  %p218_p2 = scmp.lt.s32.totalorder %s5268_s17, 3 }
   0x5   : > { %s6849_s18 = smov (%p28_p1, %s26_s18), 0  ;;  %p219_p3 = pnand %p4201_p0, %p218_p2 }
   0x6   : > { %p275_p4 = scmp.lt.s32.totalorder (!%p219_p3), %s5260_s15, 1  ;;  %vm364_vm0 = vcmask (!%p219_p3), 122880   ;;  %vm365_vm1 = vsmask.f32 (!%p219_p3), 256  ;;  %vm361_vm2 = vcmask (!%p219_p3), 125952   ;;  %s5270_s23 = smov (!%p219_p3), 8  }
   0x7   : > { %222 = sbr.rel (%p219_p3) target bundleno = 696 (0x2b8), region = 36  ;;  %vm5321_vm3 = vmand (!%p219_p3), %vm364_vm0, %vm365_vm1  ;;  %v367_v1 = vld [vmem:[#allocation2 + $0x8] sm:$0x1] (!%p219_p3)  ;;  %v377_v2 = vld [vmem:[#allocation2 + $0x20] sm:$0x1] (!%p219_p3)  ;;  %s5271_s24 = smov (!%p219_p3), 4  }
   0x8   : > { %v372_v3 = vld [vmem:[#allocation2 + $0x14] sm:$0x1] (!%p219_p3)  ;;  %v382_v4 = vld [vmem:[#allocation2 + $0x2c] sm:$0x1] (!%p219_p3)  ;;  %v387_v8 = vld [vmem:[#allocation2 + $0x38] sm:$0x1] (!%p219_p3) }
   0x9   : > { %v392_v13 = vld [vmem:[#allocation2 + $0x44] sm:$0x1] (!%p219_p3)  ;;  %v397_v18 = vld [vmem:[#allocation2 + $0x50] sm:$0x1] (!%p219_p3)  ;;  %vm696_vm4 = vsmask.f32 (!%p219_p3), 3328 }
   0xa   : > { %vm697_vm5 = vsmask.f32 (!%p219_p3), 7440  ;;  %v402_v23 = vld [vmem:[#allocation2 + $0x5c] sm:$0x1] (!%p219_p3)  ;;  %s5272_s25 = smov (!%p219_p3), 12   ;;  %s5273_s26 = smov (!%p219_p3), 24  }
   0xb   : > { %vm5392_vm6 = vmor (!%p219_p3), %vm696_vm4, %vm697_vm5  ;;  %s5274_s27 = smov (!%p219_p3), 32   ;;  %vm518_vm7 = vcmask (!%p219_p3), 31744   ;;  %vm615_vm8 = vcmask (!%p219_p3), 64544   ;;  %vm1275_vm9 = vcmask (!%p219_p3), 97344   ;;  %vm1500_vm10 = vcmask (!%p219_p3), 130144  }
   0xc   : > { %vm1725_vm11 = vcmask (!%p219_p3), 162944   ;;  %vm2382_vm12 = vcmask (!%p219_p3), 195744   ;;  %vm2608_vm13 = vcmask (!%p219_p3), 228544   ;;  %vm2833_vm14 = vcmask (!%p219_p3), 261344  }
   0xd   : > { %vm3490_vm15 = vcmask (!%p219_p3), 294144   ;;  %vm3567_vm0 = vcmask (!%p219_p3), 293888   ;;  %vm3664_vm1 = vcmask (!%p219_p3), 1043456  }
   0xe   : > { %s6851_s15 = smov (!%p275_p4, %s5260_s15), 1 }
   0xf   : > { %s4654_s19 = smul.u32 204, %s6851_s15 }
  0x11   : > { %s5330_s22 = scalar_lea.vmem %s6837_s0, %s4654_s19  ;;  %s4275_s28 = sadd.s32 192, %s4654_s19 }
  0x12   : > { %v313_v5 = vld [vmem:[%s5330_s22] sm:$0xf]  ;;  %v314_v6 = vld [vmem:[%s5330_s22 + $0x4] sm:$0xf]  ;;  %v315_v7 = vld [vmem:[%s5330_s22 + $0x8] sm:$0x1]  ;;  %s5884_s5 = scalar_lea.vmem %s6838_s1, %s4275_s28 }
  0x13   : > { %362 = vst.msk [vmem:[#allocation2] sm:$0xf] %vm361_vm2, %v313_v5  ;;  %363 = vst.msk [vmem:[#allocation2 + $0x4] sm:$0xf] %vm361_vm2, %v314_v6  ;;  %v368_v9 = vsel %vm5321_vm3, %v315_v7, %v367_v1  ;;  %v319_v10 = vld [vmem:[%s5330_s22 + $0x18] sm:$0xf] }
  0x14   : > { %v320_v11 = vld [vmem:[%s5330_s22 + $0x1c] sm:$0xf]  ;;  %v321_v12 = vld [vmem:[%s5330_s22 + $0x20] sm:$0x1]  ;;  %369 = vst [vmem:[#allocation2 + $0x8] sm:$0x1] %v368_v9 }
  0x15   : > { %375 = vst.msk [vmem:[#allocation2 + $0x18] sm:$0xf] %vm361_vm2, %v319_v10  ;;  %376 = vst.msk [vmem:[#allocation2 + $0x1c] sm:$0xf] %vm361_vm2, %v320_v11  ;;  %v378_v14 = vsel %vm5321_vm3, %v321_v12, %v377_v2  ;;  %v316_v15 = vld [vmem:[%s5330_s22 + $0xc] sm:$0xf] }
  0x16   : > { %v317_v16 = vld [vmem:[%s5330_s22 + $0x10] sm:$0xf]  ;;  %v318_v17 = vld [vmem:[%s5330_s22 + $0x14] sm:$0x1]  ;;  %379 = vst [vmem:[#allocation2 + $0x20] sm:$0x1] %v378_v14 }
  0x17   : > { %370 = vst.msk [vmem:[#allocation2 + $0xc] sm:$0xf] %vm361_vm2, %v316_v15  ;;  %371 = vst.msk [vmem:[#allocation2 + $0x10] sm:$0xf] %vm361_vm2, %v317_v16  ;;  %v373_v19 = vsel %vm5321_vm3, %v318_v17, %v372_v3  ;;  %v322_v20 = vld [vmem:[%s5330_s22 + $0x24] sm:$0xf] }
  0x18   : > { %v323_v21 = vld [vmem:[%s5330_s22 + $0x28] sm:$0xf]  ;;  %v324_v22 = vld [vmem:[%s5330_s22 + $0x2c] sm:$0x1]  ;;  %374 = vst [vmem:[#allocation2 + $0x14] sm:$0x1] %v373_v19 }
  0x19   : > { %380 = vst.msk [vmem:[#allocation2 + $0x24] sm:$0xf] %vm361_vm2, %v322_v20  ;;  %381 = vst.msk [vmem:[#allocation2 + $0x28] sm:$0xf] %vm361_vm2, %v323_v21  ;;  %v383_v24 = vsel %vm5321_vm3, %v324_v22, %v382_v4  ;;  %v325_v25 = vld [vmem:[%s5330_s22 + $0x30] sm:$0xf] }
  0x1a   : > { %v326_v26 = vld [vmem:[%s5330_s22 + $0x34] sm:$0xf]  ;;  %v327_v27 = vld [vmem:[%s5330_s22 + $0x38] sm:$0x1]  ;;  %384 = vst [vmem:[#allocation2 + $0x2c] sm:$0x1] %v383_v24 }
  0x1b   : > { %385 = vst.msk [vmem:[#allocation2 + $0x30] sm:$0xf] %vm361_vm2, %v325_v25  ;;  %386 = vst.msk [vmem:[#allocation2 + $0x34] sm:$0xf] %vm361_vm2, %v326_v26  ;;  %v388_v28 = vsel %vm5321_vm3, %v327_v27, %v387_v8  ;;  %v328_v29 = vld [vmem:[%s5330_s22 + $0x3c] sm:$0xf] }
  0x1c   : > { %v329_v30 = vld [vmem:[%s5330_s22 + $0x40] sm:$0xf]  ;;  %v330_v31 = vld [vmem:[%s5330_s22 + $0x44] sm:$0x1]  ;;  %389 = vst [vmem:[#allocation2 + $0x38] sm:$0x1] %v388_v28 }
  0x1d   : > { %390 = vst.msk [vmem:[#allocation2 + $0x3c] sm:$0xf] %vm361_vm2, %v328_v29  ;;  %391 = vst.msk [vmem:[#allocation2 + $0x40] sm:$0xf] %vm361_vm2, %v329_v30  ;;  %v393_v32 = vsel %vm5321_vm3, %v330_v31, %v392_v13  ;;  %v331_v33 = vld [vmem:[%s5330_s22 + $0x48] sm:$0xf] }
  0x1e   : > { %v332_v34 = vld [vmem:[%s5330_s22 + $0x4c] sm:$0xf]  ;;  %v333_v35 = vld [vmem:[%s5330_s22 + $0x50] sm:$0x1]  ;;  %394 = vst [vmem:[#allocation2 + $0x44] sm:$0x1] %v393_v32 }
  0x1f   : > { %395 = vst.msk [vmem:[#allocation2 + $0x48] sm:$0xf] %vm361_vm2, %v331_v33  ;;  %396 = vst.msk [vmem:[#allocation2 + $0x4c] sm:$0xf] %vm361_vm2, %v332_v34  ;;  %v398_v36 = vsel %vm5321_vm3, %v333_v35, %v397_v18  ;;  %v334_v37 = vld [vmem:[%s5330_s22 + $0x54] sm:$0xf] }
  0x20   : > { %v335_v38 = vld [vmem:[%s5330_s22 + $0x58] sm:$0xf]  ;;  %v336_v39 = vld [vmem:[%s5330_s22 + $0x5c] sm:$0x1]  ;;  %v648_v40 = vld [vmem:[#allocation2] sm:$0xf] }
  0x21   : > { %v649_v41 = vld [vmem:[#allocation2 + $0x4] sm:$0xf]  ;;  %399 = vst [vmem:[#allocation2 + $0x50] sm:$0x1] %v398_v36  ;;  %400 = vst.msk [vmem:[#allocation2 + $0x54] sm:$0xf] %vm361_vm2, %v334_v37  ;;  %v403_v42 = vsel %vm5321_vm3, %v336_v39, %v402_v23 }
  0x22   : > { %401 = vst.msk [vmem:[#allocation2 + $0x58] sm:$0xf] %vm361_vm2, %v335_v38  ;;  %v337_v43 = vld [vmem:[%s5330_s22 + $0x60] sm:$0xf]  ;;  %v650_v44 = vld [vmem:[#allocation2 + $0x8] sm:$0x1] }
  0x23   : > { %v700_v45 = vshrl.u32 %v648_v40, 16  ;;  %v703_v46 = vshll.u32 %v648_v40, 16  ;;  %v709_v47 = vshll.u32 %v649_v41, 16  ;;  %v713_v48 = vshrl.u32 %v649_v41, 16  ;;  %404 = vst [vmem:[#allocation2 + $0x5c] sm:$0x1] %v403_v42 }
  0x24   : > { %405 = vst.msk [vmem:[#allocation2 + $0x60] sm:$0xf] %vm361_vm2, %v337_v43  ;;  %v719_v49 = vshll.u32 %v650_v44, 16  ;;  %v654_v50 = vld [vmem:[#allocation2 + $0x18] sm:$0xf] }
  0x25   : > { %v655_v51 = vld [vmem:[#allocation2 + $0x1c] sm:$0xf]  ;;  %v702_v52 = vrot.slane %v700_v45, 4  ;;  %v705_v53 = vrot.slane %v703_v46, 5  ;;  %v711_v54 = vrot.slane %v709_v47, 5  ;;  %v715_v55 = vrot.slane %v713_v48, 4 }
  0x26   : > { %v656_v56 = vld [vmem:[#allocation2 + $0x20] sm:$0x1]  ;;  %v721_v57 = vrot.slane %v719_v49, 5  ;;  %v748_v58 = vshrl.u32 %v654_v50, 16  ;;  %v751_v59 = vshll.u32 %v654_v50, 16  ;;  %v757_v60 = vshll.u32 %v655_v51, 16 }
  0x27   : > { %v651_v61 = vld [vmem:[#allocation2 + $0xc] sm:$0xf]  ;;  %v706_v62 = vor.u32 %v705_v53, %v702_v52  ;;  %v716_v63 = vor.u32 %v715_v55, %v711_v54  ;;  %v761_v1 = vshrl.u32 %v655_v51, 16  ;;  %v767_v2 = vshll.u32 %v656_v56, 16  ;;  %v652_v3 = vld [vmem:[#allocation2 + $0x10] sm:$0xf] }
  0x28   : > { %v750_v5 = vrot.slane %v748_v58, 4  ;;  %v753_v6 = vrot.slane %v751_v59, 5  ;;  %v759_v7 = vrot.slane %v757_v60, 5  ;;  %v724_v8 = vshrl.u32 %v651_v61, 16  ;;  %v653_v14 = vld [vmem:[#allocation2 + $0x14] sm:$0x1] }
  0x29   : > { %v707_v9 = vrot.slane %v706_v62, 4  ;;  %v717_v10 = vrot.slane %v716_v63, 4  ;;  %v763_v11 = vrot.slane %v761_v1, 4  ;;  %v769_v12 = vrot.slane %v767_v2, 5  ;;  %v657_v22 = vld [vmem:[#allocation2 + $0x24] sm:$0xf] }
  0x2a   : > { %v754_v13 = vor.u32 %v753_v6, %v750_v5  ;;  %v726_v15 = vrot.slane %v724_v8, 4  ;;  %v727_v16 = vshll.u32 %v651_v61, 16  ;;  %v733_v17 = vshll.u32 %v652_v3, 16  ;;  %v658_v34 = vld [vmem:[#allocation2 + $0x28] sm:$0xf] }
  0x2b   : > { %v712_v18 = vsel %vm5392_vm6, %v707_v9, %v711_v54  ;;  %v722_v19 = vsel %vm5392_vm6, %v717_v10, %v721_v57  ;;  %v764_v20 = vor.u32 %v763_v11, %v759_v7  ;;  %v737_v21 = vshrl.u32 %v652_v3, 16  ;;  %v659_v35 = vld [vmem:[#allocation2 + $0x2c] sm:$0x1]  ;;  %v660_v41 = vld [vmem:[#allocation2 + $0x30] sm:$0xf] }
  0x2c   : > { %v1115_v23 = vunpack.c.l.bf16 %v712_v18  ;;  %v1116_v24 = vunpack.c.l.bf16 %v722_v19  ;;  %v755_v25 = vrot.slane %v754_v13, 4  ;;  %v729_v26 = vrot.slane %v727_v16, 5  ;;  %v661_v53 = vld [vmem:[#allocation2 + $0x34] sm:$0xf]  ;;  %v338_v55 = vld [vmem:[%s5330_s22 + $0x64] sm:$0xf] }
  0x2d   : > { %v765_v27 = vrot.slane %v764_v20, 4  ;;  %v735_v28 = vrot.slane %v733_v17, 5  ;;  %v739_v29 = vrot.slane %v737_v21, 4  ;;  %v743_v30 = vshll.u32 %v653_v14, 16  ;;  %v662_v60 = vld [vmem:[#allocation2 + $0x38] sm:$0x1] }
  0x2e   : > { %v4686_v31 = vpack.i.bf16 %v1116_v24, %v1115_v23  ;;  %v760_v32 = vsel %vm5392_vm6, %v755_v25, %v759_v7  ;;  %v730_v33 = vor.u32 %v729_v26, %v726_v15  ;;  %v772_v36 = vshrl.u32 %v657_v22, 16  ;;  %v663_v61 = vld [vmem:[#allocation2 + $0x3c] sm:$0xf]  ;;  %406 = vst.msk [vmem:[#allocation2 + $0x64] sm:$0xf] %vm361_vm2, %v338_v55 }
  0x2f   : > { %v770_v37 = vsel %vm5392_vm6, %v765_v27, %v769_v12  ;;  %v1119_v38 = vunpack.c.l.bf16 %v760_v32  ;;  %v740_v39 = vor.u32 %v739_v29, %v735_v28  ;;  %v745_v40 = vrot.slane %v743_v30, 5  ;;  %v340_v3 = vld [vmem:[%s5330_s22 + $0x6c] sm:$0xf]  ;;  %v341_v5 = vld [vmem:[%s5330_s22 + $0x70] sm:$0xf] }
  0x30   : > { %4687 = vrot.lane.b32.xlu0 %v4686_v31, %s5270_s23  ;;  %v1120_v42 = vunpack.c.l.bf16 %v770_v37  ;;  %v731_v43 = vrot.slane %v730_v33, 4  ;;  %v774_v44 = vrot.slane %v772_v36, 4  ;;  %v775_v45 = vshll.u32 %v657_v22, 16  ;;  %v664_v10 = vld [vmem:[#allocation2 + $0x40] sm:$0xf] }
  0x31   : > { %v741_v46 = vrot.slane %v740_v39, 4  ;;  %v781_v47 = vshll.u32 %v658_v34, 16  ;;  %v785_v48 = vshrl.u32 %v658_v34, 16  ;;  %v791_v49 = vshll.u32 %v659_v35, 16  ;;  %410 = vst.msk [vmem:[#allocation2 + $0x6c] sm:$0xf] %vm361_vm2, %v340_v3 }
  0x32   : > { %v4696_v50 = vpack.i.bf16 %v1120_v42, %v1119_v38  ;;  %v736_v51 = vsel %vm5392_vm6, %v731_v43, %v735_v28  ;;  %v777_v52 = vrot.slane %v775_v45, 5  ;;  %v796_v54 = vshrl.u32 %v660_v41, 16  ;;  %411 = vst.msk [vmem:[#allocation2 + $0x70] sm:$0xf] %vm361_vm2, %v341_v5  ;;  %v665_v14 = vld [vmem:[#allocation2 + $0x44] sm:$0x1] }
  0x33   : > { %v746_v56 = vsel %vm5392_vm6, %v741_v46, %v745_v40  ;;  %v1117_v57 = vunpack.c.l.bf16 %v736_v51  ;;  %v783_v58 = vrot.slane %v781_v47, 5  ;;  %v787_v59 = vrot.slane %v785_v48, 4  ;;  %v343_v16 = vld [vmem:[%s5330_s22 + $0x78] sm:$0xf]  ;;  %v344_v21 = vld [vmem:[%s5330_s22 + $0x7c] sm:$0xf] }
  0x34   : > { %4697 = vrot.lane.b32.xlu1 %v4696_v50, %s5270_s23  ;;  %v1118_v62 = vunpack.c.l.bf16 %v746_v56  ;;  %v778_v63 = vor.u32 %v777_v52, %v774_v44  ;;  %v793_v1 = vrot.slane %v791_v49, 5  ;;  %v798_v2 = vrot.slane %v796_v54, 4  ;;  %415 = vst.msk [vmem:[#allocation2 + $0x78] sm:$0xf] %vm361_vm2, %v343_v16  ;;  %v666_v26 = vld [vmem:[#allocation2 + $0x48] sm:$0xf] }
  0x35   : > { %v788_v6 = vor.u32 %v787_v59, %v783_v58  ;;  %v799_v7 = vshll.u32 %v660_v41, 16  ;;  %v805_v8 = vshll.u32 %v661_v53, 16  ;;  %v809_v9 = vshrl.u32 %v661_v53, 16  ;;  %416 = vst.msk [vmem:[#allocation2 + $0x7c] sm:$0xf] %vm361_vm2, %v344_v21 }
  0x36   : > { %v4691_v11 = vpack.i.bf16 %v1118_v62, %v1117_v57  ;;  %v779_v12 = vrot.slane %v778_v63, 4  ;;  %v815_v13 = vshll.u32 %v662_v60, 16  ;;  %v820_v15 = vshrl.u32 %v663_v61, 16  ;;  %v346_v31 = vld [vmem:[%s5330_s22 + $0x84] sm:$0xf] }
  0x37   : > { %v789_v17 = vrot.slane %v788_v6, 4  ;;  %v801_v18 = vrot.slane %v799_v7, 5  ;;  %v807_v19 = vrot.slane %v805_v8, 5  ;;  %v811_v20 = vrot.slane %v809_v9, 4  ;;  %v347_v32 = vld [vmem:[%s5330_s22 + $0x88] sm:$0xf] }
  0x38   : > { %4692 = vrot.lane.b32.xlu0 %v4691_v11, %s5270_s23  ;;  %v784_v22 = vsel %vm5392_vm6, %v779_v12, %v783_v58  ;;  %v817_v23 = vrot.slane %v815_v13, 5  ;;  %v822_v24 = vrot.slane %v820_v15, 4  ;;  %v823_v25 = vshll.u32 %v663_v61, 16  ;;  %420 = vst.msk [vmem:[#allocation2 + $0x84] sm:$0xf] %vm361_vm2, %v346_v31 }
  0x39   : > { %v794_v27 = vsel %vm5392_vm6, %v789_v17, %v793_v1  ;;  %v1121_v28 = vunpack.c.l.bf16 %v784_v22  ;;  %v802_v29 = vor.u32 %v801_v18, %v798_v2  ;;  %v812_v30 = vor.u32 %v811_v20, %v807_v19  ;;  %421 = vst.msk [vmem:[#allocation2 + $0x88] sm:$0xf] %vm361_vm2, %v347_v32  ;;  %v349_v41 = vld [vmem:[%s5330_s22 + $0x90] sm:$0xf]  ;;  %v667_v46 = vld [vmem:[#allocation2 + $0x4c] sm:$0xf] }
  0x3a   : > { %v1122_v33 = vunpack.c.l.bf16 %v794_v27  ;;  %v825_v34 = vrot.slane %v823_v25, 5  ;;  %v829_v35 = vshll.u32 %v664_v10, 16  ;;  %v833_v36 = vshrl.u32 %v664_v10, 16  ;;  %v668_v47 = vld [vmem:[#allocation2 + $0x50] sm:$0x1] }
  0x3b   : > { %v803_v37 = vrot.slane %v802_v29, 4  ;;  %v813_v38 = vrot.slane %v812_v30, 4  ;;  %v839_v39 = vshll.u32 %v665_v14, 16  ;;  %v844_v40 = vshrl.u32 %v666_v26, 16  ;;  %425 = vst.msk [vmem:[#allocation2 + $0x90] sm:$0xf] %vm361_vm2, %v349_v41 }
  0x3c   : > { %v4701_v42 = vpack.i.bf16 %v1122_v33, %v1121_v28  ;;  %v826_v43 = vor.u32 %v825_v34, %v822_v24  ;;  %v831_v44 = vrot.slane %v829_v35, 5  ;;  %v835_v45 = vrot.slane %v833_v36, 4  ;;  %v669_v52 = vld [vmem:[#allocation2 + $0x54] sm:$0xf]  ;;  %v352_v58 = vld [vmem:[%s5330_s22 + $0x9c] sm:$0xf] }
  0x3d   : > { %v808_v48 = vsel %vm5392_vm6, %v803_v37, %v807_v19  ;;  %v818_v49 = vsel %vm5392_vm6, %v813_v38, %v817_v23  ;;  %v841_v50 = vrot.slane %v839_v39, 5  ;;  %v846_v51 = vrot.slane %v844_v40, 4  ;;  %v350_v53 = vld [vmem:[%s5330_s22 + $0x94] sm:$0xf]  ;;  %v670_v63 = vld [vmem:[#allocation2 + $0x58] sm:$0xf] }
  0x3e   : > { %4702 = vrot.lane.b32.xlu1 %v4701_v42, %s5270_s23  ;;  %v1123_v54 = vunpack.c.l.bf16 %v808_v48  ;;  %v1124_v55 = vunpack.c.l.bf16 %v818_v49  ;;  %v827_v56 = vrot.slane %v826_v43, 4  ;;  %v836_v57 = vor.u32 %v835_v45, %v831_v44  ;;  %426 = vst.msk [vmem:[#allocation2 + $0x94] sm:$0xf] %vm361_vm2, %v350_v53  ;;  %v407_v1 = vld [vmem:[#allocation2 + $0x68] sm:$0x1] }
  0x3f   : > { %v847_v59 = vshll.u32 %v666_v26, 16  ;;  %v853_v60 = vshll.u32 %v667_v46, 16  ;;  %v857_v61 = vshrl.u32 %v667_v46, 16  ;;  %v863_v62 = vshll.u32 %v668_v47, 16  ;;  %430 = vst.msk [vmem:[#allocation2 + $0x9c] sm:$0xf] %vm361_vm2, %v352_v58 }
  0x40   : > { %v4706_v2 = vpack.i.bf16 %v1124_v55, %v1123_v54  ;;  %v832_v3 = vsel %vm5392_vm6, %v827_v56, %v831_v44  ;;  %v837_v5 = vrot.slane %v836_v57, 4  ;;  %v671_v6 = vld [vmem:[#allocation2 + $0x5c] sm:$0x1]  ;;  %v868_v7 = vshrl.u32 %v669_v52, 16  ;;  %v353_v8 = vld [vmem:[%s5330_s22 + $0xa0] sm:$0xf] }
  0x41   : > { %v1125_v9 = vunpack.c.l.bf16 %v832_v3  ;;  %v849_v10 = vrot.slane %v847_v59, 5  ;;  %v855_v11 = vrot.slane %v853_v60, 5  ;;  %v859_v12 = vrot.slane %v857_v61, 4  ;;  %v339_v13 = vld [vmem:[%s5330_s22 + $0x68] sm:$0x1] }
  0x42   : > { %431 = vst.msk [vmem:[#allocation2 + $0xa0] sm:$0xf] %vm361_vm2, %v353_v8  ;;  %4707 = vrot.lane.b32.xlu0 %v4706_v2, %s5270_s23  ;;  %v842_v14 = vsel %vm5392_vm6, %v837_v5, %v841_v50  ;;  %v865_v15 = vrot.slane %v863_v62, 5  ;;  %v870_v16 = vrot.slane %v868_v7, 4  ;;  %v871_v17 = vshll.u32 %v669_v52, 16 }
  0x43   : > { %v1126_v18 = vunpack.c.l.bf16 %v842_v14  ;;  %v850_v19 = vor.u32 %v849_v10, %v846_v51  ;;  %v860_v20 = vor.u32 %v859_v12, %v855_v11  ;;  %v877_v21 = vshll.u32 %v670_v63, 16  ;;  %v672_v22 = vld [vmem:[#allocation2 + $0x60] sm:$0xf]  ;;  %v673_v23 = vld [vmem:[#allocation2 + $0x64] sm:$0xf] }
  0x44   : > { %v873_v24 = vrot.slane %v871_v17, 5  ;;  %v881_v25 = vshrl.u32 %v670_v63, 16  ;;  %v887_v26 = vshll.u32 %v671_v6, 16  ;;  %v408_v27 = vsel %vm5321_vm3, %v339_v13, %v407_v1  ;;  %v355_v28 = vld [vmem:[%s5330_s22 + $0xa8] sm:$0xf] }
  0x45   : > { %v4711_v29 = vpack.i.bf16 %v1126_v18, %v1125_v9  ;;  %v851_v30 = vrot.slane %v850_v19, 4  ;;  %v861_v31 = vrot.slane %v860_v20, 4  ;;  %v879_v32 = vrot.slane %v877_v21, 5  ;;  %409 = vst [vmem:[#allocation2 + $0x68] sm:$0x1] %v408_v27 }
  0x46   : > { %435 = vst.msk [vmem:[#allocation2 + $0xa8] sm:$0xf] %vm361_vm2, %v355_v28  ;;  %v874_v33 = vor.u32 %v873_v24, %v870_v16  ;;  %v883_v34 = vrot.slane %v881_v25, 4  ;;  %v889_v35 = vrot.slane %v887_v26, 5  ;;  %v892_v36 = vshrl.u32 %v672_v22, 16 }
  0x47   : > { %v412_v37 = vld [vmem:[#allocation2 + $0x74] sm:$0x1]  ;;  %4712 = vrot.lane.b32.xlu1 %v4711_v29, %s5270_s23  ;;  %v856_v38 = vsel %vm5392_vm6, %v851_v30, %v855_v11  ;;  %v866_v39 = vsel %vm5392_vm6, %v861_v31, %v865_v15  ;;  %v895_v40 = vshll.u32 %v672_v22, 16  ;;  %v901_v41 = vshll.u32 %v673_v23, 16  ;;  %v356_v43 = vld [vmem:[%s5330_s22 + $0xac] sm:$0xf] }
  0x48   : > { %v342_v42 = vld [vmem:[%s5330_s22 + $0x74] sm:$0x1]  ;;  %v1127_v44 = vunpack.c.l.bf16 %v856_v38  ;;  %v1128_v45 = vunpack.c.l.bf16 %v866_v39  ;;  %v875_v46 = vrot.slane %v874_v33, 4  ;;  %v884_v47 = vor.u32 %v883_v34, %v879_v32  ;;  %v675_v48 = vld [vmem:[#allocation2 + $0x6c] sm:$0xf] }
  0x49   : > { %v676_v49 = vld [vmem:[#allocation2 + $0x70] sm:$0xf]  ;;  %436 = vst.msk [vmem:[#allocation2 + $0xac] sm:$0xf] %vm361_vm2, %v356_v43  ;;  %v894_v50 = vrot.slane %v892_v36, 4  ;;  %v897_v51 = vrot.slane %v895_v40, 5  ;;  %v413_v58 = vsel %vm5321_vm3, %v342_v42, %v412_v37 }
  0x4a   : > { %v903_v52 = vrot.slane %v901_v41, 5  ;;  %v905_v53 = vshrl.u32 %v673_v23, 16  ;;  %v358_v54 = vld [vmem:[%s5330_s22 + $0xb4] sm:$0xf]  ;;  %v4716_v55 = vpack.i.bf16 %v1128_v45, %v1127_v44  ;;  %v880_v56 = vsel %vm5392_vm6, %v875_v46, %v879_v32  ;;  %v359_v59 = vld [vmem:[%s5330_s22 + $0xb8] sm:$0xf] }
  0x4b   : > { %v885_v57 = vrot.slane %v884_v47, 4  ;;  %440 = vst.msk [vmem:[#allocation2 + $0xb4] sm:$0xf] %vm361_vm2, %v358_v54  ;;  %v1129_v60 = vunpack.c.l.bf16 %v880_v56  ;;  %v898_v61 = vor.u32 %v897_v51, %v894_v50  ;;  %414 = vst [vmem:[#allocation2 + $0x74] sm:$0x1] %v413_v58  ;;  %v916_v63 = vshrl.u32 %v675_v48, 16 }
  0x4c   : > { %v907_v62 = vrot.slane %v905_v53, 4  ;;  %v417_v1 = vld [vmem:[#allocation2 + $0x80] sm:$0x1]  ;;  %441 = vst.msk [vmem:[#allocation2 + $0xb8] sm:$0xf] %vm361_vm2, %v359_v59  ;;  %4717 = vrot.lane.b32.xlu0 %v4716_v55, %s5270_s23  ;;  %v919_v5 = vshll.u32 %v675_v48, 16 }
  0x4d   : > { %v890_v2 = vsel %vm5392_vm6, %v885_v57, %v889_v35  ;;  %v674_v3 = vld [vmem:[#allocation2 + $0x68] sm:$0x1]  ;;  %v925_v6 = vshll.u32 %v676_v49, 16  ;;  %v929_v7 = vshrl.u32 %v676_v49, 16  ;;  %v899_v9 = vrot.slane %v898_v61, 4 }
  0x4e   : > { %v1130_v8 = vunpack.c.l.bf16 %v890_v2  ;;  %v908_v10 = vor.u32 %v907_v62, %v903_v52  ;;  %v911_v11 = vshll.u32 %v674_v3, 16  ;;  %v345_v12 = vld [vmem:[%s5330_s22 + $0x80] sm:$0x1]  ;;  %v678_v13 = vld [vmem:[#allocation2 + $0x78] sm:$0xf]  ;;  %v918_v14 = vrot.slane %v916_v63, 4 }
  0x4f   : > { %v921_v15 = vrot.slane %v919_v5, 5  ;;  %v927_v16 = vrot.slane %v925_v6, 5  ;;  %v931_v17 = vrot.slane %v929_v7, 4  ;;  %v679_v18 = vld [vmem:[#allocation2 + $0x7c] sm:$0xf]  ;;  %v904_v20 = vsel %vm5392_vm6, %v899_v9, %v903_v52 }
  0x50   : > { %v4721_v19 = vpack.i.bf16 %v1130_v8, %v1129_v60  ;;  %v909_v21 = vrot.slane %v908_v10, 4  ;;  %v913_v22 = vrot.slane %v911_v11, 5  ;;  %v1131_v23 = vunpack.c.l.bf16 %v904_v20  ;;  %v348_v27 = vld [vmem:[%s5330_s22 + $0x8c] sm:$0x1]  ;;  %v681_v33 = vld [vmem:[#allocation2 + $0x84] sm:$0xf] }
  0x51   : > { %v922_v24 = vor.u32 %v921_v15, %v918_v14  ;;  %v932_v25 = vor.u32 %v931_v17, %v927_v16  ;;  %v418_v26 = vsel %vm5321_vm3, %v345_v12, %v417_v1  ;;  %v422_v28 = vld [vmem:[#allocation2 + $0x8c] sm:$0x1]  ;;  %v940_v30 = vshrl.u32 %v678_v13, 16  ;;  %v682_v43 = vld [vmem:[#allocation2 + $0x88] sm:$0xf] }
  0x52   : > { %4722 = vrot.lane.b32.xlu1 %v4721_v19, %s5270_s23  ;;  %v914_v29 = vsel %vm5392_vm6, %v909_v21, %v913_v22  ;;  %419 = vst [vmem:[#allocation2 + $0x80] sm:$0x1] %v418_v26  ;;  %v943_v31 = vshll.u32 %v678_v13, 16  ;;  %v949_v32 = vshll.u32 %v679_v18, 16  ;;  %v677_v35 = vld [vmem:[#allocation2 + $0x74] sm:$0x1]  ;;  %v423_v47 = vsel %vm5321_vm3, %v348_v27, %v422_v28 }
  0x53   : > { %v1132_v34 = vunpack.c.l.bf16 %v914_v29  ;;  %v923_v36 = vrot.slane %v922_v24, 4  ;;  %v933_v37 = vrot.slane %v932_v25, 4  ;;  %v953_v38 = vshrl.u32 %v679_v18, 16  ;;  %v351_v48 = vld [vmem:[%s5330_s22 + $0x98] sm:$0x1] }
  0x54   : > { %v935_v39 = vshll.u32 %v677_v35, 16  ;;  %v942_v40 = vrot.slane %v940_v30, 4  ;;  %v945_v41 = vrot.slane %v943_v31, 5  ;;  %v951_v42 = vrot.slane %v949_v32, 5  ;;  %v427_v49 = vld [vmem:[#allocation2 + $0x98] sm:$0x1] }
  0x55   : > { %v4726_v44 = vpack.i.bf16 %v1132_v34, %v1131_v23  ;;  %v928_v45 = vsel %vm5392_vm6, %v923_v36, %v927_v16  ;;  %v955_v46 = vrot.slane %v953_v38, 4  ;;  %424 = vst [vmem:[#allocation2 + $0x8c] sm:$0x1] %v423_v47  ;;  %v964_v53 = vshrl.u32 %v681_v33, 16  ;;  %v684_v58 = vld [vmem:[#allocation2 + $0x90] sm:$0xf] }
  0x56   : > { %v937_v50 = vrot.slane %v935_v39, 5  ;;  %v1133_v51 = vunpack.c.l.bf16 %v928_v45  ;;  %v946_v52 = vor.u32 %v945_v41, %v942_v40  ;;  %v967_v55 = vshll.u32 %v681_v33, 16  ;;  %v685_v63 = vld [vmem:[#allocation2 + $0x94] sm:$0xf]  ;;  %v354_v1 = vld [vmem:[%s5330_s22 + $0xa4] sm:$0x1] }
  0x57   : > { %4727 = vrot.lane.b32.xlu0 %v4726_v44, %s5270_s23  ;;  %v956_v54 = vor.u32 %v955_v46, %v951_v42  ;;  %v973_v56 = vshll.u32 %v682_v43, 16  ;;  %v977_v57 = vshrl.u32 %v682_v43, 16  ;;  %v966_v61 = vrot.slane %v964_v53, 4  ;;  %v432_v12 = vld [vmem:[#allocation2 + $0xa4] sm:$0x1] }
  0x58   : > { %v938_v59 = vsel %vm5392_vm6, %v933_v37, %v937_v50  ;;  %v947_v60 = vrot.slane %v946_v52, 4  ;;  %v428_v62 = vsel %vm5321_vm3, %v351_v48, %v427_v49  ;;  %v969_v6 = vrot.slane %v967_v55, 5  ;;  %v687_v21 = vld [vmem:[#allocation2 + $0x9c] sm:$0xf]  ;;  %v688_v35 = vld [vmem:[#allocation2 + $0xa0] sm:$0xf] }
  0x59   : > { %v1134_v2 = vunpack.c.l.bf16 %v938_v59  ;;  %v680_v3 = vld [vmem:[#allocation2 + $0x80] sm:$0x1]  ;;  %v957_v5 = vrot.slane %v956_v54, 4  ;;  %v975_v7 = vrot.slane %v973_v56, 5  ;;  %429 = vst [vmem:[#allocation2 + $0x98] sm:$0x1] %v428_v62  ;;  %v433_v26 = vsel %vm5321_vm3, %v354_v1, %v432_v12 }
  0x5a   : > { %v952_v8 = vsel %vm5392_vm6, %v947_v60, %v951_v42  ;;  %v959_v9 = vshll.u32 %v680_v3, 16  ;;  %v979_v10 = vrot.slane %v977_v57, 4  ;;  %v988_v11 = vshrl.u32 %v684_v58, 16  ;;  %434 = vst [vmem:[#allocation2 + $0xa4] sm:$0x1] %v433_v26 }
  0x5b   : > { %v4731_v13 = vpack.i.bf16 %v1134_v2, %v1133_v51  ;;  %v1135_v14 = vunpack.c.l.bf16 %v952_v8  ;;  %v970_v15 = vor.u32 %v969_v6, %v966_v61  ;;  %v991_v16 = vshll.u32 %v684_v58, 16  ;;  %v357_v45 = vld [vmem:[%s5330_s22 + $0xb0] sm:$0x1]  ;;  %v690_v51 = vld [vmem:[#allocation2 + $0xa8] sm:$0xf] }
  0x5c   : > { %v961_v17 = vrot.slane %v959_v9, 5  ;;  %v980_v18 = vor.u32 %v979_v10, %v975_v7  ;;  %v990_v19 = vrot.slane %v988_v11, 4  ;;  %v997_v20 = vshll.u32 %v685_v63, 16  ;;  %v683_v22 = vld [vmem:[#allocation2 + $0x8c] sm:$0x1] }
  0x5d   : > { %4732 = vrot.lane.b32.xlu1 %v4731_v13, %s5270_s23  ;;  %v971_v23 = vrot.slane %v970_v15, 4  ;;  %v993_v24 = vrot.slane %v991_v16, 5  ;;  %v1001_v25 = vshrl.u32 %v685_v63, 16  ;;  %v983_v29 = vshll.u32 %v683_v22, 16  ;;  %v437_v46 = vld [vmem:[#allocation2 + $0xb0] sm:$0x1] }
  0x5e   : > { %v962_v27 = vsel %vm5392_vm6, %v957_v5, %v961_v17  ;;  %v981_v28 = vrot.slane %v980_v18, 4  ;;  %v999_v30 = vrot.slane %v997_v20, 5  ;;  %v1012_v39 = vshrl.u32 %v687_v21, 16  ;;  %v691_v60 = vld [vmem:[#allocation2 + $0xac] sm:$0xf] }
  0x5f   : > { %v1136_v31 = vunpack.c.l.bf16 %v962_v27  ;;  %v976_v32 = vsel %vm5392_vm6, %v971_v23, %v975_v7  ;;  %v994_v33 = vor.u32 %v993_v24, %v990_v19  ;;  %v1003_v34 = vrot.slane %v1001_v25, 4  ;;  %v360_v3 = vld [vmem:[%s5330_s22 + $0xbc] sm:$0x1]  ;;  %v694_v19 = vld [vmem:[#allocation2 + $0xb8] sm:$0xf]  ;;  %v4374_v24 = vld [vmem:[#allocation2] sm:$0xff]  }
  0x60   : > { %v985_v36 = vrot.slane %v983_v29, 5  ;;  %v1137_v37 = vunpack.c.l.bf16 %v976_v32  ;;  %v686_v38 = vld [vmem:[#allocation2 + $0x98] sm:$0x1]  ;;  %v1015_v40 = vshll.u32 %v687_v21, 16  ;;  %v1014_v48 = vrot.slane %v1012_v39, 4  ;;  %s4276_s22 = sshll.u32 %s6851_s15, 7 }
  0x61   : > { %v4736_v41 = vpack.i.bf16 %v1136_v31, %v1135_v14  ;;  %v995_v42 = vrot.slane %v994_v33, 4  ;;  %v1004_v43 = vor.u32 %v1003_v34, %v999_v30  ;;  %v1007_v44 = vshll.u32 %v686_v38, 16  ;;  %v689_v63 = vld [vmem:[#allocation2 + $0xa4] sm:$0x1]  ;;  %v442_v9 = vld [vmem:[#allocation2 + $0xbc] sm:$0x1] }
  0x62   : > { %v986_v47 = vsel %vm5392_vm6, %v981_v28, %v985_v36  ;;  %v1017_v49 = vrot.slane %v1015_v40, 5  ;;  %v1021_v50 = vshll.u32 %v688_v35, 16  ;;  %v1025_v59 = vshrl.u32 %v688_v35, 16  ;;  %v693_v14 = vld [vmem:[#allocation2 + $0xb4] sm:$0xf] }
  0x63   : > { %4737 = vrot.lane.b32.xlu0 %v4736_v41, %s5270_s23  ;;  %v1138_v52 = vunpack.c.l.bf16 %v986_v47  ;;  %v1000_v53 = vsel %vm5392_vm6, %v995_v42, %v999_v30  ;;  %v1005_v54 = vrot.slane %v1004_v43, 4  ;;  %v1009_v55 = vrot.slane %v1007_v44, 5  ;;  %v4515_v47 = vld [vmem:[#allocation2 + $0x18] sm:$0xff]  }
  0x64   : > { %v1139_v56 = vunpack.c.l.bf16 %v1000_v53  ;;  %v1018_v57 = vor.u32 %v1017_v49, %v1014_v48  ;;  %v1023_v58 = vrot.slane %v1021_v50, 5  ;;  %v438_v1 = vsel %vm5321_vm3, %v357_v45, %v437_v46 }
  0x65   : > { %v4741_v61 = vpack.i.bf16 %v1138_v52, %v1137_v37  ;;  %v1010_v62 = vsel %vm5392_vm6, %v1005_v54, %v1009_v55  ;;  %v1036_v2 = vshrl.u32 %v690_v51, 16  ;;  %v1027_v7 = vrot.slane %v1025_v59, 4  ;;  %439 = vst [vmem:[#allocation2 + $0xb0] sm:$0x1] %v438_v1  ;;  %v1310_v37 = vld [vmem:[#allocation2 + $0xc] sm:$0xff]   ;;  %v1314_v52 = vld [vmem:[#allocation2 + $0x24] sm:$0xff]  }
  0x66   : > { %v1140_v5 = vunpack.c.l.bf16 %v1010_v62  ;;  %v1019_v6 = vrot.slane %v1018_v57, 4  ;;  %v1031_v8 = vshll.u32 %v689_v63, 16  ;;  %v1039_v11 = vshll.u32 %v690_v51, 16  ;;  %v1318_v62 = vld [vmem:[#allocation2 + $0x3c] sm:$0xff]  }
  0x67   : > { %4742 = vrot.lane.b32.xlu1 %v4741_v61, %s5270_s23  ;;  %v1038_v10 = vrot.slane %v1036_v2, 4  ;;  %v1045_v12 = vshll.u32 %v691_v60, 16  ;;  %v1049_v13 = vshrl.u32 %v691_v60, 16  ;;  %v1028_v17 = vor.u32 %v1027_v7, %v1023_v58  ;;  %v4516_v61 = vld [vmem:[#allocation2 + $0x30] sm:$0xff]  }
  0x68   : > { %v4746_v15 = vpack.i.bf16 %v1140_v5, %v1139_v56  ;;  %v1024_v16 = vsel %vm5392_vm6, %v1019_v6, %v1023_v58  ;;  %v1033_v18 = vrot.slane %v1031_v8, 5  ;;  %v1041_v21 = vrot.slane %v1039_v11, 5  ;;  %v4517_v6 = vld [vmem:[#allocation2 + $0x48] sm:$0xff]   ;;  %v1322_v11 = vld [vmem:[#allocation2 + $0x54] sm:$0xff]  }
  0x69   : > { %v1141_v20 = vunpack.c.l.bf16 %v1024_v16  ;;  %v1047_v22 = vrot.slane %v1045_v12, 5  ;;  %v1051_v23 = vrot.slane %v1049_v13, 4  ;;  %v1029_v25 = vrot.slane %v1028_v17, 4  ;;  %v4518_v16 = vld [vmem:[#allocation2 + $0x60] sm:$0xff]  }
  0x6a   : > { %4747 = vrot.lane.b32.xlu0 %v4746_v15, %s5270_s23  ;;  %v443_v26 = vsel %vm5321_vm3, %v360_v3, %v442_v9  ;;  %v1060_v27 = vshrl.u32 %v693_v14, 16  ;;  %v1063_v28 = vshll.u32 %v693_v14, 16  ;;  %v1042_v29 = vor.u32 %v1041_v21, %v1038_v10  ;;  %v1326_v21 = vld [vmem:[#allocation2 + $0x6c] sm:$0xff]  }
  0x6b   : > { %v1052_v30 = vor.u32 %v1051_v23, %v1047_v22  ;;  %444 = vst [vmem:[#allocation2 + $0xbc] sm:$0x1] %v443_v26  ;;  %v1069_v31 = vshll.u32 %v694_v19, 16  ;;  %v1073_v32 = vshrl.u32 %v694_v19, 16  ;;  %v1034_v33 = vsel %vm5392_vm6, %v1029_v25, %v1033_v18  ;;  %v5548_v26 = vld [vmem:[#allocation2 + $0x78] sm:$0xff]  }
  0x6c   : > { %v1062_v34 = vrot.slane %v1060_v27, 4  ;;  %v1065_v35 = vrot.slane %v1063_v28, 5  ;;  %v5519_v36 = vunpack.c.l.bf16 %v4374_v24  ;;  %v1142_v38 = vunpack.c.l.bf16 %v1034_v33  ;;  %v692_v39 = vld [vmem:[#allocation2 + $0xb0] sm:$0x1] }
  0x6d   : > { %v1043_v40 = vrot.slane %v1042_v29, 4  ;;  %v1053_v41 = vrot.slane %v1052_v30, 4  ;;  %v1071_v42 = vrot.slane %v1069_v31, 5  ;;  %v1055_v43 = vshll.u32 %v692_v39, 16  ;;  %v1330_v31 = vld [vmem:[#allocation2 + $0x84] sm:$0xff]  }
  0x6e   : > { %v1066_v44 = vor.u32 %v1065_v35, %v1062_v34  ;;  %v1075_v45 = vrot.slane %v1073_v32, 4  ;;  %v5521_v46 = vunpack.c.h.bf16 %v4374_v24  ;;  %v4751_v48 = vpack.i.bf16 %v1142_v38, %v1141_v20  ;;  %519 = vst.msk [vmem:[#allocation3] sm:$0xff] %vm518_vm7, %v5519_v36 }
  0x6f   : > { %v1048_v49 = vsel %vm5392_vm6, %v1043_v40, %v1047_v22  ;;  %v1342_v50 = vunpack.c.l.bf16 %v1310_v37  ;;  %v1343_v51 = vunpack.c.h.bf16 %v1310_v37  ;;  %v1057_v53 = vrot.slane %v1055_v43, 5  ;;  %v4520_v37 = vld [vmem:[#allocation2 + $0x90] sm:$0xff]   ;;  %v4521_v43 = vld [vmem:[#allocation2 + $0xa8] sm:$0xff]   ;;  %616 = vst.msk [vmem:[#allocation3] sm:$0xff] %vm615_vm8, %v5519_v36 }
  0x70   : > { %v1143_v54 = vunpack.c.l.bf16 %v1048_v49  ;;  %v1067_v55 = vrot.slane %v1066_v44, 4  ;;  %v1076_v56 = vor.u32 %v1075_v45, %v1071_v42  ;;  %4752 = vrot.lane.b32.xlu1 %v4751_v48, %s5270_s23  ;;  %v4766_v57 = vpack.i.bf16 %v5521_v46, %v5519_v36  ;;  %v1338_v49 = vld [vmem:[#allocation2 + $0xb4] sm:$0xff]   ;;  %520 = vst.msk [vmem:[#allocation3 + $0x8] sm:$0xff] %vm518_vm7, %v5521_v46 }
  0x71   : > { %v5528_v58 = vpack.i.bf16 %v1343_v51, %v1342_v50  ;;  %v5530_v59 = vunpack.c.l.bf16 %v4515_v47  ;;  %v5532_v60 = vunpack.c.h.bf16 %v4515_v47  ;;  %v1058_v63 = vsel %vm5392_vm6, %v1053_v41, %v1057_v53  ;;  %617 = vst.msk [vmem:[#allocation3 + $0x8] sm:$0xff] %vm615_vm8, %v5521_v46 }
  0x72   : > { %v695_v1 = vld [vmem:[#allocation2 + $0xbc] sm:$0x1]  ;;  %v1072_v2 = vsel %vm5392_vm6, %v1067_v55, %v1071_v42  ;;  %v1077_v3 = vrot.slane %v1076_v56, 4  ;;  %v1346_v5 = vunpack.c.l.bf16 %v1314_v52  ;;  %v1144_v7 = vunpack.c.l.bf16 %v1058_v63  ;;  %v1759_v63 = vld [vmem:[#allocation2 + $0x4] sm:$0xf] }
  0x73   : > { %v1079_v8 = vshll.u32 %v695_v1, 16  ;;  %v1145_v9 = vunpack.c.l.bf16 %v1072_v2  ;;  %v4776_v10 = vpack.i.bf16 %v5532_v60, %v5530_v59  ;;  %v1347_v12 = vunpack.c.h.bf16 %v1314_v52  ;;  %v1334_v42 = vld [vmem:[#allocation2 + $0x9c] sm:$0xff]   ;;  %523 = vst.msk [vmem:[#allocation3 + $0x20] sm:$0xff] %vm518_vm7, %v5530_v59  ;;  %524 = vst.msk [vmem:[#allocation3 + $0x28] sm:$0xff] %vm518_vm7, %v5532_v60 }
  0x74   : > { %v5540_v13 = vunpack.c.l.bf16 %v4516_v61  ;;  %v5542_v14 = vunpack.c.h.bf16 %v4516_v61  ;;  %v1350_v15 = vunpack.c.l.bf16 %v1318_v62  ;;  %v4756_v17 = vpack.i.bf16 %v1144_v7, %v1143_v54  ;;  %v1758_v54 = vld [vmem:[#allocation2] sm:$0xf]  ;;  %620 = vst.msk [vmem:[#allocation3 + $0x20] sm:$0xff] %vm615_vm8, %v5530_v59  ;;  %621 = vst.msk [vmem:[#allocation3 + $0x28] sm:$0xff] %vm615_vm8, %v5532_v60 }
  0x75   : > { %v1081_v18 = vrot.slane %v1079_v8, 5  ;;  %v1351_v19 = vunpack.c.h.bf16 %v1318_v62  ;;  %v4387_v20 = vunpack.c.l.bf16 %v4517_v6  ;;  %v5544_v22 = vpack.i.bf16 %v1347_v12, %v1346_v5  ;;  %v1782_v5 = vld [vmem:[#allocation2 + $0x60] sm:$0xf] }
  0x76   : > { %v4786_v23 = vpack.i.bf16 %v5542_v14, %v5540_v13  ;;  %v4388_v24 = vunpack.c.h.bf16 %v4517_v6  ;;  %v1354_v25 = vunpack.c.l.bf16 %v1322_v11  ;;  %4757 = vrot.lane.b32.xlu0 %v4756_v17, %s5270_s23  ;;  %v1355_v29 = vunpack.c.h.bf16 %v1322_v11  ;;  %527 = vst.msk [vmem:[#allocation3 + $0x40] sm:$0xff] %vm518_vm7, %v5540_v13  ;;  %528 = vst.msk [vmem:[#allocation3 + $0x48] sm:$0xff] %vm518_vm7, %v5542_v14 }
  0x77   : > { %v1082_v27 = vsel %vm5392_vm6, %v1077_v3, %v1081_v18  ;;  %v5553_v28 = vpack.i.bf16 %v1351_v19, %v1350_v15  ;;  %v4391_v30 = vunpack.c.l.bf16 %v4518_v16  ;;  %v4392_v34 = vunpack.c.h.bf16 %v4518_v16  ;;  %v1760_v18 = vld [vmem:[#allocation2 + $0x8] sm:$0x1]  ;;  %624 = vst.msk [vmem:[#allocation3 + $0x40] sm:$0xff] %vm615_vm8, %v5540_v13  ;;  %625 = vst.msk [vmem:[#allocation3 + $0x48] sm:$0xff] %vm615_vm8, %v5542_v14 }
  0x78   : > { %v1146_v32 = vunpack.c.l.bf16 %v1082_v27  ;;  %v5555_v33 = vpack.i.bf16 %v4388_v24, %v4387_v20  ;;  %v1358_v35 = vunpack.c.l.bf16 %v1326_v21  ;;  %v5557_v38 = vpack.i.bf16 %v1355_v29, %v1354_v25  ;;  %v1784_v25 = vld [vmem:[#allocation2 + $0x68] sm:$0x1] }
  0x79   : > { %v1359_v39 = vunpack.c.h.bf16 %v1326_v21  ;;  %v4395_v40 = vunpack.c.l.bf16 %v5548_v26  ;;  %v4396_v41 = vunpack.c.h.bf16 %v5548_v26  ;;  %v5561_v45 = vpack.i.bf16 %v4392_v34, %v4391_v30 }
  0x7a   : > { %v4761_v44 = vpack.i.bf16 %v1146_v32, %v1145_v9  ;;  %v1362_v47 = vunpack.c.l.bf16 %v1330_v31  ;;  %v1363_v48 = vunpack.c.h.bf16 %v1330_v31  ;;  %4767 = vrot.lane.b32.xlu0 %v4766_v57, %s5271_s24  ;;  %v4399_v52 = vunpack.c.l.bf16 %v4520_v37  ;;  %v1783_v9 = vld [vmem:[#allocation2 + $0x64] sm:$0xf] }
  0x7b   : > { %v5564_v50 = vpack.i.bf16 %v1359_v39, %v1358_v35  ;;  %v5570_v51 = vpack.i.bf16 %v4396_v41, %v4395_v40  ;;  %v4400_v53 = vunpack.c.h.bf16 %v4520_v37  ;;  %v1366_v56 = vunpack.c.l.bf16 %v1334_v42  ;;  %v2432_v39 = vld [vmem:[#allocation2 + $0x6c] sm:$0xff]  }
  0x7c   : > { %4762 = vrot.lane.b32.xlu1 %v4761_v44, %s5270_s23  ;;  %v5573_v55 = vpack.i.bf16 %v1363_v48, %v1362_v47  ;;  %v1367_v61 = vunpack.c.h.bf16 %v1334_v42  ;;  %v4403_v62 = vunpack.c.l.bf16 %v4521_v43  ;;  %v4404_v1 = vunpack.c.h.bf16 %v4521_v43 }
  0x7d   : > { %v5575_v57 = vpack.i.bf16 %v4400_v53, %v4399_v52  ;;  %v1370_v2 = vunpack.c.l.bf16 %v1338_v49  ;;  %v1371_v3 = vunpack.c.h.bf16 %v1338_v49  ;;  %v5580_v7 = vpack.i.bf16 %v4391_v30, %v5519_v36  ;;  %v2641_v53 = vld [vmem:[#allocation2 + $0xc] sm:$0xff]  }
  0x7e   : > { %v5577_v6 = vpack.i.bf16 %v1367_v61, %v1366_v56  ;;  %v5583_v8 = vpack.i.bf16 %v4392_v34, %v5521_v46  ;;  %v1807_v11 = vshrl.u32 %v1758_v54, 16  ;;  %4777 = vrot.lane.b32.xlu0 %v4776_v10, %s5271_s24  ;;  %v5586_v12 = vpack.i.bf16 %v4404_v1, %v4403_v62  ;;  %v2416_v10 = vld [vmem:[#allocation2 + $0xc] sm:$0xff]  }
  0x7f   : > { %v5588_v15 = vpack.i.bf16 %v1371_v3, %v1370_v2  ;;  %v1810_v16 = vshll.u32 %v1758_v54, 16  ;;  %v1816_v17 = vshll.u32 %v1759_v63, 16  ;;  %v1820_v20 = vshrl.u32 %v1759_v63, 16  ;;  %v2657_v3 = vld [vmem:[#allocation2 + $0x6c] sm:$0xff]  }
  0x80   : > { %4772 = vrot.lane.b32.xlu1 %v5528_v58, %s5271_s24  ;;  %v1809_v19 = vrot.slane %v1807_v11, 4  ;;  %v1999_v21 = vshrl.u32 %v1782_v5, 16  ;;  %v2002_v24 = vshll.u32 %v1782_v5, 16  ;;  %v2008_v30 = vshll.u32 %v1783_v9, 16 }
  0x81   : > { %v1812_v27 = vrot.slane %v1810_v16, 5  ;;  %v1818_v29 = vrot.slane %v1816_v17, 5  ;;  %v2012_v31 = vshrl.u32 %v1783_v9, 16  ;;  %v1822_v35 = vrot.slane %v1820_v20, 4  ;;  %v1535_v16 = vld [vmem:[#allocation2 + $0xc] sm:$0xff]  }
  0x82   : > { %v2001_v32 = vrot.slane %v1999_v21, 4  ;;  %v2004_v34 = vrot.slane %v2002_v24, 5  ;;  %v1826_v37 = vshll.u32 %v1760_v18, 16  ;;  %4787 = vrot.lane.b32.xlu0 %v4786_v23, %s5271_s24  ;;  %v2010_v42 = vrot.slane %v2008_v30, 5  ;;  %v1551_v17 = vld [vmem:[#allocation2 + $0x6c] sm:$0xff]  }
  0x83   : > { %v1813_v58 = vor.u32 %v1812_v27, %v1809_v19  ;;  %v2014_v43 = vrot.slane %v2012_v31, 4  ;;  %v2018_v44 = vshll.u32 %v1784_v25, 16  ;;  %v1823_v48 = vor.u32 %v1822_v35, %v1818_v29  ;;  %v2866_v21 = vld [vmem:[#allocation2 + $0xc] sm:$0xf] }
  0x84   : > { %4782 = vrot.lane.b32.xlu1 %v5544_v22, %s5271_s24  ;;  %v2005_v47 = vor.u32 %v2004_v34, %v2001_v32  ;;  %v1828_v49 = vrot.slane %v1826_v37, 5  ;;  %v2448_v52 = vunpack.c.l.bf16 %v2416_v10  ;;  %v2464_v62 = vunpack.c.l.bf16 %v2432_v39  ;;  %v2890_v34 = vld [vmem:[#allocation2 + $0x6c] sm:$0xf] }
  0x85   : > { %v1814_v54 = vrot.slane %v1813_v58, 4  ;;  %v2015_v56 = vor.u32 %v2014_v43, %v2010_v42  ;;  %v2020_v61 = vrot.slane %v2018_v44, 5  ;;  %v1824_v1 = vrot.slane %v1823_v48, 4  ;;  %v2891_v58 = vld [vmem:[#allocation2 + $0x70] sm:$0xf] }
  0x86   : > { %v2006_v63 = vrot.slane %v2005_v47, 4  ;;  %v2449_v2 = vunpack.c.h.bf16 %v2416_v10  ;;  %v2465_v23 = vunpack.c.h.bf16 %v2432_v39  ;;  %4797 = vrot.lane.b32.xlu0 %v5555_v33, %s5271_s24  ;;  %v5602_v9 = vpack.i.bf16 %v2464_v62, %v2448_v52 }
  0x87   : > { %v1819_v22 = vsel %vm5392_vm6, %v1814_v54, %v1818_v29  ;;  %v2016_v5 = vrot.slane %v2015_v56, 4  ;;  %v2673_v11 = vunpack.c.l.bf16 %v2641_v53  ;;  %v1829_v33 = vsel %vm5392_vm6, %v1824_v1, %v1828_v49  ;;  %v1761_v54 = vld [vmem:[#allocation2 + $0xc] sm:$0xf] }
  0x88   : > { %4792 = vrot.lane.b32.xlu1 %v5553_v28, %s5271_s24  ;;  %v2011_v18 = vsel %vm5392_vm6, %v2006_v63, %v2010_v42  ;;  %v5608_v19 = vunpack.c.l.bf16 %v1819_v22  ;;  %v5612_v20 = vpack.i.bf16 %v2465_v23, %v2449_v2  ;;  %v5618_v27 = vunpack.c.l.bf16 %v1829_v33  ;;  %v5620_v28 = vld [vmem:[#allocation2 + $0x10] sm:$0xf]  ;;  %v1785_v22 = vld [vmem:[#allocation2 + $0x6c] sm:$0xf] }
  0x89   : > { %v5614_v24 = vunpack.c.l.bf16 %v2011_v18  ;;  %v2021_v25 = vsel %vm5392_vm6, %v2016_v5, %v2020_v61  ;;  %v2689_v29 = vunpack.c.l.bf16 %v2657_v3  ;;  %v1567_v31 = vunpack.c.l.bf16 %v1535_v16  ;;  %v1786_v33 = vld [vmem:[#allocation2 + $0x70] sm:$0xf] }
  0x8a   : > { %v5622_v30 = vunpack.c.l.bf16 %v2021_v25  ;;  %v1583_v10 = vunpack.c.l.bf16 %v1551_v17  ;;  %v2674_v32 = vunpack.c.h.bf16 %v2641_v53  ;;  %4807 = vrot.lane.b32.xlu0 %v5561_v45, %s5271_s24  ;;  %v2690_v39 = vunpack.c.h.bf16 %v2657_v3 }
  0x8b   : > { %v4856_v35 = vpack.i.bf16 %v5614_v24, %v5608_v19  ;;  %v5628_v37 = vpack.i.bf16 %v2689_v29, %v2673_v11  ;;  %v2915_v42 = vshrl.u32 %v2866_v21, 16  ;;  %v2918_v47 = vshll.u32 %v2866_v21, 16 }
  0x8c   : > { %4802 = vrot.lane.b32.xlu1 %v5557_v38, %s5271_s24  ;;  %v4861_v43 = vpack.i.bf16 %v5622_v30, %v5618_v27  ;;  %v5634_v44 = vpack.i.bf16 %v1583_v10, %v1567_v31  ;;  %v2924_v48 = vshll.u32 %v5620_v28, 16  ;;  %v5637_v45 = vpack.i.bf16 %v2690_v39, %v2674_v32  ;;  %v1762_v38 = vld [vmem:[#allocation2 + $0x10] sm:$0xf] }
  0x8d   : > { %v2917_v49 = vrot.slane %v2915_v42, 4  ;;  %v2928_v52 = vshrl.u32 %v5620_v28, 16  ;;  %v3107_v53 = vshrl.u32 %v2890_v34, 16  ;;  %v2920_v56 = vrot.slane %v2918_v47, 5 }
  0x8e   : > { %v2926_v61 = vrot.slane %v2924_v48, 5  ;;  %v3110_v62 = vshll.u32 %v2890_v34, 16  ;;  %v3116_v63 = vshll.u32 %v2891_v58, 16  ;;  %4817 = vrot.lane.b32.xlu0 %v5570_v51, %s5271_s24  ;;  %v3120_v2 = vshrl.u32 %v2891_v58, 16  ;;  %v2868_v58 = vld [vmem:[#allocation2 + $0x14] sm:$0x1] }
  0x8f   : > { %v3109_v1 = vrot.slane %v3107_v53, 4  ;;  %v1568_v23 = vunpack.c.h.bf16 %v1535_v16  ;;  %v1584_v3 = vunpack.c.h.bf16 %v1551_v17  ;;  %v2921_v5 = vor.u32 %v2920_v56, %v2917_v49  ;;  %v2892_v53 = vld [vmem:[#allocation2 + $0x74] sm:$0x1] }
  0x90   : > { %4812 = vrot.lane.b32.xlu1 %v5564_v50, %s5271_s24  ;;  %v3112_v11 = vrot.slane %v3110_v62, 5  ;;  %v3118_v18 = vrot.slane %v3116_v63, 5  ;;  %v1831_v21 = vshrl.u32 %v1761_v54, 16  ;;  %v1834_v29 = vshll.u32 %v1761_v54, 16 }
  0x91   : > { %v5644_v25 = vpack.i.bf16 %v1584_v3, %v1568_v23  ;;  %v1840_v28 = vshll.u32 %v1762_v38, 16  ;;  %v1844_v31 = vshrl.u32 %v1762_v38, 16  ;;  %v2922_v10 = vrot.slane %v2921_v5, 4 }
  0x92   : > { %v3113_v51 = vor.u32 %v3112_v11, %v3109_v1  ;;  %v1833_v32 = vrot.slane %v1831_v21, 4  ;;  %v2023_v34 = vshrl.u32 %v1785_v22, 16  ;;  %4827 = vrot.lane.b32.xlu0 %v5575_v57, %s5271_s24  ;;  %v1836_v16 = vrot.slane %v1834_v29, 5  ;;  %v1763_v29 = vld [vmem:[#allocation2 + $0x14] sm:$0x1] }
  0x93   : > { %v1842_v17 = vrot.slane %v1840_v28, 5  ;;  %v2026_v50 = vshll.u32 %v1785_v22, 16  ;;  %v2032_v39 = vshll.u32 %v1786_v33, 16  ;;  %v2927_v42 = vsel %vm5392_vm6, %v2922_v10, %v2926_v61  ;;  %v1787_v28 = vld [vmem:[#allocation2 + $0x74] sm:$0x1] }
  0x94   : > { %4822 = vrot.lane.b32.xlu1 %v5573_v55, %s5271_s24  ;;  %v3114_v47 = vrot.slane %v3113_v51, 4  ;;  %v2025_v48 = vrot.slane %v2023_v34, 4  ;;  %v2036_v49 = vshrl.u32 %v1786_v33, 16  ;;  %v5652_v54 = vunpack.c.l.bf16 %v2927_v42 }
  0x95   : > { %v1837_v56 = vor.u32 %v1836_v16, %v1833_v32  ;;  %v2028_v62 = vrot.slane %v2026_v50, 5  ;;  %v2034_v57 = vrot.slane %v2032_v39, 5  ;;  %v2930_v38 = vrot.slane %v2928_v52, 4 }
  0x96   : > { %v3119_v63 = vsel %vm5392_vm6, %v3114_v47, %v3118_v18  ;;  %v2934_v1 = vshll.u32 %v2868_v58, 16  ;;  %v3122_v23 = vrot.slane %v3120_v2, 4  ;;  %4837 = vrot.lane.b32.xlu0 %v5586_v12, %s5271_s24  ;;  %v3126_v5 = vshll.u32 %v2892_v53, 16 }
  0x97   : > { %v5658_v55 = vunpack.c.l.bf16 %v3119_v63  ;;  %v1838_v3 = vrot.slane %v1837_v56, 4  ;;  %v2029_v22 = vor.u32 %v2028_v62, %v2025_v48  ;;  %v2931_v11 = vor.u32 %v2930_v38, %v2926_v61  ;;  %v2870_v38 = vld [vmem:[#allocation2 + $0x1c] sm:$0xf] }
  0x98   : > { %4832 = vrot.lane.b32.xlu1 %v5577_v6, %s5271_s24  ;;  %v2936_v33 = vrot.slane %v2934_v1, 5  ;;  %v3123_v21 = vor.u32 %v3122_v23, %v3118_v18  ;;  %v1846_v10 = vrot.slane %v1844_v31, 4  ;;  %v3128_v51 = vrot.slane %v3126_v5, 5  ;;  %v2893_v23 = vld [vmem:[#allocation2 + $0x78] sm:$0xf] }
  0x99   : > { %v4891_v52 = vpack.i.bf16 %v5658_v55, %v5652_v54  ;;  %v1843_v12 = vsel %vm5392_vm6, %v1838_v3, %v1842_v17  ;;  %v2030_v2 = vrot.slane %v2029_v22, 4  ;;  %v2932_v34 = vrot.slane %v2931_v11, 4  ;;  %v1764_v5 = vld [vmem:[#allocation2 + $0x18] sm:$0xf] }
  0x9a   : > { %v5666_v32 = vunpack.c.l.bf16 %v1843_v12  ;;  %v3124_v16 = vrot.slane %v3123_v21, 4  ;;  %v1847_v50 = vor.u32 %v1846_v10, %v1842_v17  ;;  %4847 = vrot.lane.b32.xlu0 %v5580_v7, %s5271_s24  ;;  %v1850_v61 = vshll.u32 %v1763_v29, 16 }
  0x9b   : > { %v2035_v6 = vsel %vm5392_vm6, %v2030_v2, %v2034_v57  ;;  %v2038_v18 = vrot.slane %v2036_v49, 4  ;;  %v2042_v31 = vshll.u32 %v1787_v28, 16  ;;  %v2937_v58 = vsel %vm5392_vm6, %v2932_v34, %v2936_v33  ;;  %v2869_v49 = vld [vmem:[#allocation2 + $0x18] sm:$0xf]  ;;  %v1765_v28 = vld [vmem:[#allocation2 + $0x1c] sm:$0xf] }
  0x9c   : > { %4842 = vrot.lane.b32.xlu1 %v5588_v15, %s5271_s24  ;;  %v5674_v39 = vunpack.c.l.bf16 %v2035_v6  ;;  %v3129_v17 = vsel %vm5392_vm6, %v3124_v16, %v3128_v51  ;;  %v1848_v42 = vrot.slane %v1847_v50, 4  ;;  %v5680_v47 = vunpack.c.l.bf16 %v2937_v58  ;;  %v1788_v51 = vld [vmem:[#allocation2 + $0x78] sm:$0xf] }
  0x9d   : > { %v5682_v7 = vunpack.c.l.bf16 %v3129_v17  ;;  %v1852_v48 = vrot.slane %v1850_v61, 5  ;;  %v2039_v53 = vor.u32 %v2038_v18, %v2034_v57  ;;  %v2044_v15 = vrot.slane %v2042_v31, 5  ;;  %v1789_v18 = vld [vmem:[#allocation2 + $0x7c] sm:$0xf] }
  0x9e   : > { %v4901_v56 = vpack.i.bf16 %v5674_v39, %v5666_v32  ;;  %v5689_v62 = vpack.i.bf16 %v4395_v40, %v5530_v59  ;;  %v5694_v63 = vpack.i.bf16 %v4396_v41, %v5532_v60  ;;  %4857 = vrot.lane.b32.xlu0 %v4856_v35, %s5272_s25  ;;  %v2894_v41 = vld [vmem:[#allocation2 + $0x7c] sm:$0xf]  ;;  %v2939_v3 = vshrl.u32 %v2869_v49, 16  ;;  %v5790_v32 = vld [vmem:[#allocation2 + $0x84] sm:$0xff]  }
  0x9f   : > { %v4906_v57 = vpack.i.bf16 %v5682_v7, %v5680_v47  ;;  %v1853_v1 = vsel %vm5392_vm6, %v1848_v42, %v1852_v48  ;;  %v2040_v40 = vrot.slane %v2039_v53, 4  ;;  %v2942_v19 = vshll.u32 %v2869_v49, 16  ;;  %v5774_v47 = vld [vmem:[#allocation2 + $0x24] sm:$0xff]  }
  0xa0   : > { %4852 = vrot.lane.b32.xlu1 %v5583_v8, %s5271_s24  ;;  %v5706_v26 = vunpack.c.l.bf16 %v1853_v1  ;;  %v2948_v24 = vshll.u32 %v2870_v38, 16  ;;  %v2952_v35 = vshrl.u32 %v2870_v38, 16  ;;  %v2941_v33 = vrot.slane %v2939_v3, 4  ;;  %v5792_v39 = vld [vmem:[#allocation2 + $0x24] sm:$0xff]  }
  0xa1   : > { %v2045_v22 = vsel %vm5392_vm6, %v2040_v40, %v2044_v15  ;;  %v3131_v21 = vshrl.u32 %v2893_v23, 16  ;;  %v3134_v29 = vshll.u32 %v2893_v23, 16  ;;  %v2944_v8 = vrot.slane %v2942_v19, 5  ;;  %v2871_v40 = vld [vmem:[#allocation2 + $0x20] sm:$0x1] }
  0xa2   : > { %v5710_v11 = vunpack.c.l.bf16 %v2045_v22  ;;  %4867 = vrot.lane.b32.xlu0 %v5602_v9, %s5273_s26  ;;  %v2950_v10 = vrot.slane %v2948_v24, 5  ;;  %v3140_v12 = vshll.u32 %v2894_v41, 16  ;;  %v3144_v2 = vshrl.u32 %v2894_v41, 16  ;;  %v2895_v19 = vld [vmem:[#allocation2 + $0x80] sm:$0x1] }
  0xa3   : > { %v3133_v16 = vrot.slane %v3131_v21, 4  ;;  %v3136_v50 = vrot.slane %v3134_v29, 5  ;;  %v2945_v6 = vor.u32 %v2944_v8, %v2941_v33  ;;  %v1855_v31 = vshrl.u32 %v1764_v5, 16 }
  0xa4   : > { %4862 = vrot.lane.b32.xlu1 %v4861_v43, %s5272_s25  ;;  %v4911_v34 = vpack.i.bf16 %v5710_v11, %v5706_v26  ;;  %v3142_v61 = vrot.slane %v3140_v12, 5  ;;  %v1858_v9 = vshll.u32 %v1764_v5, 16  ;;  %v1864_v17 = vshll.u32 %v1765_v28, 16 }
  0xa5   : > { %v3137_v58 = vor.u32 %v3136_v50, %v3133_v16  ;;  %v1868_v42 = vshrl.u32 %v1765_v28, 16  ;;  %v2047_v48 = vshrl.u32 %v1788_v51, 16  ;;  %v2946_v53 = vrot.slane %v2945_v6, 4  ;;  %v1766_v16 = vld [vmem:[#allocation2 + $0x20] sm:$0x1] }
  0xa6   : > { %4877 = vrot.lane.b32.xlu0 %v5628_v37, %s5273_s26  ;;  %v1857_v27 = vrot.slane %v1855_v31, 4  ;;  %v1860_v30 = vrot.slane %v1858_v9, 5  ;;  %v2050_v43 = vshll.u32 %v1788_v51, 16  ;;  %v1866_v15 = vrot.slane %v1864_v17, 5  ;;  %v1790_v31 = vld [vmem:[#allocation2 + $0x80] sm:$0x1] }
  0xa7   : > { %v3138_v49 = vrot.slane %v3137_v58, 4  ;;  %v2049_v38 = vrot.slane %v2047_v48, 4  ;;  %v2056_v1 = vshll.u32 %v1789_v18, 16  ;;  %v2951_v23 = vsel %vm5392_vm6, %v2946_v53, %v2950_v10  ;;  %v2420_v53 = vld [vmem:[#allocation2 + $0x24] sm:$0xff]  }
  0xa8   : > { %4872 = vrot.lane.b32.xlu1 %v5612_v20, %s5273_s26  ;;  %v1861_v41 = vor.u32 %v1860_v30, %v1857_v27  ;;  %v2052_v3 = vrot.slane %v2050_v43, 5  ;;  %v2060_v22 = vshrl.u32 %v1789_v18, 16  ;;  %v5728_v24 = vunpack.c.l.bf16 %v2951_v23  ;;  %v2436_v43 = vld [vmem:[#allocation2 + $0x84] sm:$0xff]  }
  0xa9   : > { %v3143_v37 = vsel %vm5392_vm6, %v3138_v49, %v3142_v61  ;;  %v2058_v5 = vrot.slane %v2056_v1, 5  ;;  %v2954_v33 = vrot.slane %v2952_v35, 4  ;;  %v2958_v28 = vshll.u32 %v2871_v40, 16  ;;  %v4688_v40 = vpop.permute.xlu0 %4687 }
  0xaa   : > { %4887 = vrot.lane.b32.xlu0 %v5637_v45, %s5273_s26  ;;  %v5732_v20 = vunpack.c.l.bf16 %v3143_v37  ;;  %v1862_v21 = vrot.slane %v1861_v41, 4  ;;  %v2053_v29 = vor.u32 %v2052_v3, %v2049_v38  ;;  %v3146_v12 = vrot.slane %v3144_v2, 4  ;;  %v4698_v37 = vpop.permute.xlu1 %4697 }
  0xab   : > { %v2955_v8 = vor.u32 %v2954_v33, %v2950_v10  ;;  %v3150_v51 = vshll.u32 %v2895_v19, 16  ;;  %v1870_v50 = vrot.slane %v1868_v42, 4  ;;  %v2960_v18 = vrot.slane %v2958_v28, 5 }
  0xac   : > { %4882 = vrot.lane.b32.xlu1 %v5634_v44, %s5271_s24  ;;  %v4941_v6 = vpack.i.bf16 %v5732_v20, %v5728_v24  ;;  %v1867_v35 = vsel %vm5392_vm6, %v1862_v21, %v1866_v15  ;;  %v2054_v45 = vrot.slane %v2053_v29, 4  ;;  %v3147_v17 = vor.u32 %v3146_v12, %v3142_v61  ;;  %v5910_v20 = vld [vmem:[#allocation2 + $0x88] sm:$0xf] }
  0xad   : > { %v5740_v9 = vunpack.c.l.bf16 %v1867_v35  ;;  %v2956_v58 = vrot.slane %v2955_v8, 4  ;;  %v3152_v48 = vrot.slane %v3150_v51, 5  ;;  %v1871_v10 = vor.u32 %v1870_v50, %v1866_v15  ;;  %v456_v51 = vld [vmem:[#allocation2 + $0xc] sm:$0xff]   ;;  %v4693_v59 = vpop.permute.xlu0 %4692 }
  0xae   : > { %4897 = vrot.lane.b32.xlu0 %v5644_v25, %s5271_s24  ;;  %v2059_v44 = vsel %vm5392_vm6, %v2054_v45, %v2058_v5  ;;  %v1874_v2 = vshll.u32 %v1766_v16, 16  ;;  %v2062_v42 = vrot.slane %v2060_v22, 4  ;;  %v3148_v30 = vrot.slane %v3147_v17, 4  ;;  %v553_v16 = vld [vmem:[#allocation2 + $0xc] sm:$0xff]  }
  0xaf   : > { %v5750_v27 = vunpack.c.l.bf16 %v2059_v44  ;;  %v2961_v61 = vsel %vm5392_vm6, %v2956_v58, %v2960_v18  ;;  %v2066_v25 = vshll.u32 %v1790_v31, 16  ;;  %v1872_v15 = vrot.slane %v1871_v10, 4  ;;  %v5829_v18 = vld [vmem:[#allocation2 + $0x24] sm:$0xff]  }
  0xb0   : > { %4892 = vrot.lane.b32.xlu1 %v4891_v52, %s5274_s27  ;;  %v5754_v49 = vunpack.c.l.bf16 %v2961_v61  ;;  %v1876_v38 = vrot.slane %v1874_v2, 5  ;;  %v2063_v1 = vor.u32 %v2062_v42, %v2058_v5  ;;  %v3153_v54 = vsel %vm5392_vm6, %v3148_v30, %v3152_v48  ;;  %v460_v58 = vld [vmem:[#allocation2 + $0x24] sm:$0xff]   ;;  %v4703_v17 = vpop.permute.xlu1 %4702 }
  0xb1   : > { %v4951_v23 = vpack.i.bf16 %v5750_v27, %v5740_v9  ;;  %v2068_v55 = vrot.slane %v2066_v25, 5  ;;  %v2452_v52 = vunpack.c.l.bf16 %v2420_v53  ;;  %v5764_v41 = vunpack.c.l.bf16 %v3153_v54  ;;  %v2872_v42 = vld [vmem:[#allocation2 + $0x24] sm:$0xf] }
  0xb2   : > { %4907 = vrot.lane.b32.xlu0 %v4906_v57, %s5274_s27  ;;  %v1877_v3 = vsel %vm5392_vm6, %v1872_v15, %v1876_v38  ;;  %v2064_v22 = vrot.slane %v2063_v1, 4  ;;  %v2468_v19 = vunpack.c.l.bf16 %v2436_v43  ;;  %v2453_v33 = vunpack.c.h.bf16 %v2420_v53  ;;  %v5838_v53 = vld [vmem:[#allocation2 + $0x28] sm:$0xf]  ;;  %v2896_v15 = vld [vmem:[#allocation2 + $0x84] sm:$0xf] }
  0xb3   : > { %v5772_v5 = vunpack.c.l.bf16 %v1877_v3  ;;  %v2469_v21 = vunpack.c.h.bf16 %v2436_v43  ;;  %v4956_v7 = vpack.i.bf16 %v5764_v41, %v5754_v49  ;;  %v4690_v12 = vunpack.i.h.bf16 %v4688_v40  ;;  %v5847_v38 = vld [vmem:[#allocation2 + $0x88] sm:$0xf]  ;;  %v565_v49 = vld [vmem:[#allocation2 + $0x54] sm:$0xff]  }
  0xb4   : > { %4902 = vrot.lane.b32.xlu1 %v4901_v56, %s5272_s25  ;;  %v2069_v57 = vsel %vm5392_vm6, %v2064_v22, %v2068_v55  ;;  %v5780_v29 = vpack.i.bf16 %v2468_v19, %v2452_v52  ;;  %v5794_v56 = vld [vmem:[#allocation2 + $0x84] sm:$0xff]   ;;  %v4689_v36 = vunpack.i.l.bf16 %v4688_v40  ;;  %v4700_v50 = vunpack.i.h.bf16 %v4698_v37 }
  0xb5   : > { %v5800_v28 = vunpack.c.l.bf16 %v2069_v57  ;;  %v5802_v8 = vpack.i.bf16 %v2469_v21, %v2453_v33  ;;  %v4699_v46 = vunpack.i.l.bf16 %v4698_v37  ;;  %v2677_v35 = vunpack.c.l.bf16 %v5774_v47  ;;  %1277 = vst.msk [vmem:[#allocation3 + $0x8] sm:$0xff] %vm1275_vm9, %v4690_v12  ;;  %v4708_v37 = vpop.permute.xlu0 %4707 }
  0xb6   : > { %4917 = vrot.lane.b32.xlu0 %v5689_v62, %s5273_s26  ;;  %v2693_v13 = vunpack.c.l.bf16 %v5790_v32  ;;  %v1571_v14 = vunpack.c.l.bf16 %v5792_v39  ;;  %v1587_v45 = vunpack.c.l.bf16 %v5794_v56  ;;  %1276 = vst.msk [vmem:[#allocation3] sm:$0xff] %vm1275_vm9, %v4689_v36  ;;  %1281 = vst.msk [vmem:[#allocation3 + $0x28] sm:$0xff] %vm1275_vm9, %v4700_v50  ;;  %v488_v26 = vunpack.c.l.bf16 %v456_v51  ;;  %v561_v36 = vld [vmem:[#allocation2 + $0x3c] sm:$0xff]  }
  0xb7   : > { %v4961_v60 = vpack.i.bf16 %v5800_v28, %v5772_v5  ;;  %1280 = vst.msk [vmem:[#allocation3 + $0x20] sm:$0xff] %vm1275_vm9, %v4699_v46  ;;  %v489_v11 = vunpack.c.h.bf16 %v456_v51  ;;  %v586_v31 = vunpack.c.h.bf16 %v553_v16  ;;  %v4695_v10 = vunpack.i.h.bf16 %v4693_v59 }
  0xb8   : > { %4912 = vrot.lane.b32.xlu1 %v4911_v34, %s5272_s25  ;;  %v585_v34 = vunpack.c.l.bf16 %v553_v16  ;;  %v5834_v48 = vpack.i.bf16 %v2693_v13, %v2677_v35  ;;  %v5836_v44 = vpack.i.bf16 %v1587_v45, %v1571_v14  ;;  %v4694_v2 = vunpack.i.l.bf16 %v4693_v59  ;;  %521 = vst.msk [vmem:[#allocation3 + $0x10] sm:$0xff] %vm518_vm7, %v488_v26 }
  0xb9   : > { %522 = vst.msk [vmem:[#allocation3 + $0x18] sm:$0xff] %vm518_vm7, %v489_v11  ;;  %v492_v61 = vunpack.c.l.bf16 %v460_v58  ;;  %v493_v30 = vunpack.c.h.bf16 %v5774_v47  ;;  %v589_v25 = vunpack.c.l.bf16 %v5829_v18  ;;  %v590_v43 = vunpack.c.h.bf16 %v5792_v39  ;;  %v4713_v50 = vpop.permute.xlu1 %4712 }
  0xba   : > { %4927 = vrot.lane.b32.xlu0 %v5689_v62, %s5273_s26  ;;  %618 = vst.msk [vmem:[#allocation3 + $0x10] sm:$0xff] %vm615_vm8, %v585_v34  ;;  %619 = vst.msk [vmem:[#allocation3 + $0x18] sm:$0xff] %vm615_vm8, %v586_v31  ;;  %v4705_v1 = vunpack.i.h.bf16 %v4703_v17  ;;  %v4704_v40 = vunpack.i.l.bf16 %v4703_v17  ;;  %v2678_v54 = vunpack.c.h.bf16 %v460_v58  ;;  %v2694_v55 = vunpack.c.h.bf16 %v5790_v32  ;;  %v464_v32 = vld [vmem:[#allocation2 + $0x3c] sm:$0xff]   ;;  %v1767_v34 = vld [vmem:[#allocation2 + $0x24] sm:$0xf] }
  0xbb   : > { %1279 = vst.msk [vmem:[#allocation3 + $0x18] sm:$0xff] %vm1275_vm9, %v4695_v10  ;;  %1278 = vst.msk [vmem:[#allocation3 + $0x10] sm:$0xff] %vm1275_vm9, %v4694_v2  ;;  %v2963_v52 = vshrl.u32 %v2872_v42, 16  ;;  %v2966_v3 = vshll.u32 %v2872_v42, 16  ;;  %v2972_v22 = vshll.u32 %v5838_v53, 16  ;;  %v2976_v19 = vshrl.u32 %v5838_v53, 16 }
  0xbc   : > { %4922 = vrot.lane.b32.xlu1 %v5694_v63, %s5273_s26  ;;  %525 = vst.msk [vmem:[#allocation3 + $0x30] sm:$0xff] %vm518_vm7, %v492_v61  ;;  %526 = vst.msk [vmem:[#allocation3 + $0x38] sm:$0xff] %vm518_vm7, %v493_v30  ;;  %v5862_v33 = vpack.i.bf16 %v2694_v55, %v2678_v54  ;;  %v3155_v21 = vshrl.u32 %v2896_v15, 16  ;;  %v3158_v47 = vshll.u32 %v2896_v15, 16  ;;  %v3164_v57 = vshll.u32 %v5847_v38, 16  ;;  %v4503_v55 = vld [vmem:[#allocation2 + $0x48] sm:$0xff]  }
  0xbd   : > { %622 = vst.msk [vmem:[#allocation3 + $0x30] sm:$0xff] %vm615_vm8, %v589_v25  ;;  %623 = vst.msk [vmem:[#allocation3 + $0x38] sm:$0xff] %vm615_vm8, %v590_v43  ;;  %v2965_v39 = vrot.slane %v2963_v52, 4  ;;  %v2968_v12 = vrot.slane %v2966_v3, 5  ;;  %v5869_v51 = vrot.slane %v2972_v22, 5  ;;  %v3168_v16 = vshrl.u32 %v5847_v38, 16 }
  0xbe   : > { %4937 = vrot.lane.b32.xlu0 %v5694_v63, %s5273_s26  ;;  %1283 = vst.msk [vmem:[#allocation3 + $0x38] sm:$0xff] %vm1275_vm9, %v4705_v1  ;;  %1282 = vst.msk [vmem:[#allocation3 + $0x30] sm:$0xff] %vm1275_vm9, %v4704_v40  ;;  %v3157_v46 = vrot.slane %v3155_v21, 4  ;;  %v3160_v35 = vrot.slane %v3158_v47, 5  ;;  %v5874_v59 = vrot.slane %v3164_v57, 5  ;;  %v4710_v13 = vunpack.i.h.bf16 %v4708_v37  ;;  %v4718_v21 = vpop.permute.xlu0 %4717 }
  0xbf   : > { %v2969_v14 = vor.u32 %v2968_v12, %v2965_v39  ;;  %v4709_v45 = vunpack.i.l.bf16 %v4708_v37  ;;  %v496_v26 = vunpack.c.l.bf16 %v464_v32  ;;  %v497_v11 = vunpack.c.h.bf16 %v464_v32  ;;  %v5876_v31 = vld [vmem:[#allocation2 + $0x28] sm:$0xf]  ;;  %v1791_v2 = vld [vmem:[#allocation2 + $0x84] sm:$0xf]  ;;  %v445_v43 = vld [vmem:[%s5884_s5] sm:$0xf] }
  0xc0   : > { %4932 = vrot.lane.b32.xlu1 %v5689_v62, %s5271_s24  ;;  %v3161_v58 = vor.u32 %v3160_v35, %v3157_v46  ;;  %1285 = vst.msk [vmem:[#allocation3 + $0x48] sm:$0xff] %vm1275_vm9, %v4710_v13  ;;  %v593_v17 = vunpack.c.l.bf16 %v561_v36  ;;  %v594_v10 = vunpack.c.h.bf16 %v561_v36  ;;  %v4715_v62 = vunpack.i.h.bf16 %v4713_v50  ;;  %v446_v54 = vld [vmem:[%s5884_s5 + $0x4] sm:$0xf]  ;;  %v468_v12 = vld [vmem:[#allocation2 + $0x54] sm:$0xff]  }
  0xc1   : > { %v2970_v42 = vrot.slane %v2969_v14, 4  ;;  %1284 = vst.msk [vmem:[#allocation3 + $0x40] sm:$0xff] %vm1275_vm9, %v4709_v45  ;;  %v4714_v61 = vunpack.i.l.bf16 %v4713_v50  ;;  %v1572_v30 = vunpack.c.h.bf16 %v5829_v18  ;;  %v1588_v25 = vunpack.c.h.bf16 %v5794_v56 }
  0xc2   : > { %4947 = vrot.lane.b32.xlu0 %v5694_v63, %s5271_s24  ;;  %529 = vst.msk [vmem:[#allocation3 + $0x50] sm:$0xff] %vm518_vm7, %v496_v26  ;;  %530 = vst.msk [vmem:[#allocation3 + $0x58] sm:$0xff] %vm518_vm7, %v497_v11  ;;  %v3162_v63 = vrot.slane %v3161_v58, 4  ;;  %v1879_v15 = vshrl.u32 %v1767_v34, 16  ;;  %v1882_v1 = vshll.u32 %v1767_v34, 16  ;;  %v1888_v40 = vshll.u32 %v5876_v31, 16 }
  0xc3   : > { %626 = vst.msk [vmem:[#allocation3 + $0x50] sm:$0xff] %vm615_vm8, %v593_v17  ;;  %627 = vst.msk [vmem:[#allocation3 + $0x58] sm:$0xff] %vm615_vm8, %v594_v10  ;;  %v2975_v56 = vsel %vm5392_vm6, %v2970_v42, %v5869_v51  ;;  %v5908_v24 = vpack.i.bf16 %v1588_v25, %v1572_v30  ;;  %v2071_v18 = vshrl.u32 %v1791_v2, 16  ;;  %v2074_v39 = vshll.u32 %v1791_v2, 16  ;;  %v2898_v10 = vld [vmem:[#allocation2 + $0x8c] sm:$0x1] }
  0xc4   : > { %4942 = vrot.lane.b32.xlu1 %v4941_v6, %s5274_s27  ;;  %449 = vst.msk [vmem:[#allocation2 + $0xc0] sm:$0xf] %vm361_vm2, %v445_v43  ;;  %v1892_v6 = vshrl.u32 %v5876_v31, 16  ;;  %450 = vst.msk [vmem:[#allocation2 + $0xc4] sm:$0xf] %vm361_vm2, %v446_v54  ;;  %v3167_v52 = vsel %vm5392_vm6, %v3162_v63, %v5874_v59  ;;  %v5917_v3 = vunpack.c.l.bf16 %v2975_v56  ;;  %v1881_v22 = vrot.slane %v1879_v15, 4  ;;  %v4723_v45 = vpop.permute.xlu1 %4722 }
  0xc5   : > { %1287 = vst.msk [vmem:[#allocation3 + $0x58] sm:$0xff] %vm1275_vm9, %v4715_v62  ;;  %1286 = vst.msk [vmem:[#allocation3 + $0x50] sm:$0xff] %vm1275_vm9, %v4714_v61  ;;  %v1884_v37 = vrot.slane %v1882_v1, 5  ;;  %v5923_v47 = vunpack.c.l.bf16 %v3167_v52  ;;  %v5925_v57 = vrot.slane %v1888_v40, 5  ;;  %v2073_v32 = vrot.slane %v2071_v18, 4  ;;  %v4504_v40 = vld [vmem:[#allocation2 + $0x60] sm:$0xff]  }
  0xc6   : > { %4957 = vrot.lane.b32.xlu0 %v4956_v7, %s5274_s27  ;;  %v2080_v50 = vshll.u32 %v5910_v20, 16  ;;  %v2084_v46 = vshrl.u32 %v5910_v20, 16  ;;  %v4323_v35 = vunpack.c.l.bf16 %v4503_v55  ;;  %v2076_v7 = vrot.slane %v2074_v39, 5  ;;  %v1769_v62 = vld [vmem:[#allocation2 + $0x2c] sm:$0x1] }
  0xc7   : > { %v1885_v36 = vor.u32 %v1884_v37, %v1881_v22  ;;  %v4991_v41 = vpack.i.bf16 %v5923_v47, %v5917_v3  ;;  %v4324_v13 = vunpack.c.h.bf16 %v4503_v55  ;;  %v4720_v14 = vunpack.i.h.bf16 %v4718_v21 }
  0xc8   : > { %4952 = vrot.lane.b32.xlu1 %v4951_v23, %s5272_s25  ;;  %v2082_v11 = vrot.slane %v2080_v50, 5  ;;  %531 = vst.msk [vmem:[#allocation3 + $0x60] sm:$0xff] %vm518_vm7, %v4323_v35  ;;  %v4719_v9 = vunpack.i.l.bf16 %v4718_v21  ;;  %v500_v27 = vunpack.c.l.bf16 %v468_v12  ;;  %v2874_v23 = vld [vmem:[#allocation2 + $0x2c] sm:$0x1]  ;;  %v2077_v34 = vor.u32 %v2076_v7, %v2073_v32 }
  0xc9   : > { %v1886_v26 = vrot.slane %v1885_v36, 4  ;;  %532 = vst.msk [vmem:[#allocation3 + $0x68] sm:$0xff] %vm518_vm7, %v4324_v13  ;;  %v501_v31 = vunpack.c.h.bf16 %v468_v12  ;;  %v597_v58 = vunpack.c.l.bf16 %v565_v49  ;;  %v598_v17 = vunpack.c.h.bf16 %v565_v49  ;;  %v569_v36 = vld [vmem:[#allocation2 + $0x6c] sm:$0xff]  }
  0xca   : > { %4967 = vrot.lane.b32.xlu0 %v5780_v29, %s5273_s26  ;;  %628 = vst.msk [vmem:[#allocation3 + $0x60] sm:$0xff] %vm615_vm8, %v4323_v35  ;;  %629 = vst.msk [vmem:[#allocation3 + $0x68] sm:$0xff] %vm615_vm8, %v4324_v13  ;;  %v4725_v29 = vunpack.i.h.bf16 %v4723_v45  ;;  %v4724_v42 = vunpack.i.l.bf16 %v4723_v45  ;;  %v2978_v61 = vrot.slane %v2976_v19, 4  ;;  %v2078_v30 = vrot.slane %v2077_v34, 4  ;;  %v1793_v19 = vld [vmem:[#allocation2 + $0x8c] sm:$0x1] }
  0xcb   : > { %v1891_v2 = vsel %vm5392_vm6, %v1886_v26, %v5925_v57  ;;  %1288 = vst.msk [vmem:[#allocation3 + $0x60] sm:$0xff] %vm1275_vm9, %v4719_v9  ;;  %1289 = vst.msk [vmem:[#allocation3 + $0x68] sm:$0xff] %vm1275_vm9, %v4720_v14  ;;  %v2982_v5 = vshll.u32 %v2874_v23, 16  ;;  %v3170_v28 = vrot.slane %v3168_v16, 4  ;;  %v3174_v53 = vshll.u32 %v2898_v10, 16  ;;  %v4505_v34 = vld [vmem:[#allocation2 + $0x78] sm:$0xff]  }
  0xcc   : > { %4962 = vrot.lane.b32.xlu1 %v4961_v60, %s5272_s25  ;;  %533 = vst.msk [vmem:[#allocation3 + $0x70] sm:$0xff] %vm518_vm7, %v500_v27  ;;  %v5952_v25 = vunpack.c.l.bf16 %v1891_v2  ;;  %534 = vst.msk [vmem:[#allocation3 + $0x78] sm:$0xff] %vm518_vm7, %v501_v31  ;;  %v2979_v60 = vor.u32 %v2978_v61, %v5869_v51  ;;  %v1894_v43 = vrot.slane %v1892_v6, 4  ;;  %v1898_v63 = vshll.u32 %v1769_v62, 16  ;;  %v476_v2 = vld [vmem:[#allocation2 + $0x84] sm:$0xff]  }
  0xcd   : > { %630 = vst.msk [vmem:[#allocation3 + $0x70] sm:$0xff] %vm615_vm8, %v597_v58  ;;  %631 = vst.msk [vmem:[#allocation3 + $0x78] sm:$0xff] %vm615_vm8, %v598_v17  ;;  %v2083_v15 = vsel %vm5392_vm6, %v2078_v30, %v2082_v11  ;;  %v2984_v38 = vrot.slane %v2982_v5, 5  ;;  %v3171_v16 = vor.u32 %v3170_v28, %v5874_v59  ;;  %v2086_v1 = vrot.slane %v2084_v46, 4  ;;  %v573_v30 = vld [vmem:[#allocation2 + $0x84] sm:$0xff]  }
  0xce   : > { %1290 = vst.msk [vmem:[#allocation3 + $0x70] sm:$0xff] %vm1275_vm9, %v4724_v42  ;;  %4977 = vrot.lane.b32.xlu0 %v5834_v48, %s5273_s26  ;;  %1291 = vst.msk [vmem:[#allocation3 + $0x78] sm:$0xff] %vm1275_vm9, %v4725_v29  ;;  %v5970_v51 = vunpack.c.l.bf16 %v2083_v15  ;;  %v2980_v54 = vrot.slane %v2979_v60, 4  ;;  %v3176_v56 = vrot.slane %v3174_v53, 5  ;;  %v1895_v20 = vor.u32 %v1894_v43, %v5925_v57  ;;  %v4728_v48 = vpop.permute.xlu0 %4727  ;;  %v480_v60 = vld [vmem:[#allocation2 + $0x9c] sm:$0xff]  }
  0xcf   : > { %v3172_v6 = vrot.slane %v3171_v16, 4  ;;  %v1900_v18 = vrot.slane %v1898_v63, 5  ;;  %v2087_v55 = vor.u32 %v2086_v1, %v2082_v11  ;;  %v2090_v52 = vshll.u32 %v1793_v19, 16  ;;  %v4733_v50 = vpop.permute.xlu1 %4732  ;;  %v4534_v11 = vld [vmem:[#allocation2 + $0x90] sm:$0xff]   ;;  %v577_v53 = vld [vmem:[#allocation2 + $0x9c] sm:$0xff]  }
  0xd0   : > { %4972 = vrot.lane.b32.xlu1 %v5802_v8, %s5273_s26  ;;  %v5001_v22 = vpack.i.bf16 %v5970_v51, %v5952_v25  ;;  %v2985_v59 = vsel %vm5392_vm6, %v2980_v54, %v2984_v38  ;;  %v1896_v37 = vrot.slane %v1895_v20, 4  ;;  %v4327_v21 = vunpack.c.l.bf16 %v4504_v40  ;;  %v472_v8 = vld [vmem:[#allocation2 + $0x6c] sm:$0xff]  }
  0xd1   : > { %v3177_v57 = vsel %vm5392_vm6, %v3172_v6, %v3176_v56  ;;  %v3335_v32 = vunpack.c.l.bf16 %v2985_v59  ;;  %v2088_v39 = vrot.slane %v2087_v55, 4  ;;  %v2092_v12 = vrot.slane %v2090_v52, 5  ;;  %v2875_v38 = vld [vmem:[#allocation2 + $0x30] sm:$0xf]  ;;  %v6022_v56 = vld [vmem:[#allocation2 + $0x34] sm:$0xf] }
  0xd2   : > { %4987 = vrot.lane.b32.xlu0 %v5862_v33, %s5273_s26  ;;  %v3351_v46 = vunpack.c.l.bf16 %v3177_v57  ;;  %v1901_v35 = vsel %vm5392_vm6, %v1896_v37, %v1900_v18  ;;  %v4328_v49 = vunpack.c.h.bf16 %v4504_v40  ;;  %535 = vst.msk [vmem:[#allocation3 + $0x80] sm:$0xff] %vm518_vm7, %v4327_v21  ;;  %v4730_v7 = vunpack.i.h.bf16 %v4728_v48  ;;  %v4530_v33 = vld [vmem:[#allocation2 + $0x30] sm:$0xff]  }
  0xd3   : > { %v2093_v13 = vsel %vm5392_vm6, %v2088_v39, %v2092_v12  ;;  %v5988_v14 = vunpack.c.l.bf16 %v1901_v35  ;;  %632 = vst.msk [vmem:[#allocation3 + $0x80] sm:$0xff] %vm615_vm8, %v4327_v21  ;;  %v4729_v45 = vunpack.i.l.bf16 %v4728_v48  ;;  %v504_v26 = vunpack.c.l.bf16 %v472_v8  ;;  %v2899_v20 = vld [vmem:[#allocation2 + $0x90] sm:$0xf]  ;;  %v6032_v59 = vld [vmem:[#allocation2 + $0x94] sm:$0xf]  ;;  %v4507_v21 = vld [vmem:[#allocation2 + $0xa8] sm:$0xff]  }
  0xd4   : > { %4982 = vrot.lane.b32.xlu1 %v5836_v44, %s5271_s24  ;;  %v5006_v44 = vpack.i.bf16 %v3351_v46, %v3335_v32  ;;  %v5991_v9 = vunpack.c.l.bf16 %v2093_v13  ;;  %536 = vst.msk [vmem:[#allocation3 + $0x88] sm:$0xff] %vm518_vm7, %v4328_v49  ;;  %v505_v27 = vunpack.c.h.bf16 %v472_v8  ;;  %v601_v23 = vunpack.c.l.bf16 %v569_v36  ;;  %v484_v12 = vld [vmem:[#allocation2 + $0xb4] sm:$0xff]  }
  0xd5   : > { %v4738_v31 = vpop.permute.xlu0 %4737  ;;  %633 = vst.msk [vmem:[#allocation3 + $0x88] sm:$0xff] %vm615_vm8, %v4328_v49  ;;  %v602_v58 = vunpack.c.h.bf16 %v569_v36  ;;  %v4735_v17 = vunpack.i.h.bf16 %v4733_v50  ;;  %v4734_v10 = vunpack.i.l.bf16 %v4733_v50  ;;  %v4443_v62 = vunpack.c.l.bf16 %v4530_v33  ;;  %v581_v36 = vld [vmem:[#allocation2 + $0xb4] sm:$0xff]  }
  0xd6   : > { %4997 = vrot.lane.b32.xlu0 %v5908_v24, %s5271_s24  ;;  %1292 = vst.msk [vmem:[#allocation3 + $0x80] sm:$0xff] %vm1275_vm9, %v4729_v45  ;;  %v5011_v29 = vpack.i.bf16 %v5991_v9, %v5988_v14  ;;  %1293 = vst.msk [vmem:[#allocation3 + $0x88] sm:$0xff] %vm1275_vm9, %v4730_v7  ;;  %v4459_v24 = vunpack.c.l.bf16 %v4534_v11  ;;  %v4444_v42 = vunpack.c.h.bf16 %v4530_v33  ;;  %v4460_v61 = vunpack.c.h.bf16 %v4534_v11  ;;  %v1770_v7 = vld [vmem:[#allocation2 + $0x30] sm:$0xf]  ;;  %v6060_v11 = vld [vmem:[#allocation2 + $0x34] sm:$0xf] }
  0xd7   : > { %537 = vst.msk [vmem:[#allocation3 + $0x90] sm:$0xff] %vm518_vm7, %v504_v26  ;;  %538 = vst.msk [vmem:[#allocation3 + $0x98] sm:$0xff] %vm518_vm7, %v505_v27  ;;  %v4331_v5 = vunpack.c.l.bf16 %v4505_v34  ;;  %v4332_v3 = vunpack.c.h.bf16 %v4505_v34  ;;  %v4740_v47 = vunpack.i.h.bf16 %v4738_v31  ;;  %v508_v63 = vunpack.c.l.bf16 %v476_v2 }
  0xd8   : > { %4992 = vrot.lane.b32.xlu1 %v4991_v41, %s5274_s27  ;;  %634 = vst.msk [vmem:[#allocation3 + $0x90] sm:$0xff] %vm615_vm8, %v601_v23  ;;  %635 = vst.msk [vmem:[#allocation3 + $0x98] sm:$0xff] %vm615_vm8, %v602_v58  ;;  %v4739_v41 = vunpack.i.l.bf16 %v4738_v31  ;;  %v6011_v19 = vpack.i.bf16 %v4459_v24, %v4443_v62  ;;  %v6013_v43 = vpack.i.bf16 %v4460_v61, %v4444_v42  ;;  %v509_v15 = vunpack.c.h.bf16 %v476_v2  ;;  %v1794_v62 = vld [vmem:[#allocation2 + $0x90] sm:$0xf] }
  0xd9   : > { %1294 = vst.msk [vmem:[#allocation3 + $0x90] sm:$0xff] %vm1275_vm9, %v4734_v10  ;;  %v4743_v28 = vpop.permute.xlu1 %4742  ;;  %1295 = vst.msk [vmem:[#allocation3 + $0x98] sm:$0xff] %vm1275_vm9, %v4735_v17  ;;  %v605_v16 = vunpack.c.l.bf16 %v573_v30  ;;  %v606_v1 = vunpack.c.h.bf16 %v573_v30  ;;  %v512_v6 = vunpack.c.l.bf16 %v480_v60  ;;  %v513_v18 = vunpack.c.h.bf16 %v480_v60 }
  0xda   : > { %543 = vst.msk [vmem:[#allocation3 + $0xc0] sm:$0xff] %vm518_vm7, %v4459_v24  ;;  %544 = vst.msk [vmem:[#allocation3 + $0xc8] sm:$0xff] %vm518_vm7, %v4460_v61  ;;  %5007 = vrot.lane.b32.xlu0 %v5006_v44, %s5274_s27  ;;  %v4745_v40 = vunpack.i.h.bf16 %v4743_v28  ;;  %v4744_v54 = vunpack.i.l.bf16 %v4743_v28  ;;  %v609_v55 = vunpack.c.l.bf16 %v577_v53  ;;  %v610_v52 = vunpack.c.h.bf16 %v577_v53 }
  0xdb   : > { %539 = vst.msk [vmem:[#allocation3 + $0xa0] sm:$0xff] %vm518_vm7, %v4331_v5  ;;  %540 = vst.msk [vmem:[#allocation3 + $0xa8] sm:$0xff] %vm518_vm7, %v4332_v3  ;;  %v2990_v37 = vshll.u32 %v2875_v38, 16  ;;  %v2996_v8 = vshll.u32 %v6022_v56, 16  ;;  %v3000_v57 = vshrl.u32 %v6022_v56, 16  ;;  %v3179_v32 = vshrl.u32 %v2899_v20, 16 }
  0xdc   : > { %640 = vst.msk [vmem:[#allocation3 + $0xc0] sm:$0xff] %vm615_vm8, %v4459_v24  ;;  %641 = vst.msk [vmem:[#allocation3 + $0xc8] sm:$0xff] %vm615_vm8, %v4460_v61  ;;  %5002 = vrot.lane.b32.xlu1 %v5001_v22, %s5272_s25  ;;  %v4748_v48 = vpop.permute.xlu0 %4747  ;;  %v2987_v22 = vshrl.u32 %v2875_v38, 16  ;;  %v3182_v39 = vshll.u32 %v2899_v20, 16  ;;  %v3188_v35 = vshll.u32 %v6032_v59, 16  ;;  %v3192_v49 = vshrl.u32 %v6032_v59, 16 }
  0xdd   : > { %636 = vst.msk [vmem:[#allocation3 + $0xa0] sm:$0xff] %vm615_vm8, %v4331_v5  ;;  %637 = vst.msk [vmem:[#allocation3 + $0xa8] sm:$0xff] %vm615_vm8, %v4332_v3  ;;  %v4750_v25 = vunpack.i.h.bf16 %v4748_v48  ;;  %v4749_v51 = vunpack.i.l.bf16 %v4748_v48  ;;  %v2992_v46 = vrot.slane %v2990_v37, 5  ;;  %v6056_v33 = vrot.slane %v2996_v8, 5  ;;  %v1795_v5 = vld [vmem:[#allocation2 + $0x94] sm:$0xf] }
  0xde   : > { %541 = vst.msk [vmem:[#allocation3 + $0xb0] sm:$0xff] %vm518_vm7, %v508_v63  ;;  %542 = vst.msk [vmem:[#allocation3 + $0xb8] sm:$0xff] %vm518_vm7, %v509_v15  ;;  %5017 = vrot.lane.b32.xlu0 %v6011_v19, %s5273_s26  ;;  %v2989_v50 = vrot.slane %v2987_v22, 4  ;;  %v3181_v13 = vrot.slane %v3179_v32, 4  ;;  %v3184_v45 = vrot.slane %v3182_v39, 5  ;;  %v6058_v26 = vunpack.c.l.bf16 %v4507_v21 }
  0xdf   : > { %1297 = vst.msk [vmem:[#allocation3 + $0xa8] sm:$0xff] %vm1275_vm9, %v4740_v47  ;;  %1296 = vst.msk [vmem:[#allocation3 + $0xa0] sm:$0xff] %vm1275_vm9, %v4739_v41  ;;  %v6062_v27 = vrot.slane %v3188_v35, 5  ;;  %v6064_v23 = vunpack.c.h.bf16 %v4507_v21  ;;  %v516_v34 = vunpack.c.l.bf16 %v484_v12  ;;  %v517_v14 = vunpack.c.h.bf16 %v484_v12  ;;  %v1772_v12 = vld [vmem:[#allocation2 + $0x38] sm:$0x1] }
  0xe0   : > { %638 = vst.msk [vmem:[#allocation3 + $0xb0] sm:$0xff] %vm615_vm8, %v605_v16  ;;  %639 = vst.msk [vmem:[#allocation3 + $0xb8] sm:$0xff] %vm615_vm8, %v606_v1  ;;  %5012 = vrot.lane.b32.xlu1 %v5011_v29, %s5272_s25  ;;  %v2993_v44 = vor.u32 %v2992_v46, %v2989_v50  ;;  %v3185_v31 = vor.u32 %v3184_v45, %v3181_v13  ;;  %v613_v9 = vunpack.c.l.bf16 %v581_v36  ;;  %v614_v58 = vunpack.c.h.bf16 %v581_v36  ;;  %v2877_v16 = vld [vmem:[#allocation2 + $0x38] sm:$0x1] }
  0xe1   : > { %1299 = vst.msk [vmem:[#allocation3 + $0xb8] sm:$0xff] %vm1275_vm9, %v4745_v40  ;;  %1298 = vst.msk [vmem:[#allocation3 + $0xb0] sm:$0xff] %vm1275_vm9, %v4744_v54  ;;  %v1903_v2 = vshrl.u32 %v1770_v7, 16  ;;  %v1906_v29 = vshll.u32 %v1770_v7, 16  ;;  %v1912_v24 = vshll.u32 %v6060_v11, 16  ;;  %v1916_v3 = vshrl.u32 %v6060_v11, 16 }
  0xe2   : > { %545 = vst.msk [vmem:[#allocation3 + $0xd0] sm:$0xff] %vm518_vm7, %v512_v6  ;;  %546 = vst.msk [vmem:[#allocation3 + $0xd8] sm:$0xff] %vm518_vm7, %v513_v18  ;;  %5027 = vrot.lane.b32.xlu0 %v6011_v19, %s5273_s26  ;;  %v4753_v17 = vpop.permute.xlu1 %4752  ;;  %v2994_v10 = vrot.slane %v2993_v44, 4  ;;  %v3186_v30 = vrot.slane %v3185_v31, 4  ;;  %v2095_v15 = vshrl.u32 %v1794_v62, 16  ;;  %v2098_v38 = vshll.u32 %v1794_v62, 16 }
  0xe3   : > { %1301 = vst.msk [vmem:[#allocation3 + $0xc8] sm:$0xff] %vm1275_vm9, %v4750_v25  ;;  %1300 = vst.msk [vmem:[#allocation3 + $0xc0] sm:$0xff] %vm1275_vm9, %v4749_v51  ;;  %v4755_v42 = vunpack.i.h.bf16 %v4753_v17  ;;  %v4754_v61 = vunpack.i.l.bf16 %v4753_v17  ;;  %v1905_v41 = vrot.slane %v1903_v2, 4  ;;  %v1908_v28 = vrot.slane %v1906_v29, 5  ;;  %v2901_v18 = vld [vmem:[#allocation2 + $0x98] sm:$0x1] }
  0xe4   : > { %642 = vst.msk [vmem:[#allocation3 + $0xd0] sm:$0xff] %vm615_vm8, %v609_v55  ;;  %643 = vst.msk [vmem:[#allocation3 + $0xd8] sm:$0xff] %vm615_vm8, %v610_v52  ;;  %5022 = vrot.lane.b32.xlu1 %v6013_v43, %s5273_s26  ;;  %v2999_v47 = vsel %vm5392_vm6, %v2994_v10, %v6056_v33  ;;  %v6087_v60 = vrot.slane %v1912_v24, 5  ;;  %v3191_v53 = vsel %vm5392_vm6, %v3186_v30, %v6062_v27  ;;  %v2104_v54 = vshll.u32 %v1795_v5, 16 }
  0xe5   : > { %547 = vst.msk [vmem:[#allocation3 + $0xe0] sm:$0xff] %vm518_vm7, %v6058_v26  ;;  %548 = vst.msk [vmem:[#allocation3 + $0xe8] sm:$0xff] %vm518_vm7, %v6064_v23  ;;  %v3336_v63 = vunpack.c.l.bf16 %v2999_v47  ;;  %v3352_v1 = vunpack.c.l.bf16 %v3191_v53  ;;  %v1909_v40 = vor.u32 %v1908_v28, %v1905_v41  ;;  %v2108_v20 = vshrl.u32 %v1795_v5, 16 }
  0xe6   : > { %644 = vst.msk [vmem:[#allocation3 + $0xe0] sm:$0xff] %vm615_vm8, %v6058_v26  ;;  %645 = vst.msk [vmem:[#allocation3 + $0xe8] sm:$0xff] %vm615_vm8, %v6064_v23  ;;  %5037 = vrot.lane.b32.xlu0 %v6013_v43, %s5273_s26  ;;  %v2097_v48 = vrot.slane %v2095_v15, 4  ;;  %v2100_v6 = vrot.slane %v2098_v38, 5  ;;  %v3002_v55 = vrot.slane %v3000_v57, 4  ;;  %v2106_v22 = vrot.slane %v2104_v54, 5 }
  0xe7   : > { %549 = vst.msk [vmem:[#allocation3 + $0xf0] sm:$0xff] %vm518_vm7, %v516_v34  ;;  %550 = vst.msk [vmem:[#allocation3 + $0xf8] sm:$0xff] %vm518_vm7, %v517_v14  ;;  %v5041_v52 = vpack.i.bf16 %v3352_v1, %v3336_v63  ;;  %v1910_v51 = vrot.slane %v1909_v40, 4  ;;  %v3006_v37 = vshll.u32 %v2877_v16, 16  ;;  %v3194_v57 = vrot.slane %v3192_v49, 4 }
  0xe8   : > { %646 = vst.msk [vmem:[#allocation3 + $0xf0] sm:$0xff] %vm615_vm8, %v613_v9  ;;  %647 = vst.msk [vmem:[#allocation3 + $0xf8] sm:$0xff] %vm615_vm8, %v614_v58  ;;  %5032 = vrot.lane.b32.xlu1 %v6011_v19, %s5271_s24  ;;  %v4758_v25 = vpop.permute.xlu0 %4757  ;;  %v2101_v32 = vor.u32 %v2100_v6, %v2097_v48  ;;  %v3003_v39 = vor.u32 %v3002_v55, %v6056_v33  ;;  %v3198_v36 = vshll.u32 %v2901_v18, 16  ;;  %v1918_v7 = vrot.slane %v1916_v3, 4  ;;  %v1796_v14 = vld [vmem:[#allocation2 + $0x98] sm:$0x1] }
  0xe9   : > { %1303 = vst.msk [vmem:[#allocation3 + $0xd8] sm:$0xff] %vm1275_vm9, %v4755_v42  ;;  %1302 = vst.msk [vmem:[#allocation3 + $0xd0] sm:$0xff] %vm1275_vm9, %v4754_v61  ;;  %v4760_v21 = vunpack.i.h.bf16 %v4758_v25  ;;  %v4759_v8 = vunpack.i.l.bf16 %v4758_v25  ;;  %v1915_v19 = vsel %vm5392_vm6, %v1910_v51, %v6087_v60  ;;  %v3008_v56 = vrot.slane %v3006_v37, 5  ;;  %v2424_v9 = vld [vmem:[#allocation2 + $0x3c] sm:$0xff]  }
  0xea   : > { %5047 = vrot.lane.b32.xlu0 %v6013_v43, %s5271_s24  ;;  %v2102_v50 = vrot.slane %v2101_v32, 4  ;;  %v2230_v46 = vunpack.c.l.bf16 %v1915_v19  ;;  %v3004_v35 = vrot.slane %v3003_v39, 4  ;;  %v3195_v33 = vor.u32 %v3194_v57, %v6062_v27  ;;  %v2440_v3 = vld [vmem:[#allocation2 + $0x9c] sm:$0xff]  }
  0xeb   : > { %1305 = vst.msk [vmem:[#allocation3 + $0xe8] sm:$0xff] %vm1275_vm9, %v4760_v21  ;;  %1304 = vst.msk [vmem:[#allocation3 + $0xe0] sm:$0xff] %vm1275_vm9, %v4759_v8  ;;  %v3200_v13 = vrot.slane %v3198_v36, 5  ;;  %v1922_v45 = vshll.u32 %v1772_v12, 16  ;;  %v2110_v11 = vrot.slane %v2108_v20, 4  ;;  %v1919_v2 = vor.u32 %v1918_v7, %v6087_v60  ;;  %v2649_v60 = vld [vmem:[#allocation2 + $0x3c] sm:$0xff]  }
  0xec   : > { %5042 = vrot.lane.b32.xlu1 %v5041_v52, %s5274_s27  ;;  %v4768_v43 = vpop.permute.xlu0 %4767  ;;  %v2107_v59 = vsel %vm5392_vm6, %v2102_v50, %v2106_v22  ;;  %v3009_v31 = vsel %vm5392_vm6, %v3004_v35, %v3008_v56  ;;  %v3196_v62 = vrot.slane %v3195_v33, 4  ;;  %v2114_v30 = vshll.u32 %v1796_v14, 16  ;;  %v2665_v18 = vld [vmem:[#allocation2 + $0x9c] sm:$0xff]  }
  0xed   : > { %v4770_v49 = vunpack.i.h.bf16 %v4768_v43  ;;  %v4769_v34 = vunpack.i.l.bf16 %v4768_v43  ;;  %v2246_v10 = vunpack.c.l.bf16 %v2107_v59  ;;  %v3337_v27 = vunpack.c.l.bf16 %v3009_v31  ;;  %v6132_v37 = vld [vmem:[#allocation2 + $0x3c] sm:$0xff]  }
  0xee   : > { %v4763_v44 = vpop.permute.xlu1 %4762  ;;  %v1924_v29 = vrot.slane %v1922_v45, 5  ;;  %v2111_v24 = vor.u32 %v2110_v11, %v2106_v22  ;;  %v3201_v61 = vsel %vm5392_vm6, %v3196_v62, %v3200_v13  ;;  %v2456_v47 = vunpack.c.l.bf16 %v2424_v9  ;;  %v6134_v21 = vld [vmem:[#allocation2 + $0x9c] sm:$0xff]  }
  0xef   : > { %v4765_v58 = vunpack.i.h.bf16 %v4763_v44  ;;  %v4764_v17 = vunpack.i.l.bf16 %v4763_v44  ;;  %1501 = vst.msk [vmem:[#allocation3] sm:$0xff] %vm1500_vm10, %v4769_v34  ;;  %1502 = vst.msk [vmem:[#allocation3 + $0x8] sm:$0xff] %vm1500_vm10, %v4770_v49  ;;  %v5051_v42 = vpack.i.bf16 %v2246_v10, %v2230_v46  ;;  %v3353_v28 = vunpack.c.l.bf16 %v3201_v61  ;;  %v2878_v56 = vld [vmem:[#allocation2 + $0x3c] sm:$0xf]  ;;  %v6137_v35 = vld [vmem:[#allocation2 + $0x40] sm:$0xf] }
  0xf0   : > { %v4778_v5 = vpop.permute.xlu0 %4777  ;;  %v1920_v53 = vrot.slane %v1919_v2, 4  ;;  %v2112_v63 = vrot.slane %v2111_v24, 4  ;;  %v2116_v1 = vrot.slane %v2114_v30, 5  ;;  %v2472_v48 = vunpack.c.l.bf16 %v2440_v3  ;;  %v2902_v59 = vld [vmem:[#allocation2 + $0x9c] sm:$0xf] }
  0xf1   : > { %1307 = vst.msk [vmem:[#allocation3 + $0xf8] sm:$0xff] %vm1275_vm9, %v4765_v58  ;;  %1306 = vst.msk [vmem:[#allocation3 + $0xf0] sm:$0xff] %vm1275_vm9, %v4764_v17  ;;  %v4780_v15 = vunpack.i.h.bf16 %v4778_v5  ;;  %5052 = vrot.lane.b32.xlu1 %v5051_v42, %s5272_s25  ;;  %v4779_v40 = vunpack.i.l.bf16 %v4778_v5  ;;  %v5056_v54 = vpack.i.bf16 %v3353_v28, %v3337_v27  ;;  %v2457_v6 = vunpack.c.h.bf16 %v2424_v9  ;;  %v6147_v17 = vld [vmem:[#allocation2 + $0xa0] sm:$0xf] }
  0xf2   : > { %v4773_v41 = vpop.permute.xlu1 %4772  ;;  %v1925_v20 = vsel %vm5392_vm6, %v1920_v53, %v1924_v29  ;;  %v2117_v55 = vsel %vm5392_vm6, %v2112_v63, %v2116_v1  ;;  %v2473_v25 = vunpack.c.h.bf16 %v2440_v3  ;;  %v2681_v22 = vunpack.c.l.bf16 %v2649_v60  ;;  %v1773_v53 = vld [vmem:[#allocation2 + $0x3c] sm:$0xf]  ;;  %v6162_v1 = vld [vmem:[#allocation2 + $0x40] sm:$0xf] }
  0xf3   : > { %v4775_v38 = vunpack.i.h.bf16 %v4773_v41  ;;  %v4774_v16 = vunpack.i.l.bf16 %v4773_v41  ;;  %1506 = vst.msk [vmem:[#allocation3 + $0x28] sm:$0xff] %vm1500_vm10, %v4780_v15  ;;  %v2231_v52 = vunpack.c.l.bf16 %v1925_v20  ;;  %1505 = vst.msk [vmem:[#allocation3 + $0x20] sm:$0xff] %vm1500_vm10, %v4779_v40  ;;  %5057 = vrot.lane.b32.xlu0 %v5056_v54, %s5274_s27  ;;  %v2247_v8 = vunpack.c.l.bf16 %v2117_v55  ;;  %v1797_v40 = vld [vmem:[#allocation2 + $0x9c] sm:$0xf] }
  0xf4   : > { %v4788_v51 = vpop.permute.xlu0 %4787  ;;  %v5066_v39 = vpack.i.bf16 %v2472_v48, %v2456_v47  ;;  %v5071_v50 = vpack.i.bf16 %v2473_v25, %v2457_v6  ;;  %v2697_v46 = vunpack.c.l.bf16 %v2665_v18  ;;  %v1575_v43 = vunpack.c.l.bf16 %v6132_v37 }
  0xf5   : > { %1503 = vst.msk [vmem:[#allocation3 + $0x10] sm:$0xff] %vm1500_vm10, %v4774_v16  ;;  %1504 = vst.msk [vmem:[#allocation3 + $0x18] sm:$0xff] %vm1500_vm10, %v4775_v38  ;;  %v4790_v12 = vunpack.i.h.bf16 %v4788_v51  ;;  %v4789_v19 = vunpack.i.l.bf16 %v4788_v51  ;;  %v5061_v7 = vpack.i.bf16 %v2247_v8, %v2231_v52  ;;  %v1591_v33 = vunpack.c.l.bf16 %v6134_v21 }
  0xf6   : > { %v4783_v32 = vpop.permute.xlu1 %4782  ;;  %v2682_v13 = vunpack.c.h.bf16 %v2649_v60  ;;  %v5076_v45 = vpack.i.bf16 %v2697_v46, %v2681_v22  ;;  %v2698_v44 = vunpack.c.h.bf16 %v2665_v18  ;;  %v3011_v49 = vshrl.u32 %v2878_v56, 16 }
  0xf7   : > { %v4785_v57 = vunpack.i.h.bf16 %v4783_v32  ;;  %v4784_v36 = vunpack.i.l.bf16 %v4783_v32  ;;  %1509 = vst.msk [vmem:[#allocation3 + $0x40] sm:$0xff] %vm1500_vm10, %v4789_v19  ;;  %1510 = vst.msk [vmem:[#allocation3 + $0x48] sm:$0xff] %vm1500_vm10, %v4790_v12  ;;  %v3014_v34 = vshll.u32 %v2878_v56, 16  ;;  %5062 = vrot.lane.b32.xlu1 %v5061_v7, %s5272_s25  ;;  %5067 = vrot.lane.b32.xlu0 %v5066_v39, %s5273_s26  ;;  %v5081_v14 = vpack.i.bf16 %v1591_v33, %v1575_v43  ;;  %v1798_v19 = vld [vmem:[#allocation2 + $0xa0] sm:$0xf] }
  0xf8   : > { %v4798_v11 = vpop.permute.xlu0 %4797  ;;  %v3020_v10 = vshll.u32 %v6137_v35, 16  ;;  %v5086_v2 = vpack.i.bf16 %v2698_v44, %v2682_v13  ;;  %v3013_v29 = vrot.slane %v3011_v49, 4  ;;  %v3024_v61 = vshrl.u32 %v6137_v35, 16 }
  0xf9   : > { %1508 = vst.msk [vmem:[#allocation3 + $0x38] sm:$0xff] %vm1500_vm10, %v4785_v57  ;;  %1507 = vst.msk [vmem:[#allocation3 + $0x30] sm:$0xff] %vm1500_vm10, %v4784_v36  ;;  %v4800_v9 = vunpack.i.h.bf16 %v4798_v11  ;;  %v4799_v58 = vunpack.i.l.bf16 %v4798_v11  ;;  %v3016_v24 = vrot.slane %v3014_v34, 5  ;;  %v3203_v30 = vshrl.u32 %v2902_v59, 16  ;;  %v2880_v34 = vld [vmem:[#allocation2 + $0x44] sm:$0x1] }
  0xfa   : > { %v4793_v31 = vpop.permute.xlu1 %4792  ;;  %v6152_v42 = vrot.slane %v3020_v10, 5  ;;  %v3206_v5 = vshll.u32 %v2902_v59, 16  ;;  %v3212_v3 = vshll.u32 %v6147_v17, 16  ;;  %v3216_v47 = vshrl.u32 %v6147_v17, 16 }
  0xfb   : > { %v4795_v62 = vunpack.i.h.bf16 %v4793_v31  ;;  %v4794_v27 = vunpack.i.l.bf16 %v4793_v31  ;;  %1513 = vst.msk [vmem:[#allocation3 + $0x60] sm:$0xff] %vm1500_vm10, %v4799_v58  ;;  %1514 = vst.msk [vmem:[#allocation3 + $0x68] sm:$0xff] %vm1500_vm10, %v4800_v9  ;;  %v1576_v28 = vunpack.c.h.bf16 %v6132_v37  ;;  %5072 = vrot.lane.b32.xlu1 %v5071_v50, %s5273_s26  ;;  %5077 = vrot.lane.b32.xlu0 %v5076_v45, %s5273_s26  ;;  %v3017_v15 = vor.u32 %v3016_v24, %v3013_v29 }
  0xfc   : > { %v4808_v41 = vpop.permute.xlu0 %4807  ;;  %v3205_v60 = vrot.slane %v3203_v30, 4  ;;  %v3208_v48 = vrot.slane %v3206_v5, 5  ;;  %v6164_v6 = vrot.slane %v3212_v3, 5  ;;  %v1592_v55 = vunpack.c.h.bf16 %v6134_v21  ;;  %v1775_v5 = vld [vmem:[#allocation2 + $0x44] sm:$0x1] }
  0xfd   : > { %1512 = vst.msk [vmem:[#allocation3 + $0x58] sm:$0xff] %vm1500_vm10, %v4795_v62  ;;  %1511 = vst.msk [vmem:[#allocation3 + $0x50] sm:$0xff] %vm1500_vm10, %v4794_v27  ;;  %v4810_v38 = vunpack.i.h.bf16 %v4808_v41  ;;  %v4809_v16 = vunpack.i.l.bf16 %v4808_v41  ;;  %v3018_v18 = vrot.slane %v3017_v15, 4  ;;  %v1927_v52 = vshrl.u32 %v1773_v53, 16  ;;  %v2904_v27 = vld [vmem:[#allocation2 + $0xa4] sm:$0x1] }
  0xfe   : > { %v4803_v63 = vpop.permute.xlu1 %4802  ;;  %v1930_v25 = vshll.u32 %v1773_v53, 16  ;;  %v3209_v51 = vor.u32 %v3208_v48, %v3205_v60  ;;  %v1936_v22 = vshll.u32 %v6162_v1, 16  ;;  %v1940_v37 = vshrl.u32 %v6162_v1, 16  ;;  %v1799_v60 = vld [vmem:[#allocation2 + $0xa4] sm:$0x1] }
  0xff   : > { %v4805_v54 = vunpack.i.h.bf16 %v4803_v63  ;;  %v4804_v20 = vunpack.i.l.bf16 %v4803_v63  ;;  %1517 = vst.msk [vmem:[#allocation3 + $0x80] sm:$0xff] %vm1500_vm10, %v4809_v16  ;;  %1518 = vst.msk [vmem:[#allocation3 + $0x88] sm:$0xff] %vm1500_vm10, %v4810_v38  ;;  %v2119_v8 = vshrl.u32 %v1797_v40, 16  ;;  %5082 = vrot.lane.b32.xlu1 %v5081_v14, %s5271_s24  ;;  %5087 = vrot.lane.b32.xlu0 %v5086_v2, %s5273_s26  ;;  %v3023_v21 = vsel %vm5392_vm6, %v3018_v18, %v6152_v42 }
 0x100   : > { %v4818_v32 = vpop.permute.xlu0 %4817  ;;  %v5096_v12 = vpack.i.bf16 %v1592_v55, %v1576_v28  ;;  %v1929_v56 = vrot.slane %v1927_v52, 4  ;;  %v1932_v57 = vrot.slane %v1930_v25, 5  ;;  %v3210_v36 = vrot.slane %v3209_v51, 4 }
 0x101   : > { %1516 = vst.msk [vmem:[#allocation3 + $0x78] sm:$0xff] %vm1500_vm10, %v4805_v54  ;;  %1515 = vst.msk [vmem:[#allocation3 + $0x70] sm:$0xff] %vm1500_vm10, %v4804_v20  ;;  %v3338_v50 = vunpack.c.l.bf16 %v3023_v21  ;;  %v1938_v33 = vrot.slane %v1936_v22, 5  ;;  %v2121_v13 = vrot.slane %v2119_v8, 4  ;;  %v2122_v45 = vshll.u32 %v1797_v40, 16 }
 0x102   : > { %v4813_v39 = vpop.permute.xlu1 %4812  ;;  %v1933_v43 = vor.u32 %v1932_v57, %v1929_v56  ;;  %v3215_v11 = vsel %vm5392_vm6, %v3210_v36, %v6164_v6  ;;  %v2128_v44 = vshll.u32 %v1798_v19, 16  ;;  %v2132_v59 = vshrl.u32 %v1798_v19, 16  ;;  %v4531_v19 = vld [vmem:[#allocation2 + $0x48] sm:$0xff]  }
 0x103   : > { %v4815_v46 = vunpack.i.h.bf16 %v4813_v39  ;;  %v4814_v7 = vunpack.i.l.bf16 %v4813_v39  ;;  %v4820_v49 = vunpack.i.h.bf16 %v4818_v32  ;;  %v3354_v14 = vunpack.c.l.bf16 %v3215_v11  ;;  %5097 = vrot.lane.b32.xlu0 %v5096_v12, %s5271_s24 }
 0x104   : > { %v6183_v31 = vpop.permute.xlu0 %4827  ;;  %v1934_v9 = vrot.slane %v1933_v43, 4  ;;  %v2124_v58 = vrot.slane %v2122_v45, 5  ;;  %v4819_v10 = vunpack.i.l.bf16 %v4818_v32  ;;  %v2130_v2 = vrot.slane %v2128_v44, 5 }
 0x105   : > { %1520 = vst.msk [vmem:[#allocation3 + $0x98] sm:$0xff] %vm1500_vm10, %v4815_v46  ;;  %1519 = vst.msk [vmem:[#allocation3 + $0x90] sm:$0xff] %vm1500_vm10, %v4814_v7  ;;  %v3026_v30 = vrot.slane %v3024_v61, 4  ;;  %v5091_v3 = vpack.i.bf16 %v3354_v14, %v3338_v50  ;;  %v3030_v53 = vshll.u32 %v2880_v34, 16  ;;  %v3218_v35 = vrot.slane %v3216_v47, 4 }
 0x106   : > { %v4823_v62 = vpop.permute.xlu1 %4822  ;;  %1522 = vst.msk [vmem:[#allocation3 + $0xa8] sm:$0xff] %vm1500_vm10, %v4820_v49  ;;  %v1939_v41 = vsel %vm5392_vm6, %v1934_v9, %v1938_v33  ;;  %v2125_v28 = vor.u32 %v2124_v58, %v2121_v13  ;;  %1521 = vst.msk [vmem:[#allocation3 + $0xa0] sm:$0xff] %vm1500_vm10, %v4819_v10  ;;  %v3222_v61 = vshll.u32 %v2904_v27, 16  ;;  %v1942_v40 = vrot.slane %v1940_v37, 4  ;;  %v2881_v10 = vld [vmem:[#allocation2 + $0x48] sm:$0xf] }
 0x107   : > { %v4825_v29 = vunpack.i.h.bf16 %v4823_v62  ;;  %v4824_v24 = vunpack.i.l.bf16 %v4823_v62  ;;  %v2232_v63 = vunpack.c.l.bf16 %v1939_v41  ;;  %v3027_v15 = vor.u32 %v3026_v30, %v6152_v42  ;;  %5092 = vrot.lane.b32.xlu1 %v5091_v3, %s5274_s27  ;;  %v2905_v30 = vld [vmem:[#allocation2 + $0xa8] sm:$0xf] }
 0x108   : > { %v4838_v38 = vpop.permute.xlu0 %4837  ;;  %v2126_v16 = vrot.slane %v2125_v28, 4  ;;  %v3032_v1 = vrot.slane %v3030_v53, 5  ;;  %v1946_v54 = vshll.u32 %v1775_v5, 16  ;;  %v3219_v18 = vor.u32 %v3218_v35, %v6164_v6 }
 0x109   : > { %1524 = vst.msk [vmem:[#allocation3 + $0xb8] sm:$0xff] %vm1500_vm10, %v4825_v29  ;;  %1523 = vst.msk [vmem:[#allocation3 + $0xb0] sm:$0xff] %vm1500_vm10, %v4824_v24  ;;  %v3028_v48 = vrot.slane %v3027_v15, 4  ;;  %v3224_v55 = vrot.slane %v3222_v61, 5  ;;  %v2134_v52 = vrot.slane %v2132_v59, 4  ;;  %v1943_v17 = vor.u32 %v1942_v40, %v1938_v33 }
 0x10a   : > { %v4833_v20 = vpop.permute.xlu1 %4832  ;;  %v2131_v42 = vsel %vm5392_vm6, %v2126_v16, %v2130_v2  ;;  %v1948_v47 = vrot.slane %v1946_v54, 5  ;;  %v2138_v25 = vshll.u32 %v1799_v60, 16  ;;  %v3220_v8 = vrot.slane %v3219_v18, 4  ;;  %v6224_v24 = vld [vmem:[#allocation2 + $0x4c] sm:$0xf] }
 0x10b   : > { %v2248_v51 = vunpack.c.l.bf16 %v2131_v42  ;;  %v3033_v22 = vsel %vm5392_vm6, %v3028_v48, %v3032_v1  ;;  %v2135_v32 = vor.u32 %v2134_v52, %v2130_v2  ;;  %v1944_v39 = vrot.slane %v1943_v17, 4  ;;  %v1776_v48 = vld [vmem:[#allocation2 + $0x48] sm:$0xf]  ;;  %v6248_v42 = vld [vmem:[#allocation2 + $0x4c] sm:$0xf] }
 0x10c   : > { %v4848_v37 = vpop.permute.xlu0 %4847  ;;  %v3339_v21 = vunpack.c.l.bf16 %v3033_v22  ;;  %v2140_v12 = vrot.slane %v2138_v25, 5  ;;  %v4830_v6 = vunpack.i.h.bf16 %v6183_v31  ;;  %v3225_v36 = vsel %vm5392_vm6, %v3220_v8, %v3224_v55  ;;  %v1800_v22 = vld [vmem:[#allocation2 + $0xa8] sm:$0xf] }
 0x10d   : > { %v5101_v57 = vpack.i.bf16 %v2248_v51, %v2232_v63  ;;  %v2136_v50 = vrot.slane %v2135_v32, 4  ;;  %v4829_v46 = vunpack.i.l.bf16 %v6183_v31  ;;  %v3355_v7 = vunpack.c.l.bf16 %v3225_v36 }
 0x10e   : > { %v4843_v56 = vpop.permute.xlu1 %4842  ;;  %v1949_v43 = vsel %vm5392_vm6, %v1944_v39, %v1948_v47  ;;  %1526 = vst.msk [vmem:[#allocation3 + $0xc8] sm:$0xff] %vm1500_vm10, %v4830_v6  ;;  %v4835_v33 = vunpack.i.h.bf16 %v4833_v20  ;;  %v4834_v13 = vunpack.i.l.bf16 %v4833_v20  ;;  %v4447_v44 = vunpack.c.l.bf16 %v4531_v19  ;;  %v6258_v39 = vld [vmem:[#allocation2 + $0xac] sm:$0xf] }
 0x10f   : > { %5102 = vrot.lane.b32.xlu1 %v5101_v57, %s5272_s25  ;;  %v2141_v45 = vsel %vm5392_vm6, %v2136_v50, %v2140_v12  ;;  %v2233_v11 = vunpack.c.l.bf16 %v1949_v43  ;;  %1525 = vst.msk [vmem:[#allocation3 + $0xc0] sm:$0xff] %vm1500_vm10, %v4829_v46  ;;  %v4448_v59 = vunpack.c.h.bf16 %v4531_v19  ;;  %v5106_v34 = vpack.i.bf16 %v3355_v7, %v3339_v21 }
 0x110   : > { %v6214_v49 = vpop.permute.xlu0 %4857  ;;  %v2249_v31 = vunpack.c.l.bf16 %v2141_v45  ;;  %1528 = vst.msk [vmem:[#allocation3 + $0xd8] sm:$0xff] %vm1500_vm10, %v4835_v33  ;;  %1527 = vst.msk [vmem:[#allocation3 + $0xd0] sm:$0xff] %vm1500_vm10, %v4834_v13  ;;  %v4840_v14 = vunpack.i.h.bf16 %v4838_v38  ;;  %v4839_v9 = vunpack.i.l.bf16 %v4838_v38  ;;  %v6219_v62 = vpack.i.bf16 %v6058_v26, %v4447_v44  ;;  %v6229_v26 = vld [vmem:[#allocation2 + $0xac] sm:$0xf] }
 0x111   : > { %v6222_v27 = vpack.i.bf16 %v6064_v23, %v4448_v59  ;;  %v4845_v2 = vunpack.i.h.bf16 %v4843_v56  ;;  %v4844_v29 = vunpack.i.l.bf16 %v4843_v56  ;;  %5107 = vrot.lane.b32.xlu0 %v5106_v34, %s5274_s27  ;;  %v4850_v3 = vunpack.i.h.bf16 %v4848_v37 }
 0x112   : > { %v4853_v58 = vpop.permute.xlu1 %4852  ;;  %v5111_v5 = vpack.i.bf16 %v2249_v31, %v2233_v11  ;;  %1529 = vst.msk [vmem:[#allocation3 + $0xe0] sm:$0xff] %vm1500_vm10, %v4839_v9  ;;  %1530 = vst.msk [vmem:[#allocation3 + $0xe8] sm:$0xff] %vm1500_vm10, %v4840_v14  ;;  %v4849_v41 = vunpack.i.l.bf16 %v4848_v37  ;;  %v3035_v53 = vshrl.u32 %v2881_v10, 16  ;;  %v3038_v63 = vshll.u32 %v2881_v10, 16 }
 0x113   : > { %1532 = vst.msk [vmem:[#allocation3 + $0xf8] sm:$0xff] %vm1500_vm10, %v4845_v2  ;;  %1531 = vst.msk [vmem:[#allocation3 + $0xf0] sm:$0xff] %vm1500_vm10, %v4844_v29  ;;  %v4855_v23 = vunpack.i.h.bf16 %v4853_v58  ;;  %v4854_v28 = vunpack.i.l.bf16 %v4853_v58  ;;  %v3044_v35 = vshll.u32 %v6224_v24, 16  ;;  %v3048_v61 = vshrl.u32 %v6224_v24, 16  ;;  %v2883_v29 = vld [vmem:[#allocation2 + $0x50] sm:$0x1] }
 0x114   : > { %v6233_v15 = vpop.permute.xlu0 %4867  ;;  %5112 = vrot.lane.b32.xlu1 %v5111_v5, %s5272_s25  ;;  %1726 = vst.msk [vmem:[#allocation3] sm:$0xff] %vm1725_vm11, %v4849_v41  ;;  %1742 = vst.msk [vmem:[#allocation3 + $0x80] sm:$0xff] %vm1725_vm11, %v4850_v3  ;;  %v3227_v60 = vshrl.u32 %v2905_v30, 16  ;;  %v3230_v38 = vshll.u32 %v2905_v30, 16  ;;  %v3037_v1 = vrot.slane %v3035_v53, 4  ;;  %v3040_v40 = vrot.slane %v3038_v63, 5 }
 0x115   : > { %1727 = vst.msk [vmem:[#allocation3 + $0x8] sm:$0xff] %vm1725_vm11, %v4854_v28  ;;  %1743 = vst.msk [vmem:[#allocation3 + $0x88] sm:$0xff] %vm1725_vm11, %v4855_v23  ;;  %v3236_v54 = vshll.u32 %v6229_v26, 16  ;;  %v3240_v20 = vshrl.u32 %v6229_v26, 16  ;;  %5117 = vrot.lane.b32.xlu0 %v6219_v62, %s5273_s26  ;;  %v6246_v18 = vrot.slane %v3044_v35, 5  ;;  %v4860_v25 = vunpack.i.h.bf16 %v6214_v49 }
 0x116   : > { %v4863_v16 = vpop.permute.xlu1 %4862  ;;  %v3229_v55 = vrot.slane %v3227_v60, 4  ;;  %v3232_v52 = vrot.slane %v3230_v38, 5  ;;  %v3041_v17 = vor.u32 %v3040_v40, %v3037_v1  ;;  %v4859_v51 = vunpack.i.l.bf16 %v6214_v49  ;;  %v2907_v3 = vld [vmem:[#allocation2 + $0xb0] sm:$0x1] }
 0x117   : > { %v6250_v47 = vrot.slane %v3236_v54, 5  ;;  %v4865_v37 = vunpack.i.h.bf16 %v4863_v16  ;;  %v4864_v21 = vunpack.i.l.bf16 %v4863_v16  ;;  %v1951_v12 = vshrl.u32 %v1776_v48, 16  ;;  %2399 = vst.msk [vmem:[#allocation3 + $0x80] sm:$0xff] %vm2382_vm12, %v4860_v25  ;;  %v1778_v41 = vld [vmem:[#allocation2 + $0x50] sm:$0x1] }
 0x118   : > { %v6254_v8 = vpop.permute.xlu0 %4877  ;;  %5122 = vrot.lane.b32.xlu1 %v6222_v27, %s5273_s26  ;;  %v3233_v32 = vor.u32 %v3232_v52, %v3229_v55  ;;  %v3042_v19 = vrot.slane %v3041_v17, 4  ;;  %2383 = vst.msk [vmem:[#allocation3] sm:$0xff] %vm2382_vm12, %v4859_v51  ;;  %v1954_v56 = vshll.u32 %v1776_v48, 16  ;;  %v1960_v57 = vshll.u32 %v6248_v42, 16  ;;  %v1802_v48 = vld [vmem:[#allocation2 + $0xb0] sm:$0x1] }
 0x119   : > { %v1964_v36 = vshrl.u32 %v6248_v42, 16  ;;  %5127 = vrot.lane.b32.xlu0 %v6219_v62, %s5273_s26  ;;  %2384 = vst.msk [vmem:[#allocation3 + $0x8] sm:$0xff] %vm2382_vm12, %v4864_v21  ;;  %2400 = vst.msk [vmem:[#allocation3 + $0x88] sm:$0xff] %vm2382_vm12, %v4865_v37  ;;  %v1953_v46 = vrot.slane %v1951_v12, 4  ;;  %v2143_v7 = vshrl.u32 %v1800_v22, 16  ;;  %v2146_v43 = vshll.u32 %v1800_v22, 16 }
 0x11a   : > { %v4873_v6 = vpop.permute.xlu1 %4872  ;;  %v3234_v50 = vrot.slane %v3233_v32, 4  ;;  %v3047_v33 = vsel %vm5392_vm6, %v3042_v19, %v6246_v18  ;;  %v1956_v13 = vrot.slane %v1954_v56, 5  ;;  %v1962_v45 = vrot.slane %v1960_v57, 5 }
 0x11b   : > { %v2152_v11 = vshll.u32 %v6258_v39, 16  ;;  %v3340_v49 = vunpack.c.l.bf16 %v3047_v33  ;;  %v2145_v34 = vrot.slane %v2143_v7, 4  ;;  %v2148_v31 = vrot.slane %v2146_v43, 5 }
 0x11c   : > { %v6272_v44 = vpop.permute.xlu0 %4887  ;;  %5132 = vrot.lane.b32.xlu1 %v6219_v62, %s5271_s24  ;;  %v3239_v59 = vsel %vm5392_vm6, %v3234_v50, %v6250_v47  ;;  %v1957_v58 = vor.u32 %v1956_v13, %v1953_v46  ;;  %v2156_v2 = vshrl.u32 %v6258_v39, 16  ;;  %v4870_v62 = vunpack.i.h.bf16 %v6233_v15  ;;  %v2444_v50 = vld [vmem:[#allocation2 + $0xb4] sm:$0xff]  }
 0x11d   : > { %v3356_v9 = vunpack.c.l.bf16 %v3239_v59  ;;  %v2154_v10 = vrot.slane %v2152_v11, 5  ;;  %5137 = vrot.lane.b32.xlu0 %v6222_v27, %s5273_s26  ;;  %v2149_v30 = vor.u32 %v2148_v31, %v2145_v34  ;;  %v4869_v5 = vunpack.i.l.bf16 %v6233_v15 }
 0x11e   : > { %v6279_v14 = vpop.permute.xlu1 %4882  ;;  %v1958_v28 = vrot.slane %v1957_v58, 4  ;;  %v4875_v53 = vunpack.i.h.bf16 %v4873_v6  ;;  %v4874_v63 = vunpack.i.l.bf16 %v4873_v6  ;;  %2625 = vst.msk [vmem:[#allocation3 + $0x80] sm:$0xff] %vm2608_vm13, %v4870_v62  ;;  %v3050_v38 = vrot.slane %v3048_v61, 4 }
 0x11f   : > { %v5141_v23 = vpack.i.bf16 %v3356_v9, %v3340_v49  ;;  %v2150_v60 = vrot.slane %v2149_v30, 4  ;;  %2609 = vst.msk [vmem:[#allocation3] sm:$0xff] %vm2608_vm13, %v4869_v5  ;;  %v3054_v16 = vshll.u32 %v2883_v29, 16  ;;  %v3242_v15 = vrot.slane %v3240_v20, 4  ;;  %v2669_v5 = vld [vmem:[#allocation2 + $0xb4] sm:$0xff]  }
 0x120   : > { %v6286_v35 = vpop.permute.xlu0 %4897  ;;  %v1963_v40 = vsel %vm5392_vm6, %v1958_v28, %v1962_v45  ;;  %2610 = vst.msk [vmem:[#allocation3 + $0x8] sm:$0xff] %vm2608_vm13, %v4874_v63  ;;  %2626 = vst.msk [vmem:[#allocation3 + $0x88] sm:$0xff] %vm2608_vm13, %v4875_v53  ;;  %v3246_v54 = vshll.u32 %v2907_v3, 16  ;;  %v1966_v55 = vrot.slane %v1964_v36, 4  ;;  %v1970_v24 = vshll.u32 %v1778_v41, 16  ;;  %v2428_v36 = vld [vmem:[#allocation2 + $0x54] sm:$0xff]  }
 0x121   : > { %5142 = vrot.lane.b32.xlu1 %v5141_v23, %s5274_s27  ;;  %5147 = vrot.lane.b32.xlu0 %v6222_v27, %s5271_s24  ;;  %v2155_v26 = vsel %vm5392_vm6, %v2150_v60, %v2154_v10  ;;  %v2234_v61 = vunpack.c.l.bf16 %v1963_v40  ;;  %v3051_v20 = vor.u32 %v3050_v38, %v6246_v18  ;;  %v3056_v52 = vrot.slane %v3054_v16, 5  ;;  %v6332_v3 = vld [vmem:[#allocation2 + $0x54] sm:$0xff]  }
 0x122   : > { %v6294_v1 = vpop.permute.xlu1 %4892  ;;  %v2250_v42 = vunpack.c.l.bf16 %v2155_v26  ;;  %v3243_v17 = vor.u32 %v3242_v15, %v6250_v47  ;;  %v3248_v25 = vrot.slane %v3246_v54, 5  ;;  %v1967_v51 = vor.u32 %v1966_v55, %v1962_v45  ;;  %v6334_v41 = vld [vmem:[#allocation2 + $0xb4] sm:$0xff]  }
 0x123   : > { %v3052_v32 = vrot.slane %v3051_v20, 4  ;;  %v1972_v37 = vrot.slane %v1970_v24, 5  ;;  %v2158_v21 = vrot.slane %v2156_v2, 4  ;;  %v2162_v39 = vshll.u32 %v1802_v48, 16  ;;  %v2653_v2 = vld [vmem:[#allocation2 + $0x54] sm:$0xff]  }
 0x124   : > { %v6307_v22 = vpop.permute.xlu0 %4907  ;;  %v5151_v27 = vpack.i.bf16 %v2250_v42, %v2234_v61  ;;  %v3244_v6 = vrot.slane %v3243_v17, 4  ;;  %v1968_v19 = vrot.slane %v1967_v51, 4  ;;  %v4880_v47 = vunpack.i.h.bf16 %v6254_v8  ;;  %v2884_v55 = vld [vmem:[#allocation2 + $0x54] sm:$0xf]  ;;  %v6349_v24 = vld [vmem:[#allocation2 + $0x58] sm:$0xf] }
 0x125   : > { %v3057_v18 = vsel %vm5392_vm6, %v3052_v32, %v3056_v52  ;;  %v2159_v56 = vor.u32 %v2158_v21, %v2154_v10  ;;  %v2164_v57 = vrot.slane %v2162_v39, 5  ;;  %v4879_v33 = vunpack.i.l.bf16 %v6254_v8  ;;  %v2908_v52 = vld [vmem:[#allocation2 + $0xb4] sm:$0xf]  ;;  %v6357_v42 = vld [vmem:[#allocation2 + $0xb8] sm:$0xf] }
 0x126   : > { %v6309_v12 = vpop.permute.xlu1 %4902  ;;  %5152 = vrot.lane.b32.xlu1 %v5151_v27, %s5272_s25  ;;  %v3249_v46 = vsel %vm5392_vm6, %v3244_v6, %v3248_v25  ;;  %v3341_v7 = vunpack.c.l.bf16 %v3057_v18  ;;  %v1973_v43 = vsel %vm5392_vm6, %v1968_v19, %v1972_v37  ;;  %2850 = vst.msk [vmem:[#allocation3 + $0x80] sm:$0xff] %vm2833_vm14, %v4880_v47  ;;  %v4885_v49 = vunpack.i.h.bf16 %v6279_v14  ;;  %v3556_v47 = vld [vmem:[%s6839_s2 + $0x8] sm:$0xff] }
 0x127   : > { %v3357_v45 = vunpack.c.l.bf16 %v3249_v46  ;;  %v2160_v11 = vrot.slane %v2159_v56, 4  ;;  %v2235_v59 = vunpack.c.l.bf16 %v1973_v43  ;;  %2834 = vst.msk [vmem:[#allocation3] sm:$0xff] %vm2833_vm14, %v4879_v33  ;;  %v4884_v31 = vunpack.i.l.bf16 %v6279_v14  ;;  %v1779_v43 = vld [vmem:[#allocation2 + $0x54] sm:$0xf] }
 0x128   : > { %v6320_v13 = vpop.permute.xlu0 %4917  ;;  %v2460_v9 = vunpack.c.l.bf16 %v2428_v36  ;;  %v2476_v58 = vunpack.c.l.bf16 %v2444_v50  ;;  %v2461_v10 = vunpack.c.h.bf16 %v2428_v36  ;;  %1744 = vst.msk [vmem:[#allocation3 + $0x90] sm:$0xff] %vm1725_vm11, %v4885_v49  ;;  %v2477_v30 = vunpack.c.h.bf16 %v2444_v50  ;;  %v6385_v49 = vld [vmem:[#allocation2 + $0x58] sm:$0xf] }
 0x129   : > { %v5156_v8 = vpack.i.bf16 %v3357_v45, %v3341_v7  ;;  %v2165_v29 = vsel %vm5392_vm6, %v2160_v11, %v2164_v57  ;;  %v4890_v62 = vunpack.i.h.bf16 %v6272_v44  ;;  %1728 = vst.msk [vmem:[#allocation3 + $0x10] sm:$0xff] %vm1725_vm11, %v4884_v31  ;;  %v4889_v28 = vunpack.i.l.bf16 %v6272_v44  ;;  %v3555_v57 = vld [vmem:[%s6839_s2] sm:$0xff] }
 0x12a   : > { %v6324_v34 = vpop.permute.xlu1 %4912  ;;  %v2251_v23 = vunpack.c.l.bf16 %v2165_v29  ;;  %v5166_v14 = vpack.i.bf16 %v2476_v58, %v2460_v9  ;;  %v5171_v63 = vpack.i.bf16 %v2477_v30, %v2461_v10  ;;  %v4895_v60 = vunpack.i.h.bf16 %v6294_v1 }
 0x12b   : > { %5157 = vrot.lane.b32.xlu0 %v5156_v8, %s5274_s27  ;;  %2851 = vst.msk [vmem:[#allocation3 + $0x88] sm:$0xff] %vm2833_vm14, %v4890_v62  ;;  %v4894_v38 = vunpack.i.l.bf16 %v6294_v1  ;;  %v2685_v16 = vunpack.c.l.bf16 %v2653_v2  ;;  %2835 = vst.msk [vmem:[#allocation3 + $0x8] sm:$0xff] %vm2833_vm14, %v4889_v28  ;;  %v2701_v54 = vunpack.c.l.bf16 %v2669_v5  ;;  %v1579_v44 = vunpack.c.l.bf16 %v6332_v3  ;;  %v1803_v8 = vld [vmem:[#allocation2 + $0xb4] sm:$0xf] }
 0x12c   : > { %v6338_v53 = vpop.permute.xlu0 %4927  ;;  %v5161_v40 = vpack.i.bf16 %v2251_v23, %v2235_v59  ;;  %v1595_v48 = vunpack.c.l.bf16 %v6334_v41  ;;  %3507 = vst.msk [vmem:[#allocation3 + $0x80] sm:$0xff] %vm3490_vm15, %v4895_v60  ;;  %v4900_v1 = vunpack.i.h.bf16 %v6286_v35  ;;  %v4899_v26 = vunpack.i.l.bf16 %v6286_v35 }
 0x12d   : > { %3491 = vst.msk [vmem:[#allocation3] sm:$0xff] %vm3490_vm15, %v4894_v38  ;;  %v4905_v61 = vunpack.i.h.bf16 %v6309_v12  ;;  %v4904_v20 = vunpack.i.l.bf16 %v6309_v12  ;;  %v5176_v17 = vpack.i.bf16 %v2701_v54, %v2685_v16  ;;  %v2686_v51 = vunpack.c.h.bf16 %v2653_v2 }
 0x12e   : > { %v6344_v15 = vpop.permute.xlu1 %4922  ;;  %5162 = vrot.lane.b32.xlu1 %v5161_v40, %s5272_s25  ;;  %v5181_v25 = vpack.i.bf16 %v1595_v48, %v1579_v44  ;;  %v2702_v32 = vunpack.c.h.bf16 %v2669_v5  ;;  %1745 = vst.msk [vmem:[#allocation3 + $0x98] sm:$0xff] %vm1725_vm11, %v4900_v1  ;;  %1729 = vst.msk [vmem:[#allocation3 + $0x18] sm:$0xff] %vm1725_vm11, %v4899_v26  ;;  %v3059_v35 = vshrl.u32 %v2884_v55, 16  ;;  %v3062_v21 = vshll.u32 %v2884_v55, 16 }
 0x12f   : > { %5167 = vrot.lane.b32.xlu0 %v5166_v14, %s5273_s26  ;;  %2385 = vst.msk [vmem:[#allocation3 + $0x10] sm:$0xff] %vm2382_vm12, %v4904_v20  ;;  %2401 = vst.msk [vmem:[#allocation3 + $0x90] sm:$0xff] %vm2382_vm12, %v4905_v61  ;;  %v3068_v39 = vshll.u32 %v6349_v24, 16  ;;  %v3072_v12 = vshrl.u32 %v6349_v24, 16  ;;  %v3251_v19 = vshrl.u32 %v2908_v52, 16  ;;  %v3254_v18 = vshll.u32 %v2908_v52, 16 }
 0x130   : > { %v6360_v37 = vpop.permute.xlu0 %4937  ;;  %v5186_v6 = vpack.i.bf16 %v2702_v32, %v2686_v51  ;;  %v3260_v56 = vshll.u32 %v6357_v42, 16  ;;  %v3061_v36 = vrot.slane %v3059_v35, 4  ;;  %v3064_v50 = vrot.slane %v3062_v21, 5  ;;  %v1805_v24 = vld [vmem:[#allocation2 + $0xbc] sm:$0x1] }
 0x131   : > { %v6378_v46 = vrot.slane %v3068_v39, 5  ;;  %v3264_v7 = vshrl.u32 %v6357_v42, 16  ;;  %v3253_v33 = vrot.slane %v3251_v19, 4  ;;  %v3256_v45 = vrot.slane %v3254_v18, 5 }
 0x132   : > { %v6369_v27 = vpop.permute.xlu1 %4932  ;;  %5172 = vrot.lane.b32.xlu1 %v5171_v63, %s5273_s26  ;;  %v6382_v11 = vrot.slane %v3260_v56, 5  ;;  %v4910_v59 = vunpack.i.h.bf16 %v6307_v22  ;;  %v3065_v9 = vor.u32 %v3064_v50, %v3061_v36  ;;  %v4909_v58 = vunpack.i.l.bf16 %v6307_v22  ;;  %v2886_v56 = vld [vmem:[#allocation2 + $0x5c] sm:$0x1] }
 0x133   : > { %5177 = vrot.lane.b32.xlu0 %v5176_v17, %s5273_s26  ;;  %v4640_v10 = vpack.c.bf16 %v3556_v47, %v3555_v57  ;;  %v4915_v2 = vunpack.i.h.bf16 %v6324_v34  ;;  %v3257_v30 = vor.u32 %v3256_v45, %v3253_v33  ;;  %v4914_v62 = vunpack.i.l.bf16 %v6324_v34  ;;  %v3557_v17 = vld [vmem:[%s6839_s2 + $0x10] sm:$0xff]  ;;  %v2910_v57 = vld [vmem:[#allocation2 + $0xbc] sm:$0x1] }
 0x134   : > { %v6387_v31 = vpop.permute.xlu0 %4947  ;;  %3508 = vst.msk [vmem:[#allocation3 + $0x88] sm:$0xff] %vm3490_vm15, %v4910_v59  ;;  %v1580_v5 = vunpack.c.h.bf16 %v6332_v3  ;;  %v1596_v23 = vunpack.c.h.bf16 %v6334_v41  ;;  %v3066_v14 = vrot.slane %v3065_v9, 4  ;;  %3492 = vst.msk [vmem:[#allocation3 + $0x8] sm:$0xff] %vm3490_vm15, %v4909_v58  ;;  %v1975_v22 = vshrl.u32 %v1779_v43, 16  ;;  %v6403_v3 = vld [vmem:[#allocation2 + $0xb8] sm:$0xf] }
 0x135   : > { %4641 = vmatprep.subr.bf16.mxu0 %v4640_v10  ;;  %4648 = vmatprep.subr.bf16.mxu1 %v4640_v10  ;;  %2402 = vst.msk [vmem:[#allocation3 + $0x98] sm:$0xff] %vm2382_vm12, %v4915_v2  ;;  %v1978_v28 = vshll.u32 %v1779_v43, 16  ;;  %v1984_v63 = vshll.u32 %v6385_v49, 16  ;;  %v3258_v60 = vrot.slane %v3257_v30, 4  ;;  %2386 = vst.msk [vmem:[#allocation3 + $0x18] sm:$0xff] %vm2382_vm12, %v4914_v62  ;;  %v1988_v41 = vshrl.u32 %v6385_v49, 16 }
 0x136   : > { %v6392_v29 = vpop.permute.xlu1 %4942  ;;  %5182 = vrot.lane.b32.xlu1 %v5181_v25, %s5271_s24  ;;  %4643 = vmatpush3.bf16.msra.mxu0 %v4640_v10  ;;  %v5196_v34 = vpack.i.bf16 %v1596_v23, %v1580_v5  ;;  %v2167_v38 = vshrl.u32 %v1803_v8, 16  ;;  %v3071_v40 = vsel %vm5392_vm6, %v3066_v14, %v6378_v46  ;;  %v1977_v54 = vrot.slane %v1975_v22, 4  ;;  %v3523_v52 = vld [vmem:[#allocation3] sm:$0xff]  ;;  %v3558_v25 = vld [vmem:[%s6839_s2 + $0x18] sm:$0xff] }
 0x137   : > { %5187 = vrot.lane.b32.xlu0 %v5186_v6, %s5273_s26  ;;  %4651 = vmatpush3.bf16.msra.mxu1 %v4640_v10  ;;  %v1980_v44 = vrot.slane %v1978_v28, 5  ;;  %v6412_v48 = vrot.slane %v1984_v63, 5  ;;  %v3263_v1 = vsel %vm5392_vm6, %v3258_v60, %v6382_v11  ;;  %v3342_v26 = vunpack.c.l.bf16 %v3071_v40  ;;  %v3539_v39 = vld [vmem:[#allocation3 + $0x80] sm:$0xff]  ;;  %v1781_v58 = vld [vmem:[#allocation2 + $0x5c] sm:$0x1] }
 0x138   : > { %v6406_v16 = vpop.permute.xlu0 %4957  ;;  %v2169_v61 = vrot.slane %v2167_v38, 4  ;;  %v2170_v20 = vshll.u32 %v1803_v8, 16  ;;  %v3358_v51 = vunpack.c.l.bf16 %v3263_v1  ;;  %v2176_v35 = vshll.u32 %v6403_v3, 16  ;;  %4592 = vmatprep.mubr.msk.f32.mxu0 %vm3567_vm0, %v3523_v52  ;;  %4616 = vmatprep.mubr.msk.f32.mxu1 %vm3567_vm0, %v3539_v39 }
 0x139   : > { %v1981_v32 = vor.u32 %v1980_v44, %v1977_v54  ;;  %v2180_v21 = vshrl.u32 %v6403_v3, 16  ;;  %v4920_v19 = vunpack.i.h.bf16 %v6320_v13  ;;  %v4919_v18 = vunpack.i.l.bf16 %v6320_v13 }
 0x13a   : > { %v6414_v55 = vpop.permute.xlu1 %4952  ;;  %v2172_v6 = vrot.slane %v2170_v20, 5  ;;  %v5191_v36 = vpack.i.bf16 %v3358_v51, %v3342_v26  ;;  %v2178_v43 = vrot.slane %v2176_v35, 5  ;;  %v4644_v33 = vpack.c.bf16 %v3558_v25, %v3557_v17  ;;  %v3559_v17 = vld [vmem:[%s6839_s2 + $0x20] sm:$0xf] }
 0x13b   : > { %5197 = vrot.lane.b32.xlu0 %v5196_v34, %s5271_s24  ;;  %v1982_v50 = vrot.slane %v1981_v32, 4  ;;  %2627 = vst.msk [vmem:[#allocation3 + $0x90] sm:$0xff] %vm2608_vm13, %v4920_v19  ;;  %2611 = vst.msk [vmem:[#allocation3 + $0x10] sm:$0xff] %vm2608_vm13, %v4919_v18  ;;  %v4925_v13 = vunpack.i.h.bf16 %v6344_v15  ;;  %v4924_v49 = vunpack.i.l.bf16 %v6344_v15  ;;  %v3074_v9 = vrot.slane %v3072_v12, 4  ;;  %v4532_v25 = vld [vmem:[#allocation2 + $0x60] sm:$0xff]  }
 0x13c   : > { %v6429_v47 = vpop.permute.xlu0 %4967  ;;  %v2173_v59 = vor.u32 %v2172_v6, %v2169_v61  ;;  %5192 = vrot.lane.b32.xlu1 %v5191_v36, %s5274_s27  ;;  %4645 = vmatprep.subr.bf16.mxu0 %v4644_v33  ;;  %v3078_v2 = vshll.u32 %v2886_v56, 16  ;;  %v3266_v8 = vrot.slane %v3264_v7, 4  ;;  %v3270_v30 = vshll.u32 %v2910_v57, 16  ;;  %v4536_v51 = vld [vmem:[#allocation2 + $0xc0] sm:$0xff]   ;;  %v3524_v57 = vld [vmem:[#allocation3 + $0x8] sm:$0xff] }
 0x13d   : > { %v1987_v10 = vsel %vm5392_vm6, %v1982_v50, %v6412_v48  ;;  %4649 = vmatprep.subr.bf16.mxu1 %v4644_v33  ;;  %2612 = vst.msk [vmem:[#allocation3 + $0x18] sm:$0xff] %vm2608_vm13, %v4924_v49  ;;  %2628 = vst.msk [vmem:[#allocation3 + $0x98] sm:$0xff] %vm2608_vm13, %v4925_v13  ;;  %4647 = vmatpush3.bf16.msra.mxu0 %v4644_v33  ;;  %v3075_v15 = vor.u32 %v3074_v9, %v6378_v46  ;;  %v1990_v12 = vrot.slane %v1988_v41, 4  ;;  %vm4053_vm2 = vcmask 388096  }
 0x13e   : > { %v6433_v45 = vpop.permute.xlu1 %4962  ;;  %v2174_v62 = vrot.slane %v2173_v59, 4  ;;  %v2236_v5 = vunpack.c.l.bf16 %v1987_v10  ;;  %4652 = vmatpush3.bf16.msra.mxu1 %v4644_v33  ;;  %v3080_v14 = vrot.slane %v3078_v2, 5  ;;  %v3267_v42 = vor.u32 %v3266_v8, %v6382_v11  ;;  %4590 = vmatprep.subr.msk.mxu0 %vm3664_vm1, %v3559_v17  ;;  %v3540_v33 = vld [vmem:[#allocation3 + $0x88] sm:$0xff] }
 0x13f   : > { %v3272_v7 = vrot.slane %v3270_v30, 5  ;;  %v1994_v22 = vshll.u32 %v1781_v58, 16  ;;  %v3076_v60 = vrot.slane %v3075_v15, 4  ;;  %v1991_v34 = vor.u32 %v1990_v12, %v6412_v48  ;;  %4650 = vmatprep.subr.msk.mxu1 %vm3664_vm1, %v3559_v17  ;;  %v2887_v58 = vld [vmem:[#allocation2 + $0x60] sm:$0xf] }
 0x140   : > { %v6451_v23 = vpop.permute.xlu0 %4977  ;;  %v2179_v63 = vsel %vm5392_vm6, %v2174_v62, %v2178_v43  ;;  %v2182_v3 = vrot.slane %v2180_v21, 4  ;;  %v3268_v38 = vrot.slane %v3267_v42, 4  ;;  %v2186_v40 = vshll.u32 %v1805_v24, 16  ;;  %v2911_v15 = vld [vmem:[#allocation2 + $0xc0] sm:$0xf] }
 0x141   : > { %v2252_v46 = vunpack.c.l.bf16 %v2179_v63  ;;  %v1996_v41 = vrot.slane %v1994_v22, 5  ;;  %v3081_v54 = vsel %vm5392_vm6, %v3076_v60, %v3080_v14  ;;  %v1992_v44 = vrot.slane %v1991_v34, 4  ;;  %4591 = vmatpush3.msk.msra.mxu0 %vm3664_vm1, %v3559_v17  ;;  %v447_v22 = vld [vmem:[%s5884_s5 + $0x8] sm:$0x1] }
 0x142   : > { %v6454_v28 = vpop.permute.xlu1 %4972  ;;  %v2183_v11 = vor.u32 %v2182_v3, %v2178_v43  ;;  %v4930_v1 = vunpack.i.h.bf16 %v6338_v53  ;;  %v3273_v20 = vsel %vm5392_vm6, %v3268_v38, %v3272_v7  ;;  %v3343_v52 = vunpack.c.l.bf16 %v3081_v54  ;;  %4653 = vmatpush3.msk.msra.mxu1 %vm3664_vm1, %v3559_v17  ;;  %4593 = vmatmul.mubr.msk.f32.vlgmr.msra.gmra.mrb[0].mxu0 %vm3567_vm0, %v3524_v57  ;;  %v2912_v7 = vld [vmem:[#allocation2 + $0xc4] sm:$0xf]  ;;  %v451_v34 = vld [vmem:[#allocation2 + $0xc8] sm:$0x1] }
 0x143   : > { %v5201_v61 = vpack.i.bf16 %v2252_v46, %v2236_v5  ;;  %v2188_v48 = vrot.slane %v2186_v40, 5  ;;  %v3359_v35 = vunpack.c.l.bf16 %v3273_v20  ;;  %v1997_v21 = vsel %vm5392_vm6, %v1992_v44, %v1996_v41  ;;  %v2888_v5 = vld [vmem:[#allocation2 + $0x64] sm:$0xf]  ;;  %4617 = vmatmul.mubr.msk.f32.vlgmr.msra.gmra.mrb[0].mxu1 %vm3567_vm0, %v3540_v33  ;;  %v2889_v40 = vld [vmem:[#allocation2 + $0x68] sm:$0x1] }
 0x144   : > { %v6462_v26 = vpop.permute.xlu0 %4987  ;;  %v2184_v39 = vrot.slane %v2183_v11, 4  ;;  %v4929_v6 = vunpack.i.l.bf16 %v6338_v53  ;;  %2852 = vst.msk [vmem:[#allocation3 + $0x90] sm:$0xff] %vm2833_vm14, %v4930_v1  ;;  %v2237_v19 = vunpack.c.l.bf16 %v1997_v21  ;;  %v4935_v18 = vunpack.i.h.bf16 %v6369_v27 }
 0x145   : > { %5202 = vrot.lane.b32.xlu1 %v5201_v61, %s5272_s25  ;;  %v4934_v56 = vunpack.i.l.bf16 %v6369_v27  ;;  %v5206_v36 = vpack.i.bf16 %v3359_v35, %v3343_v52  ;;  %v4451_v53 = vunpack.c.l.bf16 %v4532_v25  ;;  %v4467_v43 = vunpack.c.l.bf16 %v4536_v51 }
 0x146   : > { %v6469_v32 = vpop.permute.xlu1 %4982  ;;  %v2189_v50 = vsel %vm5392_vm6, %v2184_v39, %v2188_v48  ;;  %2836 = vst.msk [vmem:[#allocation3 + $0x10] sm:$0xff] %vm2833_vm14, %v4929_v6  ;;  %v4452_v27 = vunpack.c.h.bf16 %v4532_v25  ;;  %v4468_v49 = vunpack.c.h.bf16 %v4536_v51  ;;  %v4940_v9 = vunpack.i.h.bf16 %v6360_v37 }
 0x147   : > { %v2253_v13 = vunpack.c.l.bf16 %v2189_v50  ;;  %1730 = vst.msk [vmem:[#allocation3 + $0x20] sm:$0xff] %vm1725_vm11, %v4934_v56  ;;  %1746 = vst.msk [vmem:[#allocation3 + $0xa0] sm:$0xff] %vm1725_vm11, %v4935_v18  ;;  %5207 = vrot.lane.b32.xlu0 %v5206_v36, %s5274_s27  ;;  %v5216_v2 = vpack.i.bf16 %v4467_v43, %v4451_v53  ;;  %v4939_v8 = vunpack.i.l.bf16 %v6360_v37  ;;  %v4945_v30 = vunpack.i.h.bf16 %v6392_v29 }
 0x148   : > { %v6483_v59 = vpop.permute.xlu0 %4997  ;;  %v4944_v62 = vunpack.i.l.bf16 %v6392_v29  ;;  %v6497_v12 = vpack.i.bf16 %v4468_v49, %v4452_v27  ;;  %2853 = vst.msk [vmem:[#allocation3 + $0x98] sm:$0xff] %vm2833_vm14, %v4940_v9  ;;  %v4950_v14 = vunpack.i.h.bf16 %v6387_v31  ;;  %v4949_v42 = vunpack.i.l.bf16 %v6387_v31 }
 0x149   : > { %v5211_v24 = vpack.i.bf16 %v2253_v13, %v2237_v19  ;;  %2837 = vst.msk [vmem:[#allocation3 + $0x18] sm:$0xff] %vm2833_vm14, %v4939_v8  ;;  %v4955_v37 = vunpack.i.h.bf16 %v6414_v55  ;;  %v4954_v29 = vunpack.i.l.bf16 %v6414_v55  ;;  %v3083_v63 = vshrl.u32 %v2887_v58, 16 }
 0x14a   : > { %v6490_v10 = vpop.permute.xlu1 %4992  ;;  %3493 = vst.msk [vmem:[#allocation3 + $0x10] sm:$0xff] %vm3490_vm15, %v4944_v62  ;;  %3509 = vst.msk [vmem:[#allocation3 + $0x90] sm:$0xff] %vm3490_vm15, %v4945_v30  ;;  %v3086_v60 = vshll.u32 %v2887_v58, 16  ;;  %v3092_v31 = vshll.u32 %v2888_v5, 16  ;;  %v3096_v46 = vshrl.u32 %v2888_v5, 16  ;;  %v3275_v38 = vshrl.u32 %v2911_v15, 16 }
 0x14b   : > { %5212 = vrot.lane.b32.xlu1 %v5211_v24, %s5272_s25  ;;  %1731 = vst.msk [vmem:[#allocation3 + $0x28] sm:$0xff] %vm1725_vm11, %v4949_v42  ;;  %1747 = vst.msk [vmem:[#allocation3 + $0xa8] sm:$0xff] %vm1725_vm11, %v4950_v14  ;;  %v3278_v41 = vshll.u32 %v2911_v15, 16  ;;  %5217 = vrot.lane.b32.xlu0 %v5216_v2, %s5273_s26  ;;  %v3085_v55 = vrot.slane %v3083_v63, 4  ;;  %v3284_v11 = vshll.u32 %v2912_v7, 16  ;;  %v3288_v1 = vshrl.u32 %v2912_v7, 16  ;;  %s6734_s25 = scalar_lea.vmem %s6841_s4, %s4276_s22 }
 0x14c   : > { %v6509_v3 = vpop.permute.xlu0 %5007  ;;  %2387 = vst.msk [vmem:[#allocation3 + $0x20] sm:$0xff] %vm2382_vm12, %v4954_v29  ;;  %2403 = vst.msk [vmem:[#allocation3 + $0xa0] sm:$0xff] %vm2382_vm12, %v4955_v37  ;;  %v3088_v44 = vrot.slane %v3086_v60, 5  ;;  %v3094_v61 = vrot.slane %v3092_v31, 5  ;;  %v3277_v20 = vrot.slane %v3275_v38, 4  ;;  %v452_v48 = vsel %vm5321_vm3, %v447_v22, %v451_v34 }
 0x14d   : > { %v3280_v52 = vrot.slane %v3278_v41, 5  ;;  %v3286_v25 = vrot.slane %v3284_v11, 5  ;;  %453 = vst [vmem:[#allocation2 + $0xc8] sm:$0x1] %v452_v48  ;;  %v3098_v51 = vrot.slane %v3096_v46, 4  ;;  %v3102_v35 = vshll.u32 %v2889_v40, 16 }
 0x14e   : > { %v6514_v54 = vpop.permute.xlu1 %5002  ;;  %v3089_v17 = vor.u32 %v3088_v44, %v3085_v55  ;;  %v3290_v6 = vrot.slane %v3288_v1, 4  ;;  %v4960_v19 = vunpack.i.h.bf16 %v6406_v16  ;;  %v4959_v18 = vunpack.i.l.bf16 %v6406_v16 }
 0x14f   : > { %5222 = vrot.lane.b32.xlu1 %v6497_v12, %s5273_s26  ;;  %v3281_v39 = vor.u32 %v3280_v52, %v3277_v20  ;;  %5227 = vrot.lane.b32.xlu0 %v5216_v2, %s5273_s26  ;;  %v3099_v57 = vor.u32 %v3098_v51, %v3094_v61  ;;  %v3104_v36 = vrot.slane %v3102_v35, 5  ;;  %v4965_v50 = vunpack.i.h.bf16 %v6433_v45 }
 0x150   : > { %v6521_v21 = vpop.permute.xlu0 %5017  ;;  %v3090_v0 = vrot.slane %v3089_v17, 4  ;;  %v3291_v43 = vor.u32 %v3290_v6, %v3286_v25  ;;  %3494 = vst.msk [vmem:[#allocation3 + $0x18] sm:$0xff] %vm3490_vm15, %v4959_v18  ;;  %3510 = vst.msk [vmem:[#allocation3 + $0x98] sm:$0xff] %vm3490_vm15, %v4960_v19  ;;  %v4964_v33 = vunpack.i.l.bf16 %v6433_v45  ;;  %v4970_v13 = vunpack.i.h.bf16 %v6429_v47 }
 0x151   : > { %v3282_v53 = vrot.slane %v3281_v39, 4  ;;  %v3525_v16 = vld [vmem:[#allocation3 + $0x10] sm:$0xff]  ;;  %v3100_v9 = vrot.slane %v3099_v57, 4  ;;  %2404 = vst.msk [vmem:[#allocation3 + $0xa8] sm:$0xff] %vm2382_vm12, %v4965_v50  ;;  %v4969_v58 = vunpack.i.l.bf16 %v6429_v47  ;;  %v4975_v2 = vunpack.i.h.bf16 %v6454_v28 }
 0x152   : > { %v6527_v56 = vpop.permute.xlu1 %5012  ;;  %v3541_v27 = vld [vmem:[#allocation3 + $0x90] sm:$0xff]  ;;  %v3095_v49 = vsel %vm5392_vm6, %v3090_v0, %v3094_v61  ;;  %4595 = vmatprep.mubr.msk.f32.mxu0 %vm3567_vm0, %v3525_v16  ;;  %v3292_v62 = vrot.slane %v3291_v43, 4  ;;  %2388 = vst.msk [vmem:[#allocation3 + $0x28] sm:$0xff] %vm2382_vm12, %v4964_v33  ;;  %v4974_v47 = vunpack.i.l.bf16 %v6454_v28  ;;  %v4979_v14 = vunpack.i.l.bf16 %v6451_v23 }
 0x153   : > { %4619 = vmatprep.mubr.msk.f32.mxu1 %vm3567_vm0, %v3541_v27  ;;  %5232 = vrot.lane.b32.xlu1 %v6497_v12, %s5273_s26  ;;  %v3287_v45 = vsel %vm5392_vm6, %v3282_v53, %v3286_v25  ;;  %v3344_v30 = vunpack.c.l.bf16 %v3095_v49  ;;  %2629 = vst.msk [vmem:[#allocation3 + $0xa0] sm:$0xff] %vm2608_vm13, %v4970_v13  ;;  %v3105_v24 = vsel %vm5392_vm6, %v3100_v9, %v3104_v36  ;;  %2613 = vst.msk [vmem:[#allocation3 + $0x20] sm:$0xff] %vm2608_vm13, %v4969_v58 }
 0x154   : > { %v6542_v8 = vpop.permute.xlu0 %5027  ;;  %v3360_v15 = vunpack.c.l.bf16 %v3287_v45  ;;  %2630 = vst.msk [vmem:[#allocation3 + $0xa8] sm:$0xff] %vm2608_vm13, %v4975_v2  ;;  %v4980_v12 = vunpack.i.h.bf16 %v6451_v23  ;;  %v2913_v42 = vld [vmem:[#allocation2 + $0xc8] sm:$0x1]  ;;  %v6559_v7 = vunpack.c.l.bf16 %v3105_v24  ;;  %2614 = vst.msk [vmem:[#allocation3 + $0x28] sm:$0xff] %vm2608_vm13, %v4974_v47  ;;  %v4985_v28 = vunpack.i.h.bf16 %v6469_v32 }
 0x155   : > { %v4984_v22 = vunpack.i.l.bf16 %v6469_v32  ;;  %v4990_v37 = vunpack.i.h.bf16 %v6462_v26  ;;  %v3294_v63 = vshll.u32 %v2913_v42, 16  ;;  %2838 = vst.msk [vmem:[#allocation3 + $0x20] sm:$0xff] %vm2833_vm14, %v4979_v14  ;;  %v4989_v60 = vunpack.i.l.bf16 %v6462_v26 }
 0x156   : > { %v6551_v5 = vpop.permute.xlu1 %5022  ;;  %v5236_v29 = vpack.i.bf16 %v3360_v15, %v3344_v30  ;;  %2854 = vst.msk [vmem:[#allocation3 + $0xa0] sm:$0xff] %vm2833_vm14, %v4980_v12  ;;  %v4995_v23 = vunpack.i.h.bf16 %v6490_v10  ;;  %v4994_v32 = vunpack.i.l.bf16 %v6490_v10  ;;  %v5000_v31 = vunpack.i.h.bf16 %v6483_v59 }
 0x157   : > { %1748 = vst.msk [vmem:[#allocation3 + $0xb0] sm:$0xff] %vm1725_vm11, %v4985_v28  ;;  %1732 = vst.msk [vmem:[#allocation3 + $0x30] sm:$0xff] %vm1725_vm11, %v4984_v22  ;;  %v4999_v46 = vunpack.i.l.bf16 %v6483_v59  ;;  %v5005_v38 = vunpack.i.h.bf16 %v6514_v54  ;;  %v3296_v26 = vrot.slane %v3294_v63, 5  ;;  %v3526_v40 = vld [vmem:[#allocation3 + $0x18] sm:$0xff]  ;;  %v5004_v44 = vunpack.i.l.bf16 %v6514_v54 }
 0x158   : > { %v5038_v34 = vpop.permute.xlu0 %5037  ;;  %2855 = vst.msk [vmem:[#allocation3 + $0xa8] sm:$0xff] %vm2833_vm14, %v4990_v37  ;;  %5237 = vrot.lane.b32.xlu0 %v5236_v29, %s5274_s27  ;;  %v3542_v55 = vld [vmem:[#allocation3 + $0x98] sm:$0xff]  ;;  %2839 = vst.msk [vmem:[#allocation3 + $0x28] sm:$0xff] %vm2833_vm14, %v4989_v60  ;;  %v5010_v10 = vunpack.i.h.bf16 %v6509_v3  ;;  %v5009_v11 = vunpack.i.l.bf16 %v6509_v3  ;;  %4596 = vmatmul.mubr.msk.f32.gmra.mrb[2].mxu0 %vm3567_vm0, %v3526_v40  ;;  %v5015_v59 = vunpack.i.h.bf16 %v6527_v56  ;;  %v5014_v54 = vunpack.i.l.bf16 %v6527_v56 }
 0x159   : > { %3511 = vst.msk [vmem:[#allocation3 + $0xa0] sm:$0xff] %vm3490_vm15, %v4995_v23  ;;  %4620 = vmatmul.mubr.msk.f32.gmra.mrb[2].mxu1 %vm3567_vm0, %v3542_v55  ;;  %3495 = vst.msk [vmem:[#allocation3 + $0x20] sm:$0xff] %vm3490_vm15, %v4994_v32  ;;  %v5020_v1 = vunpack.i.h.bf16 %v6521_v21  ;;  %v5019_v3 = vunpack.i.l.bf16 %v6521_v21  ;;  %v3297_v61 = vsel %vm5392_vm6, %v3292_v62, %v3296_v26  ;;  %v5025_v20 = vunpack.i.h.bf16 %v6551_v5 }
 0x15a   : > { %v5033_v41 = vpop.permute.xlu1 %5032  ;;  %1749 = vst.msk [vmem:[#allocation3 + $0xb8] sm:$0xff] %vm1725_vm11, %v5000_v31  ;;  %1733 = vst.msk [vmem:[#allocation3 + $0x38] sm:$0xff] %vm1725_vm11, %v4999_v46  ;;  %v5024_v52 = vunpack.i.l.bf16 %v6551_v5  ;;  %v5030_v48 = vunpack.i.h.bf16 %v6542_v8  ;;  %v3361_v25 = vunpack.c.l.bf16 %v3297_v61  ;;  %v5029_v4 = vunpack.i.l.bf16 %v6542_v8 }
 0x15b   : > { %2405 = vst.msk [vmem:[#allocation3 + $0xb0] sm:$0xff] %vm2382_vm12, %v5005_v38  ;;  %2389 = vst.msk [vmem:[#allocation3 + $0x30] sm:$0xff] %vm2382_vm12, %v5004_v44  ;;  %v5035_v51 = vunpack.i.h.bf16 %v5033_v41  ;;  %v5034_v35 = vunpack.i.l.bf16 %v5033_v41  ;;  %v5040_v39 = vunpack.i.h.bf16 %v5038_v34  ;;  %v5039_v6 = vunpack.i.l.bf16 %v5038_v34 }
 0x15c   : > { %3496 = vst.msk [vmem:[#allocation3 + $0x28] sm:$0xff] %vm3490_vm15, %v5009_v11  ;;  %3512 = vst.msk [vmem:[#allocation3 + $0xa8] sm:$0xff] %vm3490_vm15, %v5010_v10  ;;  %v5048_v17 = vpop.permute.xlu0 %5047  ;;  %v5241_v56 = vpack.i.bf16 %v3361_v25, %v6559_v7 }
 0x15d   : > { %2390 = vst.msk [vmem:[#allocation3 + $0x38] sm:$0xff] %vm2382_vm12, %v5014_v54  ;;  %2406 = vst.msk [vmem:[#allocation3 + $0xb8] sm:$0xff] %vm2382_vm12, %v5015_v59  ;;  %v5050_v0 = vunpack.i.h.bf16 %v5048_v17  ;;  %v5049_v57 = vunpack.i.l.bf16 %v5048_v17 }
 0x15e   : > { %2631 = vst.msk [vmem:[#allocation3 + $0xb0] sm:$0xff] %vm2608_vm13, %v5020_v1  ;;  %2615 = vst.msk [vmem:[#allocation3 + $0x30] sm:$0xff] %vm2608_vm13, %v5019_v3  ;;  %v5043_v21 = vpop.permute.xlu1 %5042  ;;  %5242 = vrot.lane.b32.xlu1 %v5241_v56, %s5274_s27 }
 0x15f   : > { %2616 = vst.msk [vmem:[#allocation3 + $0x38] sm:$0xff] %vm2608_vm13, %v5024_v52  ;;  %2632 = vst.msk [vmem:[#allocation3 + $0xb8] sm:$0xff] %vm2608_vm13, %v5025_v20  ;;  %v5045_v19 = vunpack.i.h.bf16 %v5043_v21  ;;  %v5044_v18 = vunpack.i.l.bf16 %v5043_v21 }
 0x160   : > { %2856 = vst.msk [vmem:[#allocation3 + $0xb0] sm:$0xff] %vm2833_vm14, %v5030_v48  ;;  %2840 = vst.msk [vmem:[#allocation3 + $0x30] sm:$0xff] %vm2833_vm14, %v5029_v4  ;;  %v3543_v36 = vld [vmem:[#allocation3 + $0xa0] sm:$0xff] }
 0x161   : > { %1734 = vst.msk [vmem:[#allocation3 + $0x40] sm:$0xff] %vm1725_vm11, %v5034_v35  ;;  %1750 = vst.msk [vmem:[#allocation3 + $0xc0] sm:$0xff] %vm1725_vm11, %v5035_v51  ;;  %v3527_v50 = vld [vmem:[#allocation3 + $0x20] sm:$0xff]  ;;  %4622 = vmatprep.mubr.msk.f32.mxu1 %vm3567_vm0, %v3543_v36 }
 0x162   : > { %2841 = vst.msk [vmem:[#allocation3 + $0x38] sm:$0xff] %vm2833_vm14, %v5039_v6  ;;  %2857 = vst.msk [vmem:[#allocation3 + $0xb8] sm:$0xff] %vm2833_vm14, %v5040_v39  ;;  %4598 = vmatprep.mubr.msk.f32.mxu0 %vm3567_vm0, %v3527_v50 }
 0x163   : > { %3497 = vst.msk [vmem:[#allocation3 + $0x30] sm:$0xff] %vm3490_vm15, %v5044_v18  ;;  %3513 = vst.msk [vmem:[#allocation3 + $0xb0] sm:$0xff] %vm3490_vm15, %v5045_v19  ;;  %v3528_v53 = vld [vmem:[#allocation3 + $0x28] sm:$0xff]  ;;  %v5053_v33 = vpop.permute.xlu1 %5052 }
 0x164   : > { %1735 = vst.msk [vmem:[#allocation3 + $0x48] sm:$0xff] %vm1725_vm11, %v5049_v57  ;;  %1751 = vst.msk [vmem:[#allocation3 + $0xc8] sm:$0xff] %vm1725_vm11, %v5050_v0  ;;  %v3544_v43 = vld [vmem:[#allocation3 + $0xa8] sm:$0xff]  ;;  %4599 = vmatmul.mubr.msk.f32.gmra.mrb[4].mxu0 %vm3567_vm0, %v3528_v53  ;;  %v5055_v13 = vunpack.i.h.bf16 %v5053_v33  ;;  %v5054_v16 = vunpack.i.l.bf16 %v5053_v33 }
 0x165   : > { %4623 = vmatmul.mubr.msk.f32.gmra.mrb[4].mxu1 %vm3567_vm0, %v3544_v43  ;;  %v5058_v27 = vpop.permute.xlu0 %5057 }
 0x166   : > { %2391 = vst.msk [vmem:[#allocation3 + $0x40] sm:$0xff] %vm2382_vm12, %v5054_v16  ;;  %2407 = vst.msk [vmem:[#allocation3 + $0xc0] sm:$0xff] %vm2382_vm12, %v5055_v13  ;;  %v5060_v58 = vunpack.i.h.bf16 %v5058_v27  ;;  %v5059_v2 = vunpack.i.l.bf16 %v5058_v27 }
 0x168   : > { %3498 = vst.msk [vmem:[#allocation3 + $0x38] sm:$0xff] %vm3490_vm15, %v5059_v2  ;;  %3514 = vst.msk [vmem:[#allocation3 + $0xb8] sm:$0xff] %vm3490_vm15, %v5060_v58 }
 0x169   : > { %v5063_v8 = vpop.permute.xlu1 %5062  ;;  %v5068_v45 = vpop.permute.xlu0 %5067 }
 0x16a   : > { %v3529_v49 = vld [vmem:[#allocation3 + $0x30] sm:$0xff]  ;;  %v5065_v30 = vunpack.i.h.bf16 %v5063_v8  ;;  %v5064_v62 = vunpack.i.l.bf16 %v5063_v8  ;;  %v5070_v47 = vunpack.i.h.bf16 %v5068_v45  ;;  %v5069_v5 = vunpack.i.l.bf16 %v5068_v45 }
 0x16b   : > { %v3545_v9 = vld [vmem:[#allocation3 + $0xb0] sm:$0xff]  ;;  %4601 = vmatprep.mubr.msk.f32.mxu0 %vm3567_vm0, %v3529_v49 }
 0x16c   : > { %4625 = vmatprep.mubr.msk.f32.mxu1 %vm3567_vm0, %v3545_v9  ;;  %2392 = vst.msk [vmem:[#allocation3 + $0x48] sm:$0xff] %vm2382_vm12, %v5064_v62  ;;  %2408 = vst.msk [vmem:[#allocation3 + $0xc8] sm:$0xff] %vm2382_vm12, %v5065_v30 }
 0x16d   : > { %2617 = vst.msk [vmem:[#allocation3 + $0x40] sm:$0xff] %vm2608_vm13, %v5069_v5  ;;  %2633 = vst.msk [vmem:[#allocation3 + $0xc0] sm:$0xff] %vm2608_vm13, %v5070_v47  ;;  %v5073_v15 = vpop.permute.xlu1 %5072  ;;  %v5078_v24 = vpop.permute.xlu0 %5077 }
 0x16e   : > { %v5075_v12 = vunpack.i.h.bf16 %v5073_v15  ;;  %v5074_v14 = vunpack.i.l.bf16 %v5073_v15  ;;  %v5080_v42 = vunpack.i.h.bf16 %v5078_v24  ;;  %v5079_v7 = vunpack.i.l.bf16 %v5078_v24 }
 0x16f   : > { %v3530_v28 = vld [vmem:[#allocation3 + $0x38] sm:$0xff] }
 0x170   : > { %v3546_v22 = vld [vmem:[#allocation3 + $0xb8] sm:$0xff]  ;;  %2618 = vst.msk [vmem:[#allocation3 + $0x48] sm:$0xff] %vm2608_vm13, %v5074_v14  ;;  %2634 = vst.msk [vmem:[#allocation3 + $0xc8] sm:$0xff] %vm2608_vm13, %v5075_v12  ;;  %4602 = vmatmul.mubr.msk.f32.gmra.mrb[6].mxu0 %vm3567_vm0, %v3530_v28 }
 0x171   : > { %2842 = vst.msk [vmem:[#allocation3 + $0x40] sm:$0xff] %vm2833_vm14, %v5079_v7  ;;  %2858 = vst.msk [vmem:[#allocation3 + $0xc0] sm:$0xff] %vm2833_vm14, %v5080_v42  ;;  %4626 = vmatmul.mubr.msk.f32.gmra.mrb[6].mxu1 %vm3567_vm0, %v3546_v22  ;;  %v5083_v37 = vpop.permute.xlu1 %5082  ;;  %v5088_v29 = vpop.permute.xlu0 %5087 }
 0x172   : > { %v5085_v63 = vunpack.i.h.bf16 %v5083_v37  ;;  %v5084_v60 = vunpack.i.l.bf16 %v5083_v37  ;;  %v5090_v23 = vunpack.i.h.bf16 %v5088_v29  ;;  %v5089_v34 = vunpack.i.l.bf16 %v5088_v29 }
 0x174   : > { %1752 = vst.msk [vmem:[#allocation3 + $0xd0] sm:$0xff] %vm1725_vm11, %v5085_v63  ;;  %1736 = vst.msk [vmem:[#allocation3 + $0x50] sm:$0xff] %vm1725_vm11, %v5084_v60 }
 0x175   : > { %2843 = vst.msk [vmem:[#allocation3 + $0x48] sm:$0xff] %vm2833_vm14, %v5089_v34  ;;  %2859 = vst.msk [vmem:[#allocation3 + $0xc8] sm:$0xff] %vm2833_vm14, %v5090_v23  ;;  %v5098_v32 = vpop.permute.xlu0 %5097 }
 0x176   : > { %v5100_v31 = vunpack.i.h.bf16 %v5098_v32  ;;  %v5099_v46 = vunpack.i.l.bf16 %v5098_v32 }
 0x178   : > { %1753 = vst.msk [vmem:[#allocation3 + $0xd8] sm:$0xff] %vm1725_vm11, %v5100_v31  ;;  %1737 = vst.msk [vmem:[#allocation3 + $0x58] sm:$0xff] %vm1725_vm11, %v5099_v46 }
 0x179   : > { %v5093_v38 = vpop.permute.xlu1 %5092 }
 0x17a   : > { %v5095_v41 = vunpack.i.h.bf16 %v5093_v38  ;;  %v5094_v26 = vunpack.i.l.bf16 %v5093_v38 }
 0x17c   : > { %3499 = vst.msk [vmem:[#allocation3 + $0x40] sm:$0xff] %vm3490_vm15, %v5094_v26  ;;  %3515 = vst.msk [vmem:[#allocation3 + $0xc0] sm:$0xff] %vm3490_vm15, %v5095_v41 }
 0x181   : > { %v5103_v40 = vpop.permute.xlu1 %5102 }
 0x182   : > { %v5105_v55 = vunpack.i.h.bf16 %v5103_v40  ;;  %v5104_v44 = vunpack.i.l.bf16 %v5103_v40 }
 0x183   : > { %v5108_v10 = vpop.permute.xlu0 %5107  ;;  %v3531_v11 = vld [vmem:[#allocation3 + $0x40] sm:$0xff] }
 0x184   : > { %2393 = vst.msk [vmem:[#allocation3 + $0x50] sm:$0xff] %vm2382_vm12, %v5104_v44  ;;  %2409 = vst.msk [vmem:[#allocation3 + $0xd0] sm:$0xff] %vm2382_vm12, %v5105_v55  ;;  %v3547_v59 = vld [vmem:[#allocation3 + $0xc0] sm:$0xff]  ;;  %v5110_v54 = vunpack.i.h.bf16 %v5108_v10  ;;  %v5109_v1 = vunpack.i.l.bf16 %v5108_v10  ;;  %4604 = vmatprep.mubr.msk.f32.mxu0 %vm3567_vm0, %v3531_v11 }
 0x185   : > { %4628 = vmatprep.mubr.msk.f32.mxu1 %vm3567_vm0, %v3547_v59 }
 0x186   : > { %v5113_v3 = vpop.permute.xlu1 %5112  ;;  %3500 = vst.msk [vmem:[#allocation3 + $0x48] sm:$0xff] %vm3490_vm15, %v5109_v1  ;;  %3516 = vst.msk [vmem:[#allocation3 + $0xc8] sm:$0xff] %vm3490_vm15, %v5110_v54 }
 0x187   : > { %v5115_v61 = vunpack.i.h.bf16 %v5113_v3  ;;  %v5114_v20 = vunpack.i.l.bf16 %v5113_v3  ;;  %v5118_v52 = vpop.permute.xlu0 %5117 }
 0x188   : > { %v5120_v48 = vunpack.i.h.bf16 %v5118_v52  ;;  %v5119_v17 = vunpack.i.l.bf16 %v5118_v52 }
 0x189   : > { %2394 = vst.msk [vmem:[#allocation3 + $0x58] sm:$0xff] %vm2382_vm12, %v5114_v20  ;;  %2410 = vst.msk [vmem:[#allocation3 + $0xd8] sm:$0xff] %vm2382_vm12, %v5115_v61 }
 0x18a   : > { %v5123_v25 = vpop.permute.xlu1 %5122  ;;  %2635 = vst.msk [vmem:[#allocation3 + $0xd0] sm:$0xff] %vm2608_vm13, %v5120_v48  ;;  %2619 = vst.msk [vmem:[#allocation3 + $0x50] sm:$0xff] %vm2608_vm13, %v5119_v17 }
 0x18b   : > { %v5125_v4 = vunpack.i.h.bf16 %v5123_v25  ;;  %v5124_v51 = vunpack.i.l.bf16 %v5123_v25  ;;  %v5128_v35 = vpop.permute.xlu0 %5127 }
 0x18c   : > { %v5130_v21 = vunpack.i.h.bf16 %v5128_v35  ;;  %v5129_v39 = vunpack.i.l.bf16 %v5128_v35 }
 0x18d   : > { %2620 = vst.msk [vmem:[#allocation3 + $0x58] sm:$0xff] %vm2608_vm13, %v5124_v51  ;;  %2636 = vst.msk [vmem:[#allocation3 + $0xd8] sm:$0xff] %vm2608_vm13, %v5125_v4  ;;  %v3532_v19 = vld [vmem:[#allocation3 + $0x48] sm:$0xff] }
 0x18e   : > { %v5133_v6 = vpop.permute.xlu1 %5132  ;;  %v3548_v18 = vld [vmem:[#allocation3 + $0xc8] sm:$0xff]  ;;  %2844 = vst.msk [vmem:[#allocation3 + $0x50] sm:$0xff] %vm2833_vm14, %v5129_v39  ;;  %2860 = vst.msk [vmem:[#allocation3 + $0xd0] sm:$0xff] %vm2833_vm14, %v5130_v21  ;;  %4605 = vmatmul.mubr.msk.f32.gmra.mrb[8].mxu0 %vm3567_vm0, %v3532_v19 }
 0x18f   : > { %v5135_v56 = vunpack.i.h.bf16 %v5133_v6  ;;  %v5134_v0 = vunpack.i.l.bf16 %v5133_v6  ;;  %4629 = vmatmul.mubr.msk.f32.gmra.mrb[8].mxu1 %vm3567_vm0, %v3548_v18  ;;  %v5138_v57 = vpop.permute.xlu0 %5137 }
 0x190   : > { %v5140_v36 = vunpack.i.h.bf16 %v5138_v57  ;;  %v5139_v50 = vunpack.i.l.bf16 %v5138_v57 }
 0x191   : > { %1738 = vst.msk [vmem:[#allocation3 + $0x60] sm:$0xff] %vm1725_vm11, %v5134_v0  ;;  %1754 = vst.msk [vmem:[#allocation3 + $0xe0] sm:$0xff] %vm1725_vm11, %v5135_v56 }
 0x192   : > { %2845 = vst.msk [vmem:[#allocation3 + $0x58] sm:$0xff] %vm2833_vm14, %v5139_v50  ;;  %2861 = vst.msk [vmem:[#allocation3 + $0xd8] sm:$0xff] %vm2833_vm14, %v5140_v36 }
 0x193   : > { %v5143_v53 = vpop.permute.xlu1 %5142  ;;  %v5148_v13 = vpop.permute.xlu0 %5147 }
 0x194   : > { %v5145_v43 = vunpack.i.h.bf16 %v5143_v53  ;;  %v5144_v33 = vunpack.i.l.bf16 %v5143_v53  ;;  %v5150_v16 = vunpack.i.h.bf16 %v5148_v13  ;;  %v5149_v27 = vunpack.i.l.bf16 %v5148_v13 }
 0x196   : > { %3501 = vst.msk [vmem:[#allocation3 + $0x50] sm:$0xff] %vm3490_vm15, %v5144_v33  ;;  %3517 = vst.msk [vmem:[#allocation3 + $0xd0] sm:$0xff] %vm3490_vm15, %v5145_v43 }
 0x197   : > { %1739 = vst.msk [vmem:[#allocation3 + $0x68] sm:$0xff] %vm1725_vm11, %v5149_v27  ;;  %1755 = vst.msk [vmem:[#allocation3 + $0xe8] sm:$0xff] %vm1725_vm11, %v5150_v16 }
 0x198   : > { %v5153_v49 = vpop.permute.xlu1 %5152 }
 0x199   : > { %v5155_v9 = vunpack.i.h.bf16 %v5153_v49  ;;  %v5154_v58 = vunpack.i.l.bf16 %v5153_v49 }
 0x19b   : > { %2395 = vst.msk [vmem:[#allocation3 + $0x60] sm:$0xff] %vm2382_vm12, %v5154_v58  ;;  %2411 = vst.msk [vmem:[#allocation3 + $0xe0] sm:$0xff] %vm2382_vm12, %v5155_v9 }
 0x19d   : > { %v3533_v2 = vld [vmem:[#allocation3 + $0x50] sm:$0xff]  ;;  %v5158_v45 = vpop.permute.xlu0 %5157 }
 0x19e   : > { %v3549_v8 = vld [vmem:[#allocation3 + $0xd0] sm:$0xff]  ;;  %4607 = vmatprep.mubr.msk.f32.mxu0 %vm3567_vm0, %v3533_v2  ;;  %v5160_v30 = vunpack.i.h.bf16 %v5158_v45  ;;  %v5159_v62 = vunpack.i.l.bf16 %v5158_v45 }
 0x19f   : > { %4631 = vmatprep.mubr.msk.f32.mxu1 %vm3567_vm0, %v3549_v8  ;;  %v6724_v45 = vld [vmem:[%s6840_s3] ss:$0 sm:$0xff] }
 0x1a0   : > { %3502 = vst.msk [vmem:[#allocation3 + $0x58] sm:$0xff] %vm3490_vm15, %v5159_v62  ;;  %3518 = vst.msk [vmem:[#allocation3 + $0xd8] sm:$0xff] %vm3490_vm15, %v5160_v30  ;;  %v5163_v47 = vpop.permute.xlu1 %5162 }
 0x1a1   : > { %v5165_v5 = vunpack.i.h.bf16 %v5163_v47  ;;  %v5164_v15 = vunpack.i.l.bf16 %v5163_v47  ;;  %v5168_v24 = vpop.permute.xlu0 %5167 }
 0x1a2   : > { %v5170_v12 = vunpack.i.h.bf16 %v5168_v24  ;;  %v5169_v14 = vunpack.i.l.bf16 %v5168_v24 }
 0x1a3   : > { %2396 = vst.msk [vmem:[#allocation3 + $0x68] sm:$0xff] %vm2382_vm12, %v5164_v15  ;;  %2412 = vst.msk [vmem:[#allocation3 + $0xe8] sm:$0xff] %vm2382_vm12, %v5165_v5 }
 0x1a4   : > { %2621 = vst.msk [vmem:[#allocation3 + $0x60] sm:$0xff] %vm2608_vm13, %v5169_v14  ;;  %2637 = vst.msk [vmem:[#allocation3 + $0xe0] sm:$0xff] %vm2608_vm13, %v5170_v12  ;;  %v5173_v42 = vpop.permute.xlu1 %5172 }
 0x1a5   : > { %v5175_v7 = vunpack.i.h.bf16 %v5173_v42  ;;  %v5174_v28 = vunpack.i.l.bf16 %v5173_v42  ;;  %v5178_v22 = vpop.permute.xlu0 %5177 }
 0x1a6   : > { %v5180_v37 = vunpack.i.h.bf16 %v5178_v22  ;;  %v5179_v29 = vunpack.i.l.bf16 %v5178_v22 }
 0x1a7   : > { %2622 = vst.msk [vmem:[#allocation3 + $0x68] sm:$0xff] %vm2608_vm13, %v5174_v28  ;;  %2638 = vst.msk [vmem:[#allocation3 + $0xe8] sm:$0xff] %vm2608_vm13, %v5175_v7  ;;  %v3534_v63 = vld [vmem:[#allocation3 + $0x58] sm:$0xff] }
 0x1a8   : > { %v3550_v60 = vld [vmem:[#allocation3 + $0xd8] sm:$0xff]  ;;  %2846 = vst.msk [vmem:[#allocation3 + $0x60] sm:$0xff] %vm2833_vm14, %v5179_v29  ;;  %2862 = vst.msk [vmem:[#allocation3 + $0xe0] sm:$0xff] %vm2833_vm14, %v5180_v37  ;;  %v5183_v23 = vpop.permute.xlu1 %5182  ;;  %4608 = vmatmul.mubr.msk.f32.gmra.mrb[10].mxu0 %vm3567_vm0, %v3534_v63 }
 0x1a9   : > { %4632 = vmatmul.mubr.msk.f32.gmra.mrb[10].mxu1 %vm3567_vm0, %v3550_v60  ;;  %v5185_v34 = vunpack.i.h.bf16 %v5183_v23  ;;  %v5184_v32 = vunpack.i.l.bf16 %v5183_v23  ;;  %v5188_v31 = vpop.permute.xlu0 %5187 }
 0x1aa   : > { %v5190_v46 = vunpack.i.h.bf16 %v5188_v31  ;;  %v5189_v38 = vunpack.i.l.bf16 %v5188_v31 }
 0x1ab   : > { %1756 = vst.msk [vmem:[#allocation3 + $0xf0] sm:$0xff] %vm1725_vm11, %v5185_v34  ;;  %1740 = vst.msk [vmem:[#allocation3 + $0x70] sm:$0xff] %vm1725_vm11, %v5184_v32 }
 0x1ac   : > { %2847 = vst.msk [vmem:[#allocation3 + $0x68] sm:$0xff] %vm2833_vm14, %v5189_v38  ;;  %2863 = vst.msk [vmem:[#allocation3 + $0xe8] sm:$0xff] %vm2833_vm14, %v5190_v46 }
 0x1ad   : > { %v5198_v41 = vpop.permute.xlu0 %5197 }
 0x1ae   : > { %v5200_v26 = vunpack.i.h.bf16 %v5198_v41  ;;  %v5199_v40 = vunpack.i.l.bf16 %v5198_v41  ;;  %v5193_v55 = vpop.permute.xlu1 %5192 }
 0x1af   : > { %v5195_v44 = vunpack.i.h.bf16 %v5193_v55  ;;  %v5194_v10 = vunpack.i.l.bf16 %v5193_v55 }
 0x1b0   : > { %1757 = vst.msk [vmem:[#allocation3 + $0xf8] sm:$0xff] %vm1725_vm11, %v5200_v26  ;;  %1741 = vst.msk [vmem:[#allocation3 + $0x78] sm:$0xff] %vm1725_vm11, %v5199_v40 }
 0x1b1   : > { %3503 = vst.msk [vmem:[#allocation3 + $0x60] sm:$0xff] %vm3490_vm15, %v5194_v10  ;;  %3519 = vst.msk [vmem:[#allocation3 + $0xe0] sm:$0xff] %vm3490_vm15, %v5195_v44 }
 0x1b7   : > { %v5203_v11 = vpop.permute.xlu1 %5202 }
 0x1b8   : > { %v5205_v59 = vunpack.i.h.bf16 %v5203_v11  ;;  %v5204_v54 = vunpack.i.l.bf16 %v5203_v11  ;;  %v3535_v1 = vld [vmem:[#allocation3 + $0x60] sm:$0xff] }
 0x1b9   : > { %v3551_v3 = vld [vmem:[#allocation3 + $0xe0] sm:$0xff]  ;;  %v5208_v61 = vpop.permute.xlu0 %5207  ;;  %4610 = vmatprep.mubr.msk.f32.mxu0 %vm3567_vm0, %v3535_v1 }
 0x1ba   : > { %2397 = vst.msk [vmem:[#allocation3 + $0x70] sm:$0xff] %vm2382_vm12, %v5204_v54  ;;  %2413 = vst.msk [vmem:[#allocation3 + $0xf0] sm:$0xff] %vm2382_vm12, %v5205_v59  ;;  %4634 = vmatprep.mubr.msk.f32.mxu1 %vm3567_vm0, %v3551_v3  ;;  %v5210_v20 = vunpack.i.h.bf16 %v5208_v61  ;;  %v5209_v52 = vunpack.i.l.bf16 %v5208_v61 }
 0x1bc   : > { %3504 = vst.msk [vmem:[#allocation3 + $0x68] sm:$0xff] %vm3490_vm15, %v5209_v52  ;;  %3520 = vst.msk [vmem:[#allocation3 + $0xe8] sm:$0xff] %vm3490_vm15, %v5210_v20 }
 0x1bd   : > { %v5213_v48 = vpop.permute.xlu1 %5212  ;;  %v5218_v4 = vpop.permute.xlu0 %5217 }
 0x1be   : > { %v5215_v17 = vunpack.i.h.bf16 %v5213_v48  ;;  %v5214_v25 = vunpack.i.l.bf16 %v5213_v48  ;;  %v5220_v51 = vunpack.i.h.bf16 %v5218_v4  ;;  %v5219_v35 = vunpack.i.l.bf16 %v5218_v4 }
 0x1c0   : > { %2398 = vst.msk [vmem:[#allocation3 + $0x78] sm:$0xff] %vm2382_vm12, %v5214_v25  ;;  %2414 = vst.msk [vmem:[#allocation3 + $0xf8] sm:$0xff] %vm2382_vm12, %v5215_v17 }
 0x1c1   : > { %2639 = vst.msk [vmem:[#allocation3 + $0xf0] sm:$0xff] %vm2608_vm13, %v5220_v51  ;;  %2623 = vst.msk [vmem:[#allocation3 + $0x70] sm:$0xff] %vm2608_vm13, %v5219_v35  ;;  %v5223_v21 = vpop.permute.xlu1 %5222  ;;  %v5228_v19 = vpop.permute.xlu0 %5227 }
 0x1c2   : > { %v5225_v39 = vunpack.i.h.bf16 %v5223_v21  ;;  %v5224_v6 = vunpack.i.l.bf16 %v5223_v21  ;;  %v5230_v18 = vunpack.i.h.bf16 %v5228_v19  ;;  %v5229_v56 = vunpack.i.l.bf16 %v5228_v19 }
 0x1c3   : > { %v3536_v0 = vld [vmem:[#allocation3 + $0x68] sm:$0xff] }
 0x1c4   : > { %2624 = vst.msk [vmem:[#allocation3 + $0x78] sm:$0xff] %vm2608_vm13, %v5224_v6  ;;  %2640 = vst.msk [vmem:[#allocation3 + $0xf8] sm:$0xff] %vm2608_vm13, %v5225_v39  ;;  %v3552_v57 = vld [vmem:[#allocation3 + $0xe8] sm:$0xff]  ;;  %4611 = vmatmul.mubr.msk.f32.gmra.mrb[12].mxu0 %vm3567_vm0, %v3536_v0 }
 0x1c5   : > { %2848 = vst.msk [vmem:[#allocation3 + $0x70] sm:$0xff] %vm2833_vm14, %v5229_v56  ;;  %2864 = vst.msk [vmem:[#allocation3 + $0xf0] sm:$0xff] %vm2833_vm14, %v5230_v18  ;;  %v5233_v36 = vpop.permute.xlu1 %5232  ;;  %4635 = vmatmul.mubr.msk.f32.gmra.mrb[12].mxu1 %vm3567_vm0, %v3552_v57 }
 0x1c6   : > { %v5235_v50 = vunpack.i.h.bf16 %v5233_v36  ;;  %v5234_v53 = vunpack.i.l.bf16 %v5233_v36 }
 0x1c8   : > { %2849 = vst.msk [vmem:[#allocation3 + $0x78] sm:$0xff] %vm2833_vm14, %v5234_v53  ;;  %2865 = vst.msk [vmem:[#allocation3 + $0xf8] sm:$0xff] %vm2833_vm14, %v5235_v50 }
 0x1ca   : > { %v5238_v43 = vpop.permute.xlu0 %5237 }
 0x1cb   : > { %v5240_v33 = vunpack.i.h.bf16 %v5238_v43  ;;  %v5239_v13 = vunpack.i.l.bf16 %v5238_v43 }
 0x1cd   : > { %3505 = vst.msk [vmem:[#allocation3 + $0x70] sm:$0xff] %vm3490_vm15, %v5239_v13  ;;  %3521 = vst.msk [vmem:[#allocation3 + $0xf0] sm:$0xff] %vm3490_vm15, %v5240_v33 }
 0x1d0   : > { %v5243_v16 = vpop.permute.xlu1 %5242 }
 0x1d1   : > { %v5245_v27 = vunpack.i.h.bf16 %v5243_v16  ;;  %v5244_v49 = vunpack.i.l.bf16 %v5243_v16 }
 0x1d3   : > { %3506 = vst.msk [vmem:[#allocation3 + $0x78] sm:$0xff] %vm3490_vm15, %v5244_v49  ;;  %3522 = vst.msk [vmem:[#allocation3 + $0xf8] sm:$0xff] %vm3490_vm15, %v5245_v27 }
 0x1d4   : > { %v3537_v9 = vld [vmem:[#allocation3 + $0x70] sm:$0xff] }
 0x1d5   : > { %v3553_v58 = vld [vmem:[#allocation3 + $0xf0] sm:$0xff]  ;;  %4613 = vmatprep.mubr.msk.f32.mxu0 %vm3567_vm0, %v3537_v9 }
 0x1d6   : > { %4637 = vmatprep.mubr.msk.f32.mxu1 %vm3567_vm0, %v3553_v58 }
 0x1da   : > { %v3538_v2 = vld [vmem:[#allocation3 + $0x78] sm:$0xff] }
 0x1db   : > { %v3554_v8 = vld [vmem:[#allocation3 + $0xf8] sm:$0xff]  ;;  %4614 = vmatmul.mubr.msk.f32.gmra.mrb[14].mxu0 %vm3567_vm0, %v3538_v2 }
 0x1dc   : > { %4638 = vmatmul.mubr.msk.f32.gmra.mrb[14].mxu1 %vm3567_vm0, %v3554_v8 }
 0x215   : > { %v4594_v30 = vpop.f32.mrb[0].mxu0 }
 0x216   : > { %v3740_v62 = vadd.f32 %v4594_v30, %v6724_v45  ;;  %v4618_v47 = vpop.f32.mrb[0].mxu1  ;;  %v3734_v5 = vpop.f32.mrb[1].mxu0 }
 0x217   : > { %v3820_v15 = vadd.f32 %v4618_v47, %v6724_v45  ;;  %v3735_v24 = vadd.f32 %v6724_v45, %v3734_v5  ;;  %v3814_v12 = vpop.f32.mrb[1].mxu1 }
 0x218   : > { %v3894_v14 = vmax.f32 %v3740_v62, 0.0  ;;  %v3815_v42 = vadd.f32 %v6724_v45, %v3814_v12 }
 0x219   : > { %v3910_v7 = vmax.f32 %v3820_v15, 0.0  ;;  %v3893_v28 = vmax.f32 %v3735_v24, 0.0 }
 0x21a   : > { %v4278_v22 = vpack.c.bf16 %v3894_v14, %v3894_v14  ;;  %v3909_v37 = vmax.f32 %v3815_v42, 0.0 }
 0x21b   : > { %v4294_v29 = vpack.c.bf16 %v3910_v7, %v3910_v7  ;;  %v4277_v63 = vpack.c.bf16 %v3893_v28, %v3893_v28 }
 0x21c   : > { %4055 = vst.msk [vmem:[%s6734_s25 + $0x4] sm:$0xf] %vm4053_vm2, %v4278_v22  ;;  %v4293_v60 = vpack.c.bf16 %v3909_v37, %v3909_v37 }
 0x21d   : > { %4071 = vst.msk [vmem:[%s6734_s25 + $0x44] sm:$0xf] %vm4053_vm2, %v4294_v29  ;;  %4054 = vst.msk [vmem:[%s6734_s25] sm:$0xf] %vm4053_vm2, %v4277_v63 }
 0x21e   : > { %4070 = vst.msk [vmem:[%s6734_s25 + $0x40] sm:$0xf] %vm4053_vm2, %v4293_v60 }
 0x22b   : > { %v4597_v23 = vpop.f32.mrb[2].mxu0 }
 0x22c   : > { %v4621_v34 = vpop.f32.mrb[2].mxu1  ;;  %v3750_v32 = vadd.f32 %v4597_v23, %v6724_v45  ;;  %v3744_v46 = vpop.f32.mrb[3].mxu0 }
 0x22d   : > { %v3830_v31 = vadd.f32 %v4621_v34, %v6724_v45  ;;  %v3824_v38 = vpop.f32.mrb[3].mxu1  ;;  %v3745_v41 = vadd.f32 %v6724_v45, %v3744_v46 }
 0x22e   : > { %v3825_v26 = vadd.f32 %v6724_v45, %v3824_v38  ;;  %v3896_v40 = vmax.f32 %v3750_v32, 0.0 }
 0x22f   : > { %v3912_v55 = vmax.f32 %v3830_v31, 0.0  ;;  %v3895_v44 = vmax.f32 %v3745_v41, 0.0 }
 0x230   : > { %v3911_v10 = vmax.f32 %v3825_v26, 0.0  ;;  %v4280_v11 = vpack.c.bf16 %v3896_v40, %v3896_v40 }
 0x231   : > { %v4296_v59 = vpack.c.bf16 %v3912_v55, %v3912_v55  ;;  %v4279_v54 = vpack.c.bf16 %v3895_v44, %v3895_v44 }
 0x232   : > { %v4295_v1 = vpack.c.bf16 %v3911_v10, %v3911_v10  ;;  %4057 = vst.msk [vmem:[%s6734_s25 + $0xc] sm:$0xf] %vm4053_vm2, %v4280_v11 }
 0x233   : > { %4073 = vst.msk [vmem:[%s6734_s25 + $0x4c] sm:$0xf] %vm4053_vm2, %v4296_v59  ;;  %4056 = vst.msk [vmem:[%s6734_s25 + $0x8] sm:$0xf] %vm4053_vm2, %v4279_v54 }
 0x234   : > { %4072 = vst.msk [vmem:[%s6734_s25 + $0x48] sm:$0xf] %vm4053_vm2, %v4295_v1 }
 0x237   : > { %v4600_v3 = vpop.f32.mrb[4].mxu0 }
 0x238   : > { %v4624_v61 = vpop.f32.mrb[4].mxu1  ;;  %v3760_v20 = vadd.f32 %v4600_v3, %v6724_v45  ;;  %v3754_v48 = vpop.f32.mrb[5].mxu0 }
 0x239   : > { %v3840_v52 = vadd.f32 %v4624_v61, %v6724_v45  ;;  %v3834_v17 = vpop.f32.mrb[5].mxu1  ;;  %v3755_v25 = vadd.f32 %v6724_v45, %v3754_v48 }
 0x23a   : > { %v3835_v4 = vadd.f32 %v6724_v45, %v3834_v17  ;;  %v3898_v51 = vmax.f32 %v3760_v20, 0.0 }
 0x23b   : > { %v3914_v35 = vmax.f32 %v3840_v52, 0.0  ;;  %v3897_v21 = vmax.f32 %v3755_v25, 0.0 }
 0x23c   : > { %v3913_v39 = vmax.f32 %v3835_v4, 0.0  ;;  %v4282_v6 = vpack.c.bf16 %v3898_v51, %v3898_v51 }
 0x23d   : > { %v4298_v19 = vpack.c.bf16 %v3914_v35, %v3914_v35  ;;  %v4281_v18 = vpack.c.bf16 %v3897_v21, %v3897_v21 }
 0x23e   : > { %v4297_v56 = vpack.c.bf16 %v3913_v39, %v3913_v39  ;;  %4059 = vst.msk [vmem:[%s6734_s25 + $0x14] sm:$0xf] %vm4053_vm2, %v4282_v6 }
 0x23f   : > { %4075 = vst.msk [vmem:[%s6734_s25 + $0x54] sm:$0xf] %vm4053_vm2, %v4298_v19  ;;  %4058 = vst.msk [vmem:[%s6734_s25 + $0x10] sm:$0xf] %vm4053_vm2, %v4281_v18 }
 0x240   : > { %4074 = vst.msk [vmem:[%s6734_s25 + $0x50] sm:$0xf] %vm4053_vm2, %v4297_v56 }
 0x243   : > { %v4603_v0 = vpop.f32.mrb[6].mxu0 }
 0x244   : > { %v4627_v57 = vpop.f32.mrb[6].mxu1  ;;  %v3770_v36 = vadd.f32 %v4603_v0, %v6724_v45  ;;  %v3764_v53 = vpop.f32.mrb[7].mxu0 }
 0x245   : > { %v3850_v50 = vadd.f32 %v4627_v57, %v6724_v45  ;;  %v3844_v43 = vpop.f32.mrb[7].mxu1  ;;  %v3765_v33 = vadd.f32 %v6724_v45, %v3764_v53 }
 0x246   : > { %v3845_v13 = vadd.f32 %v6724_v45, %v3844_v43  ;;  %v3900_v16 = vmax.f32 %v3770_v36, 0.0 }
 0x247   : > { %v3916_v27 = vmax.f32 %v3850_v50, 0.0  ;;  %v3899_v49 = vmax.f32 %v3765_v33, 0.0 }
 0x248   : > { %v3915_v9 = vmax.f32 %v3845_v13, 0.0  ;;  %v4284_v58 = vpack.c.bf16 %v3900_v16, %v3900_v16 }
 0x249   : > { %v4300_v2 = vpack.c.bf16 %v3916_v27, %v3916_v27  ;;  %v4283_v8 = vpack.c.bf16 %v3899_v49, %v3899_v49 }
 0x24a   : > { %v4299_v30 = vpack.c.bf16 %v3915_v9, %v3915_v9  ;;  %4061 = vst.msk [vmem:[%s6734_s25 + $0x1c] sm:$0xf] %vm4053_vm2, %v4284_v58 }
 0x24b   : > { %4077 = vst.msk [vmem:[%s6734_s25 + $0x5c] sm:$0xf] %vm4053_vm2, %v4300_v2  ;;  %4060 = vst.msk [vmem:[%s6734_s25 + $0x18] sm:$0xf] %vm4053_vm2, %v4283_v8 }
 0x24c   : > { %4076 = vst.msk [vmem:[%s6734_s25 + $0x58] sm:$0xf] %vm4053_vm2, %v4299_v30 }
 0x261   : > { %v4606_v62 = vpop.f32.mrb[8].mxu0 }
 0x262   : > { %v4630_v47 = vpop.f32.mrb[8].mxu1  ;;  %v3780_v5 = vadd.f32 %v4606_v62, %v6724_v45  ;;  %v3774_v24 = vpop.f32.mrb[9].mxu0 }
 0x263   : > { %v3860_v15 = vadd.f32 %v4630_v47, %v6724_v45  ;;  %v3854_v12 = vpop.f32.mrb[9].mxu1  ;;  %v3775_v14 = vadd.f32 %v6724_v45, %v3774_v24 }
 0x264   : > { %v3855_v42 = vadd.f32 %v6724_v45, %v3854_v12  ;;  %v3902_v7 = vmax.f32 %v3780_v5, 0.0 }
 0x265   : > { %v3918_v28 = vmax.f32 %v3860_v15, 0.0  ;;  %v3901_v22 = vmax.f32 %v3775_v14, 0.0 }
 0x266   : > { %v3917_v37 = vmax.f32 %v3855_v42, 0.0  ;;  %v4286_v29 = vpack.c.bf16 %v3902_v7, %v3902_v7 }
 0x267   : > { %v4302_v63 = vpack.c.bf16 %v3918_v28, %v3918_v28  ;;  %v4285_v60 = vpack.c.bf16 %v3901_v22, %v3901_v22 }
 0x268   : > { %v4301_v23 = vpack.c.bf16 %v3917_v37, %v3917_v37  ;;  %4063 = vst.msk [vmem:[%s6734_s25 + $0x24] sm:$0xf] %vm4053_vm2, %v4286_v29 }
 0x269   : > { %4079 = vst.msk [vmem:[%s6734_s25 + $0x64] sm:$0xf] %vm4053_vm2, %v4302_v63  ;;  %4062 = vst.msk [vmem:[%s6734_s25 + $0x20] sm:$0xf] %vm4053_vm2, %v4285_v60 }
 0x26a   : > { %4078 = vst.msk [vmem:[%s6734_s25 + $0x60] sm:$0xf] %vm4053_vm2, %v4301_v23 }
 0x27b   : > { %v4609_v34 = vpop.f32.mrb[10].mxu0 }
 0x27c   : > { %v4633_v32 = vpop.f32.mrb[10].mxu1  ;;  %v3790_v31 = vadd.f32 %v4609_v34, %v6724_v45  ;;  %v3784_v38 = vpop.f32.mrb[11].mxu0 }
 0x27d   : > { %v3870_v46 = vadd.f32 %v4633_v32, %v6724_v45  ;;  %v3864_v41 = vpop.f32.mrb[11].mxu1  ;;  %v3785_v26 = vadd.f32 %v6724_v45, %v3784_v38 }
 0x27e   : > { %v3865_v40 = vadd.f32 %v6724_v45, %v3864_v41  ;;  %v3904_v55 = vmax.f32 %v3790_v31, 0.0 }
 0x27f   : > { %v3920_v44 = vmax.f32 %v3870_v46, 0.0  ;;  %v3903_v10 = vmax.f32 %v3785_v26, 0.0 }
 0x280   : > { %v3919_v11 = vmax.f32 %v3865_v40, 0.0  ;;  %v4288_v59 = vpack.c.bf16 %v3904_v55, %v3904_v55 }
 0x281   : > { %v4304_v54 = vpack.c.bf16 %v3920_v44, %v3920_v44  ;;  %v4287_v1 = vpack.c.bf16 %v3903_v10, %v3903_v10 }
 0x282   : > { %v4303_v3 = vpack.c.bf16 %v3919_v11, %v3919_v11  ;;  %4065 = vst.msk [vmem:[%s6734_s25 + $0x2c] sm:$0xf] %vm4053_vm2, %v4288_v59 }
 0x283   : > { %4081 = vst.msk [vmem:[%s6734_s25 + $0x6c] sm:$0xf] %vm4053_vm2, %v4304_v54  ;;  %4064 = vst.msk [vmem:[%s6734_s25 + $0x28] sm:$0xf] %vm4053_vm2, %v4287_v1 }
 0x284   : > { %4080 = vst.msk [vmem:[%s6734_s25 + $0x68] sm:$0xf] %vm4053_vm2, %v4303_v3 }
 0x297   : > { %v4612_v61 = vpop.f32.mrb[12].mxu0 }
 0x298   : > { %v4636_v20 = vpop.f32.mrb[12].mxu1  ;;  %v3800_v52 = vadd.f32 %v4612_v61, %v6724_v45  ;;  %v3794_v17 = vpop.f32.mrb[13].mxu0 }
 0x299   : > { %v3880_v48 = vadd.f32 %v4636_v20, %v6724_v45  ;;  %v3874_v25 = vpop.f32.mrb[13].mxu1  ;;  %v3795_v4 = vadd.f32 %v6724_v45, %v3794_v17 }
 0x29a   : > { %v3875_v51 = vadd.f32 %v6724_v45, %v3874_v25  ;;  %v3906_v35 = vmax.f32 %v3800_v52, 0.0 }
 0x29b   : > { %v3922_v21 = vmax.f32 %v3880_v48, 0.0  ;;  %v3905_v39 = vmax.f32 %v3795_v4, 0.0 }
 0x29c   : > { %v3921_v6 = vmax.f32 %v3875_v51, 0.0  ;;  %v4290_v19 = vpack.c.bf16 %v3906_v35, %v3906_v35 }
 0x29d   : > { %v4306_v18 = vpack.c.bf16 %v3922_v21, %v3922_v21  ;;  %v4289_v56 = vpack.c.bf16 %v3905_v39, %v3905_v39 }
 0x29e   : > { %v4305_v0 = vpack.c.bf16 %v3921_v6, %v3921_v6  ;;  %4067 = vst.msk [vmem:[%s6734_s25 + $0x34] sm:$0xf] %vm4053_vm2, %v4290_v19 }
 0x29f   : > { %4083 = vst.msk [vmem:[%s6734_s25 + $0x74] sm:$0xf] %vm4053_vm2, %v4306_v18  ;;  %4066 = vst.msk [vmem:[%s6734_s25 + $0x30] sm:$0xf] %vm4053_vm2, %v4289_v56 }
 0x2a0   : > { %4082 = vst.msk [vmem:[%s6734_s25 + $0x70] sm:$0xf] %vm4053_vm2, %v4305_v0 }
 0x2ae   : > { %v4615_v57 = vpop.f32.mrb[14].mxu0 }
 0x2af   : > { %v4639_v36 = vpop.f32.mrb[14].mxu1  ;;  %v3810_v50 = vadd.f32 %v4615_v57, %v6724_v45  ;;  %v3804_v43 = vpop.f32.mrb[15].mxu0 }
 0x2b0   : > { %v3890_v53 = vadd.f32 %v4639_v36, %v6724_v45  ;;  %v3884_v33 = vpop.f32.mrb[15].mxu1  ;;  %v3805_v13 = vadd.f32 %v6724_v45, %v3804_v43 }
 0x2b1   : > { %v3885_v16 = vadd.f32 %v6724_v45, %v3884_v33  ;;  %v3908_v27 = vmax.f32 %v3810_v50, 0.0 }
 0x2b2   : > { %v3924_v49 = vmax.f32 %v3890_v53, 0.0  ;;  %v3907_v9 = vmax.f32 %v3805_v13, 0.0 }
 0x2b3   : > { %v3923_v58 = vmax.f32 %v3885_v16, 0.0  ;;  %v4292_v2 = vpack.c.bf16 %v3908_v27, %v3908_v27 }
 0x2b4   : > { %v4308_v8 = vpack.c.bf16 %v3924_v49, %v3924_v49  ;;  %v4291_v30 = vpack.c.bf16 %v3907_v9, %v3907_v9 }
 0x2b5   : > { %v4307_v62 = vpack.c.bf16 %v3923_v58, %v3923_v58  ;;  %4069 = vst.msk [vmem:[%s6734_s25 + $0x3c] sm:$0xf] %vm4053_vm2, %v4292_v2 }
 0x2b6   : > { %4085 = vst.msk [vmem:[%s6734_s25 + $0x7c] sm:$0xf] %vm4053_vm2, %v4308_v8  ;;  %4068 = vst.msk [vmem:[%s6734_s25 + $0x38] sm:$0xf] %vm4053_vm2, %v4291_v30 }
 0x2b7   : > { %4084 = vst.msk [vmem:[%s6734_s25 + $0x78] sm:$0xf] %vm4053_vm2, %v4307_v62 }
 0x2b8 PF: > { %s14_s17 = sadd.s32 1, %s5268_s17   ;;  %s6846_s15 = smov %s5264_s16 }
 0x2b9   : > { %p11_p5 = scmp.ge.s32.totalorder %s14_s17, 4   ;;  %s6847_s16 = smov %s6849_s18 }
 0x2bb   :  { %13 = sbr.rel (!%p11_p5) target bundleno = 2 (0x2), region = 71 }

</bundles_post_ra>
